<compile_context>
chip_gen: v7x
topology: tpu7x:2x2x1
jax: 0.10.0
libtpu: 0.0.40
codegen_flags: <defaults>
</compile_context>

<pallas_src>
import functools
import math

import jax
import jax.numpy as jnp
from jax.experimental import pallas as pl
from jax.experimental.pallas import tpu as pltpu

LANE = 128


def _round_up(x, m):
    return ((x + m - 1) // m) * m


# ----------------------------------------------------------------------------
# In-kernel math helpers
# ----------------------------------------------------------------------------

def _erf_approx(x):
    # Abramowitz & Stegun 7.1.26; max abs error ~1.5e-7 (f32-accurate).
    a1, a2, a3, a4, a5 = 0.254829592, -0.284496736, 1.421413741, -1.453152027, 1.061405429
    p = 0.3275911
    sgn = jnp.where(x >= 0.0, 1.0, -1.0)
    ax = jnp.abs(x)
    t = 1.0 / (1.0 + p * ax)
    poly = ((((a5 * t + a4) * t + a3) * t + a2) * t + a1) * t
    return sgn * (1.0 - poly * jnp.exp(-(ax * ax)))


def _gelu_exact(x):
    return 0.5 * x * (1.0 + _erf_approx(x * (1.0 / math.sqrt(2.0))))


# ----------------------------------------------------------------------------
# Kernel 1: per-phase, block-diagonally packed streams
#   input Linear+ReLU -> L x (MHA, LN1, FFN+GELU, LN2) -> final LN * alpha
# grid = (2,)  [bef, now], dimension_semantics = ("parallel",)
# ----------------------------------------------------------------------------

def _phase_kernel(x_ref, inw_ref, w_ref, vec_ref, o_ref,
                  *, B, S, L, head_slices, seg_bounds, eps):
    Dp = o_ref.shape[-1]
    Fp = x_ref.shape[-1]
    M = B * S

    lane = jax.lax.broadcasted_iota(jnp.int32, (1, Dp), 1)

    # Hoist all lane masks once (JAX does not CSE broadcasts).
    seg_masks = [jnp.logical_and(lane >= lo, lane < hi).astype(jnp.float32)
                 for (lo, hi) in seg_bounds]
    head_masks = [jnp.logical_and(lane >= lo, lane < lo + dh).astype(jnp.float32)
                  for (lo, dh) in head_slices]

    vecs = vec_ref[0]                                              # (R, Dp) in VMEM

    def row(r):
        return vecs[r].reshape(1, Dp)

    def seg_layernorm(x, g, b):
        # Per-stream (segment) LayerNorm; padded lanes outside all segments stay 0.
        y = jnp.zeros_like(x)
        for (lo, hi), m in zip(seg_bounds, seg_masks):
            inv_w = 1.0 / float(hi - lo)
            mu = jnp.sum(x * m, axis=-1, keepdims=True) * inv_w
            diff = (x - mu) * m
            var = jnp.sum(diff * diff, axis=-1, keepdims=True) * inv_w
            y = y + diff * jax.lax.rsqrt(var + eps)
        return y * g + b

    x = x_ref[0].reshape(M, Fp)                                    # (M, Fp)

    # Input Linear + ReLU (block-diagonal over streams).
    h = jnp.dot(x, inw_ref[0], preferred_element_type=jnp.float32) + row(0)
    h = jnp.maximum(h, 0.0)                                        # (M, Dp)

    for l in range(L):
        w = w_ref[0, l]                                            # (Dp, 6*Dp)
        r0 = 3 + 10 * l
        qkv_w = w[:, 0:3 * Dp]
        out_w = w[:, 3 * Dp:4 * Dp]
        ff1_w = w[:, 4 * Dp:5 * Dp]
        ff2_w = w[:, 5 * Dp:6 * Dp]
        qkv_b = jnp.concatenate([row(r0 + 0), row(r0 + 1), row(r0 + 2)], axis=-1)

        # ---- self-attention (probs never leave VMEM) ----
        qkv = jnp.dot(h, qkv_w, preferred_element_type=jnp.float32) + qkv_b
        q = qkv[:, 0:Dp].reshape(B, S, Dp)
        k = qkv[:, Dp:2 * Dp].reshape(B, S, Dp)
        v = qkv[:, 2 * Dp:3 * Dp].reshape(B, S, Dp)

        attn3 = jnp.zeros((B, S, Dp), jnp.float32)
        for (lo, dh), m in zip(head_slices, head_masks):
            scale = 1.0 / math.sqrt(dh)
            # Lane-masked q keeps the contraction restricted to this head's lanes
            # while staying 128-lane dense on the MXU.
            s = jnp.einsum("bqd,bkd->bqk", q * (m * scale), k,
                           preferred_element_type=jnp.float32)     # (B, S, S)
            s = s - jnp.max(s, axis=-1, keepdims=True)
            e = jnp.exp(s)
            p = e / jnp.sum(e, axis=-1, keepdims=True)
            attn3 = attn3 + jnp.einsum("bqk,bkd->bqd", p, v * m,
                                       preferred_element_type=jnp.float32)
        attn = jnp.dot(attn3.reshape(M, Dp), out_w,
                       preferred_element_type=jnp.float32) + row(r0 + 3)

        h = seg_layernorm(h + attn, row(r0 + 4), row(r0 + 5))

        # ---- feed-forward ----
        f = jnp.dot(h, ff1_w, preferred_element_type=jnp.float32) + row(r0 + 6)
        f = _gelu_exact(f)
        f = jnp.dot(f, ff2_w, preferred_element_type=jnp.float32) + row(r0 + 7)

        h = seg_layernorm(h + f, row(r0 + 8), row(r0 + 9))

    # Final encoder LayerNorm with per-stream alpha pre-folded into gamma/beta.
    h = seg_layernorm(h, row(1), row(2))
    o_ref[0] = h.reshape(B, S, Dp)


def run_phase_encoder(x, enc, B, S):
    Dp, Fp, L = enc["Dp"], enc["Fp"], enc["L"]
    R = enc["vec_blob"].shape[1]
    return pl.pallas_call(
        functools.partial(_phase_kernel, B=B, S=S, L=L,
                          head_slices=tuple(enc["head_slices"]),
                          seg_bounds=tuple(enc["seg_bounds"]), eps=1e-5),
        grid=(2,),
        in_specs=[pl.BlockSpec((1, B, S, Fp), lambda i: (i, 0, 0, 0)),
                  pl.BlockSpec((1, Fp, Dp), lambda i: (i, 0, 0)),
                  pl.BlockSpec((1, L, Dp, 6 * Dp), lambda i: (i, 0, 0, 0)),
                  pl.BlockSpec((1, R, Dp), lambda i: (i, 0, 0))],
        out_specs=pl.BlockSpec((1, B, S, Dp), lambda i: (i, 0, 0, 0)),
        out_shape=jax.ShapeDtypeStruct((2, B, S, Dp), jnp.float32),
        compiler_params=pltpu.CompilerParams(dimension_semantics=("parallel",)),
    )(x, enc["in_w"], enc["w_blob"], enc["vec_blob"])


# ----------------------------------------------------------------------------
# Kernel 2: mean_weight attentions + weighted-mean pooling + classifier, fused.
# grid = (1,). Consumes kernel 1's packed (2,B,S,Dp) output directly.
# ----------------------------------------------------------------------------

def _pool_clf_kernel(x_ref, pw_ref, pb_ref, cw_ref, cb_ref, emb_ref, out_ref,
                     *, B, S, Dov, nhead, sigmoid):
    Dp = x_ref.shape[-1]
    M = B * S
    dh = Dov // nhead
    scale = 1.0 / math.sqrt(dh)
    lane = jax.lax.broadcasted_iota(jnp.int32, (1, Dp), 1)
    head_masks = [jnp.logical_and(lane >= hd * dh, lane < (hd + 1) * dh).astype(jnp.float32)
                  for hd in range(nhead)]

    embs = []
    for ph in range(2):
        xb = x_ref[ph]                                              # (B, S, Dp)
        x2 = xb.reshape(M, Dp)
        pw = pw_ref[ph]                                             # (2, Dp, Dp)
        pb = pb_ref[ph]                                             # (2, Dp)
        q = (jnp.dot(x2, pw[0], preferred_element_type=jnp.float32)
             + pb[0].reshape(1, Dp)).reshape(B, S, Dp)
        k = (jnp.dot(x2, pw[1], preferred_element_type=jnp.float32)
             + pb[1].reshape(1, Dp)).reshape(B, S, Dp)

        pm = jnp.zeros((B, S, S), jnp.float32)
        for m in head_masks:
            s = jnp.einsum("bqd,bkd->bqk", q * (m * scale), k,
                           preferred_element_type=jnp.float32)
            s = s - jnp.max(s, axis=-1, keepdims=True)
            e = jnp.exp(s)
            pm = pm + e / jnp.sum(e, axis=-1, keepdims=True)
        pm = pm * (1.0 / nhead)                                     # head-averaged probs

        # mean_q( sum_k pm[b,q,k] * x[b,k,:] ) == (1/S) * sum_k (sum_q pm) * x
        o3 = jnp.einsum("bqk,bkd->bqd", pm, xb, preferred_element_type=jnp.float32)
        embs.append(jnp.sum(o3, axis=1) * (1.0 / S))                # (B, Dp)

    emb = jnp.concatenate(embs, axis=-1)                            # (B, 2*Dp)
    emb_ref[...] = emb

    y = jnp.dot(emb, cw_ref[...], preferred_element_type=jnp.float32) + cb_ref[...]
    if sigmoid:
        y = 1.0 / (1.0 + jnp.exp(-y))
    out_ref[...] = y


def run_pool_clf(enc_out, pool, clf, B, S):
    Dp = pool["Dp"]
    Kp = 2 * Dp
    Np = clf["Np"]
    return pl.pallas_call(
        functools.partial(_pool_clf_kernel, B=B, S=S, Dov=pool["Dov"],
                          nhead=pool["nhead"], sigmoid=(clf["act"] == "sigmoid")),
        grid=(1,),
        in_specs=[pl.BlockSpec((2, B, S, Dp), lambda i: (0, 0, 0, 0)),
                  pl.BlockSpec((2, 2, Dp, Dp), lambda i: (0, 0, 0, 0)),
                  pl.BlockSpec((2, 2, Dp), lambda i: (0, 0, 0)),
                  pl.BlockSpec((Kp, Np), lambda i: (0, 0)),
                  pl.BlockSpec((1, Np), lambda i: (0, 0))],
        out_specs=(pl.BlockSpec((B, Kp), lambda i: (0, 0)),
                   pl.BlockSpec((B, Np), lambda i: (0, 0))),
        out_shape=(jax.ShapeDtypeStruct((B, Kp), jnp.float32),
                   jax.ShapeDtypeStruct((B, Np), jnp.float32)),
    )(enc_out, pool["w"], pool["b"], clf["w"], clf["b"])


# ----------------------------------------------------------------------------
# Parameter packing (pad / transpose / block-diagonalize ONCE, outside jit)
# ----------------------------------------------------------------------------

def prepare_model(params):
    cfg = params["cfg"]
    # Per-phase stream order must match final_embed concat order: talk, gaze, me, char.
    stream_specs = [
        ("talk_in_{p}", "enc_talk_{p}", "talk_alpha_{p}", int(cfg["head_talk"])),
        ("gaze_in_{p}", "enc_gaze_{p}", "gaze_alpha_{p}", int(cfg["head_gaze"])),
        ("me_in_{p}", "enc_me_{p}", "me_alpha_{p}", int(cfg["head_me_gaze"])),
        ("char_in_{p}", "enc_char_{p}", "char_alpha_{p}", int(cfg["head_gaze"])),
    ]

    hid_dims, fea_dims = [], []
    for ink, _, _, _ in stream_specs:
        w = params[ink.format(p="bef")]["w"]
        hid_dims.append(int(w.shape[0]))
        fea_dims.append(int(w.shape[1]))
    hid_off = [0]
    for d in hid_dims:
        hid_off.append(hid_off[-1] + d)
    fea_off = [0]
    for f in fea_dims:
        fea_off.append(fea_off[-1] + f)
    Dtot, Ftot = hid_off[-1], fea_off[-1]
    Dp = _round_up(Dtot, LANE)
    Fp = _round_up(Ftot, LANE)
    L = len(params["enc_talk_bef"]["layers"])

    head_slices, seg_bounds = [], []
    for s, (_, _, _, nhead) in enumerate(stream_specs):
        D = hid_dims[s]
        assert D % nhead == 0
        dh = D // nhead
        seg_bounds.append((hid_off[s], hid_off[s] + D))
        for j in range(nhead):
            head_slices.append((hid_off[s] + j * dh, dh))

    in_ws, w_blobs, vec_blobs = [], [], []
    for phase in ("bef", "now"):
        in_w = jnp.zeros((Fp, Dp), jnp.float32)
        vec = jnp.zeros((3 + 10 * L, Dp), jnp.float32)
        wb = jnp.zeros((L, Dp, 6 * Dp), jnp.float32)

        for s, (ink, enck, alk, _) in enumerate(stream_specs):
            ip = params[ink.format(p=phase)]
            ep = params[enck.format(p=phase)]
            alpha = jnp.asarray(params[alk.format(p=phase)], jnp.float32)
            D, ho, fo = hid_dims[s], hid_off[s], fea_off[s]

            in_w = in_w.at[fo:fo + fea_dims[s], ho:ho + D].set(
                jnp.asarray(ip["w"], jnp.float32).T)
            vec = vec.at[0, ho:ho + D].set(jnp.asarray(ip["b"], jnp.float32))
            # alpha folded into the final encoder LayerNorm of this stream's segment.
            vec = vec.at[1, ho:ho + D].set(jnp.asarray(ep["norm_g"], jnp.float32) * alpha)
            vec = vec.at[2, ho:ho + D].set(jnp.asarray(ep["norm_b"], jnp.float32) * alpha)

            for l, lp in enumerate(ep["layers"]):
                a = lp["attn"]
                ipw = jnp.asarray(a["in_proj_w"], jnp.float32)
                ipb = jnp.asarray(a["in_proj_b"], jnp.float32)
                assert lp["lin1_w"].shape[0] == D, "block-diag packing needs ff == hidden"
                r0 = 3 + 10 * l
                wb = wb.at[l, ho:ho + D, 0 * Dp + ho:0 * Dp + ho + D].set(ipw[0:D].T)
                wb = wb.at[l, ho:ho + D, 1 * Dp + ho:1 * Dp + ho + D].set(ipw[D:2 * D].T)
                wb = wb.at[l, ho:ho + D, 2 * Dp + ho:2 * Dp + ho + D].set(ipw[2 * D:3 * D].T)
                wb = wb.at[l, ho:ho + D, 3 * Dp + ho:3 * Dp + ho + D].set(
                    jnp.asarray(a["out_proj_w"], jnp.float32).T)
                wb = wb.at[l, ho:ho + D, 4 * Dp + ho:4 * Dp + ho + D].set(
                    jnp.asarray(lp["lin1_w"], jnp.float32).T)
                wb = wb.at[l, ho:ho + D, 5 * Dp + ho:5 * Dp + ho + D].set(
                    jnp.asarray(lp["lin2_w"], jnp.float32).T)
                vec = vec.at[r0 + 0, ho:ho + D].set(ipb[0:D])
                vec = vec.at[r0 + 1, ho:ho + D].set(ipb[D:2 * D])
                vec = vec.at[r0 + 2, ho:ho + D].set(ipb[2 * D:3 * D])
                vec = vec.at[r0 + 3, ho:ho + D].set(jnp.asarray(a["out_proj_b"], jnp.float32))
                vec = vec.at[r0 + 4, ho:ho + D].set(jnp.asarray(lp["norm1_g"], jnp.float32))
                vec = vec.at[r0 + 5, ho:ho + D].set(jnp.asarray(lp["norm1_b"], jnp.float32))
                vec = vec.at[r0 + 6, ho:ho + D].set(jnp.asarray(lp["lin1_b"], jnp.float32))
                vec = vec.at[r0 + 7, ho:ho + D].set(jnp.asarray(lp["lin2_b"], jnp.float32))
                vec = vec.at[r0 + 8, ho:ho + D].set(jnp.asarray(lp["norm2_g"], jnp.float32))
                vec = vec.at[r0 + 9, ho:ho + D].set(jnp.asarray(lp["norm2_b"], jnp.float32))
        in_ws.append(in_w)
        w_blobs.append(wb)
        vec_blobs.append(vec)

    enc = dict(in_w=jnp.stack(in_ws), w_blob=jnp.stack(w_blobs),
               vec_blob=jnp.stack(vec_blobs), Dp=Dp, Fp=Fp, L=L,
               Dtot=Dtot, Ftot=Ftot, head_slices=head_slices, seg_bounds=seg_bounds)

    # mean_weight MHA: only Q/K projections needed (attn output & V are discarded).
    Dov = Dtot

    def pack_pool(mha):
        ipw = jnp.asarray(mha["in_proj_w"], jnp.float32)
        ipb = jnp.asarray(mha["in_proj_b"], jnp.float32)
        w = jnp.zeros((2, Dp, Dp), jnp.float32)
        b = jnp.zeros((2, Dp), jnp.float32)
        w = w.at[0, 0:Dov, 0:Dov].set(ipw[0:Dov].T)
        w = w.at[1, 0:Dov, 0:Dov].set(ipw[Dov:2 * Dov].T)
        b = b.at[0, 0:Dov].set(ipb[0:Dov])
        b = b.at[1, 0:Dov].set(ipb[Dov:2 * Dov])
        return w, b

    pwb, pbb = pack_pool(params["mean_w_bef"])
    pwn, pbn = pack_pool(params["mean_w_now"])
    pool = dict(w=jnp.stack([pwb, pwn]), b=jnp.stack([pbb, pbn]),
                Dov=Dov, Dp=Dp, nhead=2)

    out_dim = int(cfg["out_dim"])
    Np = _round_up(out_dim, LANE)
    wclf = jnp.asarray(params["clf"]["w"], jnp.float32)             # (out_dim, 2*Dov)
    cw = jnp.zeros((2 * Dp, Np), jnp.float32)
    cw = cw.at[0:Dov, 0:out_dim].set(wclf[:, 0:Dov].T)
    cw = cw.at[Dp:Dp + Dov, 0:out_dim].set(wclf[:, Dov:2 * Dov].T)
    cb = jnp.zeros((1, Np), jnp.float32).at[0, 0:out_dim].set(
        jnp.asarray(params["clf"]["b"], jnp.float32))
    clf = dict(w=cw, b=cb, Np=Np, out_dim=out_dim,
               act="sigmoid" if out_dim == 1 else "none")

    return dict(enc=enc, pool=pool, clf=clf)


# ----------------------------------------------------------------------------
# Forward pass (2 pallas_call launches + a couple of trivial XLA glue ops)
# ----------------------------------------------------------------------------

def att_new_3_forward(prep,
                      talk_bef, candi_bef, right_bef, middle_bef, left_bef, char_bef,
                      talk_now, candi_now, right_now, middle_now, left_now, char_now):
    B, S, _ = talk_bef.shape
    enc = prep["enc"]
    Fp, Ftot = enc["Fp"], enc["Ftot"]

    def pack_phase(talk, right, middle, left, candi, char):
        parts = [p.astype(jnp.float32) for p in (talk, right, middle, left, candi, char)]
        if Fp > Ftot:
            parts.append(jnp.zeros((B, S, Fp - Ftot), jnp.float32))
        return jnp.concatenate(parts, axis=2)                       # (B, S, Fp)

    x = jnp.stack([pack_phase(talk_bef, right_bef, middle_bef, left_bef, candi_bef, char_bef),
                   pack_phase(talk_now, right_now, middle_now, left_now, candi_now, char_now)],
                  axis=0)                                            # (2, B, S, Fp)

    enc_out = run_phase_encoder(x, enc, B, S)                        # (2, B, S, Dp)
    emb_p, logits_p = run_pool_clf(enc_out, prep["pool"], prep["clf"], B, S)

    Dov, Dp = prep["pool"]["Dov"], prep["pool"]["Dp"]
    if Dov == Dp:
        final_embed = emb_p
    else:
        final_embed = jnp.concatenate([emb_p[:, :Dov], emb_p[:, Dp:Dp + Dov]], axis=1)
    final_input = logits_p[:, :prep["clf"]["out_dim"]]
    return final_embed, final_input


# ----------------------------------------------------------------------------
# Deterministic parameter init (shapes follow ATT_NEW_3.__init__)
# ----------------------------------------------------------------------------

def _xavier(key, out_dim, in_dim):
    std = math.sqrt(2.0 / (in_dim + out_dim))
    return std * jax.random.normal(key, (out_dim, in_dim), jnp.float32)


def init_linear(key, out_dim, in_dim):
    kw, kb = jax.random.split(key)
    return {"w": _xavier(kw, out_dim, in_dim),
            "b": 0.01 * jax.random.normal(kb, (out_dim,), jnp.float32)}


def init_mha(key, d):
    k1, k2 = jax.random.split(key)
    return {"in_proj_w": _xavier(k1, 3 * d, d),
            "in_proj_b": jnp.zeros((3 * d,), jnp.float32),
            "out_proj_w": _xavier(k2, d, d),
            "out_proj_b": jnp.zeros((d,), jnp.float32)}


def init_encoder_layer(key, d, ff):
    k_attn, k1, k2 = jax.random.split(key, 3)
    l1 = init_linear(k1, ff, d)
    l2 = init_linear(k2, d, ff)
    return {"attn": init_mha(k_attn, d),
            "lin1_w": l1["w"], "lin1_b": l1["b"],
            "lin2_w": l2["w"], "lin2_b": l2["b"],
            "norm1_g": jnp.ones((d,), jnp.float32), "norm1_b": jnp.zeros((d,), jnp.float32),
            "norm2_g": jnp.ones((d,), jnp.float32), "norm2_b": jnp.zeros((d,), jnp.float32)}


def init_encoder(key, d, ff, n_layers):
    ks = jax.random.split(key, n_layers)
    return {"layers": [init_encoder_layer(k, d, ff) for k in ks],
            "norm_g": jnp.ones((d,), jnp.float32),
            "norm_b": jnp.zeros((d,), jnp.float32)}


def init_att_new_3(key, talk_fea, talk_hidden, me_gaze_fea, me_gaze_hidden,
                   gaze_fea, gaze_hidden, char_hidden, layer_num,
                   tfm_head_talk, tfm_head_gaze, head_me_gaze, out_dim):
    keys = iter(jax.random.split(key, 32))
    overall = talk_hidden + gaze_hidden + me_gaze_hidden + char_hidden
    p = {"cfg": dict(head_talk=tfm_head_talk, head_gaze=tfm_head_gaze,
                     head_me_gaze=head_me_gaze, out_dim=out_dim)}

    p["talk_in_bef"] = init_linear(next(keys), talk_hidden, talk_fea)
    p["talk_in_now"] = init_linear(next(keys), talk_hidden, talk_fea)
    p["talk_alpha_bef"] = jnp.float32(1.0)
    p["talk_alpha_now"] = jnp.float32(1.0)
    p["enc_talk_bef"] = init_encoder(next(keys), talk_hidden, talk_hidden, layer_num)
    p["enc_talk_now"] = init_encoder(next(keys), talk_hidden, talk_hidden, layer_num)

    p["gaze_in_bef"] = init_linear(next(keys), gaze_hidden, gaze_fea * 3)
    p["gaze_in_now"] = init_linear(next(keys), gaze_hidden, gaze_fea * 3)
    p["gaze_alpha_bef"] = jnp.float32(1.0)
    p["gaze_alpha_now"] = jnp.float32(1.0)
    p["enc_gaze_bef"] = init_encoder(next(keys), gaze_hidden, gaze_hidden, layer_num)
    p["enc_gaze_now"] = init_encoder(next(keys), gaze_hidden, gaze_hidden, layer_num)

    p["me_in_bef"] = init_linear(next(keys), me_gaze_hidden, me_gaze_fea)
    p["me_in_now"] = init_linear(next(keys), me_gaze_hidden, me_gaze_fea)
    p["me_alpha_bef"] = jnp.float32(1.0)
    p["me_alpha_now"] = jnp.float32(1.0)
    p["enc_me_bef"] = init_encoder(next(keys), me_gaze_hidden, me_gaze_hidden, layer_num)
    p["enc_me_now"] = init_encoder(next(keys), me_gaze_hidden, me_gaze_hidden, layer_num)

    p["char_in_bef"] = init_linear(next(keys), char_hidden, gaze_fea)
    p["char_in_now"] = init_linear(next(keys), char_hidden, gaze_fea)
    p["char_alpha_bef"] = jnp.float32(1.0)
    p["char_alpha_now"] = jnp.float32(1.0)
    p["enc_char_bef"] = init_encoder(next(keys), char_hidden, char_hidden, layer_num)
    p["enc_char_now"] = init_encoder(next(keys), char_hidden, char_hidden, layer_num)

    p["mean_w_bef"] = init_mha(next(keys), overall)
    p["mean_w_now"] = init_mha(next(keys), overall)
    p["clf"] = init_linear(next(keys), out_dim, overall * 2)
    return p


# ----------------------------------------------------------------------------
# Main
# ----------------------------------------------------------------------------

if __name__ == "__main__":
    B, S = 2, 8
    talk_fea, me_gaze_fea, gaze_fea = 16, 12, 8
    talk_hidden = gaze_hidden = me_gaze_hidden = char_hidden = 32
    layer_num = 1
    tfm_head_talk = tfm_head_gaze = head_me_gaze = 2
    out_dim = 1

    key = jax.random.PRNGKey(0)
    pkey, dkey = jax.random.split(key)
    params = init_att_new_3(pkey, talk_fea, talk_hidden, me_gaze_fea, me_gaze_hidden,
                            gaze_fea, gaze_hidden, char_hidden, layer_num,
                            tfm_head_talk, tfm_head_gaze, head_me_gaze, out_dim)
    prep = prepare_model(params)   # block-diag pack / pad / transpose all weights once

    dks = jax.random.split(dkey, 12)
    mk = lambda k, f: jax.random.normal(k, (B, S, f), jnp.float32)
    talk_bef, talk_now = mk(dks[0], talk_fea), mk(dks[1], talk_fea)
    candi_bef, candi_now = mk(dks[2], me_gaze_fea), mk(dks[3], me_gaze_fea)
    right_bef, right_now = mk(dks[4], gaze_fea), mk(dks[5], gaze_fea)
    middle_bef, middle_now = mk(dks[6], gaze_fea), mk(dks[7], gaze_fea)
    left_bef, left_now = mk(dks[8], gaze_fea), mk(dks[9], gaze_fea)
    char_bef, char_now = mk(dks[10], gaze_fea), mk(dks[11], gaze_fea)

    fwd = jax.jit(functools.partial(att_new_3_forward, prep))
    final_embed, final_input = fwd(talk_bef, candi_bef, right_bef, middle_bef,
                                   left_bef, char_bef, talk_now, candi_now,
                                   right_now, middle_now, left_now, char_now)
    jax.block_until_ready((final_embed, final_input))

    overall = talk_hidden + gaze_hidden + me_gaze_hidden + char_hidden
    assert final_embed.shape == (B, 2 * overall)
    assert final_input.shape == (B, out_dim)
    assert bool(jnp.all(jnp.isfinite(final_embed)))
    assert bool(jnp.all(jnp.isfinite(final_input)))
    print("KERNEL_OK")
</pallas_src>

<mosaic_0001>
module attributes {stable_mosaic.version = 11 : i64} {
  func.func @_pool_clf_kernel(%arg0: i32, %arg1: memref<2x2x8x128xf32, #tpu.memory_space<vmem>>, %arg2: memref<2x2x128x128xf32, #tpu.memory_space<vmem>>, %arg3: memref<2x2x128xf32, #tpu.memory_space<vmem>>, %arg4: memref<256x128xf32, #tpu.memory_space<vmem>>, %arg5: memref<1x128xf32, #tpu.memory_space<vmem>>, %arg6: memref<2x256xf32, #tpu.memory_space<vmem>>, %arg7: memref<2x128xf32, #tpu.memory_space<vmem>>) attributes {dimension_semantics = [#tpu.dimension_semantics<arbitrary>], iteration_bounds = array<i64: 1>, scalar_prefetch = 0 : i64, scratch_operands = 0 : i64, tpu.core_type = #tpu.core_type<tc>, window_params = [{pipeline_mode = #tpu.pipeline_mode<synchronous>, transform_indices = @transform_0, window_bounds = array<i64: 2, 2, 8, 128>}, {pipeline_mode = #tpu.pipeline_mode<synchronous>, transform_indices = @transform_1, window_bounds = array<i64: 2, 2, 128, 128>}, {pipeline_mode = #tpu.pipeline_mode<synchronous>, transform_indices = @transform_2, window_bounds = array<i64: 2, 2, 128>}, {pipeline_mode = #tpu.pipeline_mode<synchronous>, transform_indices = @transform_3, window_bounds = array<i64: 256, 128>}, {pipeline_mode = #tpu.pipeline_mode<synchronous>, transform_indices = @transform_4, window_bounds = array<i64: 1, 128>}, {pipeline_mode = #tpu.pipeline_mode<synchronous>, transform_indices = @transform_5, window_bounds = array<i64: 2, 256>}, {pipeline_mode = #tpu.pipeline_mode<synchronous>, transform_indices = @transform_6, window_bounds = array<i64: 2, 128>}]} {
    %0 = tpu.iota {dimensions = array<i32: 1>} : vector<1x128xi32>
    %c0_i32 = arith.constant 0 : i32
    %1 = vector.broadcast %c0_i32 : i32 to vector<1x128xi32>
    %2 = arith.cmpi sge, %0, %1 : vector<1x128xi32>
    %c64_i32 = arith.constant 64 : i32
    %3 = vector.broadcast %c64_i32 : i32 to vector<1x128xi32>
    %4 = arith.cmpi slt, %0, %3 : vector<1x128xi32>
    %5 = arith.andi %2, %4 : vector<1x128xi1>
    %6 = arith.extui %5 : vector<1x128xi1> to vector<1x128xi32>
    %7 = arith.sitofp %6 : vector<1x128xi32> to vector<1x128xf32>
    %c64_i32_0 = arith.constant 64 : i32
    %8 = vector.broadcast %c64_i32_0 : i32 to vector<1x128xi32>
    %9 = arith.cmpi sge, %0, %8 : vector<1x128xi32>
    %c128_i32 = arith.constant 128 : i32
    %10 = vector.broadcast %c128_i32 : i32 to vector<1x128xi32>
    %11 = arith.cmpi slt, %0, %10 : vector<1x128xi32>
    %12 = arith.andi %9, %11 : vector<1x128xi1>
    %13 = arith.extui %12 : vector<1x128xi1> to vector<1x128xi32>
    %14 = arith.sitofp %13 : vector<1x128xi32> to vector<1x128xf32>
    %c0 = arith.constant 0 : index
    %c0_1 = arith.constant 0 : index
    %c0_2 = arith.constant 0 : index
    %c0_3 = arith.constant 0 : index
    %15 = vector.load %arg1[%c0, %c0_1, %c0_2, %c0_3] : memref<2x2x8x128xf32, #tpu.memory_space<vmem>>, vector<1x2x8x128xf32>
    %16 = vector.shape_cast %15 : vector<1x2x8x128xf32> to vector<2x8x128xf32>
    %17 = vector.shape_cast %16 : vector<2x8x128xf32> to vector<16x128xf32>
    %c0_4 = arith.constant 0 : index
    %c0_5 = arith.constant 0 : index
    %c0_6 = arith.constant 0 : index
    %c0_7 = arith.constant 0 : index
    %18 = vector.load %arg2[%c0_4, %c0_5, %c0_6, %c0_7] : memref<2x2x128x128xf32, #tpu.memory_space<vmem>>, vector<1x2x128x128xf32>
    %19 = vector.shape_cast %18 : vector<1x2x128x128xf32> to vector<2x128x128xf32>
    %c0_8 = arith.constant 0 : index
    %c0_9 = arith.constant 0 : index
    %c0_10 = arith.constant 0 : index
    %20 = vector.load %arg3[%c0_8, %c0_9, %c0_10] : memref<2x2x128xf32, #tpu.memory_space<vmem>>, vector<1x2x128xf32>
    %21 = vector.shape_cast %20 : vector<1x2x128xf32> to vector<2x128xf32>
    %22 = vector.extract_strided_slice %19 {offsets = [0, 0, 0], sizes = [1, 128, 128], strides = [1, 1, 1]} : vector<2x128x128xf32> to vector<1x128x128xf32>
    %23 = vector.shape_cast %22 : vector<1x128x128xf32> to vector<128x128xf32>
    %cst = arith.constant dense<0.000000e+00> : vector<16x128xf32>
    %24 = tpu.matmul %17, %23, %cst {dimension_numbers = #tpu.dot_dimension_numbers<[1], [0], [0], [1], [0, 0, 1, 1], [], []>} : vector<16x128xf32>, vector<128x128xf32>, vector<16x128xf32> -> vector<16x128xf32>
    %25 = vector.extract_strided_slice %21 {offsets = [0, 0], sizes = [1, 128], strides = [1, 1]} : vector<2x128xf32> to vector<1x128xf32>
    %26 = vector.shape_cast %25 : vector<1x128xf32> to vector<128xf32>
    %27 = vector.shape_cast %26 : vector<128xf32> to vector<1x128xf32>
    %28 = vector.broadcast %27 : vector<1x128xf32> to vector<16x128xf32>
    %29 = arith.addf %24, %28 : vector<16x128xf32>
    %30 = vector.shape_cast %29 : vector<16x128xf32> to vector<2x8x128xf32>
    %31 = vector.extract_strided_slice %19 {offsets = [1, 0, 0], sizes = [1, 128, 128], strides = [1, 1, 1]} : vector<2x128x128xf32> to vector<1x128x128xf32>
    %32 = vector.shape_cast %31 : vector<1x128x128xf32> to vector<128x128xf32>
    %cst_11 = arith.constant dense<0.000000e+00> : vector<16x128xf32>
    %33 = tpu.matmul %17, %32, %cst_11 {dimension_numbers = #tpu.dot_dimension_numbers<[1], [0], [0], [1], [0, 0, 1, 1], [], []>} : vector<16x128xf32>, vector<128x128xf32>, vector<16x128xf32> -> vector<16x128xf32>
    %34 = vector.extract_strided_slice %21 {offsets = [1, 0], sizes = [1, 128], strides = [1, 1]} : vector<2x128xf32> to vector<1x128xf32>
    %35 = vector.shape_cast %34 : vector<1x128xf32> to vector<128xf32>
    %36 = vector.shape_cast %35 : vector<128xf32> to vector<1x128xf32>
    %37 = vector.broadcast %36 : vector<1x128xf32> to vector<16x128xf32>
    %38 = arith.addf %33, %37 : vector<16x128xf32>
    %39 = vector.shape_cast %38 : vector<16x128xf32> to vector<2x8x128xf32>
    %cst_12 = arith.constant 0.000000e+00 : f32
    %40 = vector.broadcast %cst_12 : f32 to vector<2x8x8xf32>
    %cst_13 = arith.constant 1.250000e-01 : f32
    %41 = vector.broadcast %cst_13 : f32 to vector<1x128xf32>
    %42 = arith.mulf %7, %41 : vector<1x128xf32>
    %43 = vector.shape_cast %42 : vector<1x128xf32> to vector<1x1x128xf32>
    %44 = vector.broadcast %43 : vector<1x1x128xf32> to vector<2x8x128xf32>
    %45 = arith.mulf %30, %44 : vector<2x8x128xf32>
    "tpu.trace_start"() <{level = 10 : i32, message = "bqd,bkd->bqk"}> : () -> ()
    %cst_14 = arith.constant dense<0.000000e+00> : vector<2x8x8xf32>
    %46 = tpu.matmul %45, %39, %cst_14 {dimension_numbers = #tpu.dot_dimension_numbers<[2], [2], [1], [1], [0, 0, 0, 1, 1, 1], [0], [0]>} : vector<2x8x128xf32>, vector<2x8x128xf32>, vector<2x8x8xf32> -> vector<2x8x8xf32>
    "tpu.trace_stop"() : () -> ()
    %cst_15 = arith.constant dense<0xFF800000> : vector<2x8xf32>
    %47 = vector.multi_reduction <maximumf>, %46, %cst_15 [2] : vector<2x8x8xf32> to vector<2x8xf32>
    %48 = vector.shape_cast %47 : vector<2x8xf32> to vector<2x8x1xf32>
    %49 = vector.broadcast %48 : vector<2x8x1xf32> to vector<2x8x8xf32>
    %50 = arith.subf %46, %49 : vector<2x8x8xf32>
    %51 = math.exp %50 : vector<2x8x8xf32>
    %cst_16 = arith.constant dense<0.000000e+00> : vector<2x8xf32>
    %52 = vector.multi_reduction <add>, %51, %cst_16 [2] : vector<2x8x8xf32> to vector<2x8xf32>
    %53 = vector.shape_cast %52 : vector<2x8xf32> to vector<2x8x1xf32>
    %54 = vector.broadcast %53 : vector<2x8x1xf32> to vector<2x8x8xf32>
    %55 = arith.divf %51, %54 : vector<2x8x8xf32>
    %56 = arith.addf %40, %55 : vector<2x8x8xf32>
    %cst_17 = arith.constant 1.250000e-01 : f32
    %57 = vector.broadcast %cst_17 : f32 to vector<1x128xf32>
    %58 = arith.mulf %14, %57 : vector<1x128xf32>
    %59 = vector.shape_cast %58 : vector<1x128xf32> to vector<1x1x128xf32>
    %60 = vector.broadcast %59 : vector<1x1x128xf32> to vector<2x8x128xf32>
    %61 = arith.mulf %30, %60 : vector<2x8x128xf32>
    "tpu.trace_start"() <{level = 10 : i32, message = "bqd,bkd->bqk"}> : () -> ()
    %cst_18 = arith.constant dense<0.000000e+00> : vector<2x8x8xf32>
    %62 = tpu.matmul %61, %39, %cst_18 {dimension_numbers = #tpu.dot_dimension_numbers<[2], [2], [1], [1], [0, 0, 0, 1, 1, 1], [0], [0]>} : vector<2x8x128xf32>, vector<2x8x128xf32>, vector<2x8x8xf32> -> vector<2x8x8xf32>
    "tpu.trace_stop"() : () -> ()
    %cst_19 = arith.constant dense<0xFF800000> : vector<2x8xf32>
    %63 = vector.multi_reduction <maximumf>, %62, %cst_19 [2] : vector<2x8x8xf32> to vector<2x8xf32>
    %64 = vector.shape_cast %63 : vector<2x8xf32> to vector<2x8x1xf32>
    %65 = vector.broadcast %64 : vector<2x8x1xf32> to vector<2x8x8xf32>
    %66 = arith.subf %62, %65 : vector<2x8x8xf32>
    %67 = math.exp %66 : vector<2x8x8xf32>
    %cst_20 = arith.constant dense<0.000000e+00> : vector<2x8xf32>
    %68 = vector.multi_reduction <add>, %67, %cst_20 [2] : vector<2x8x8xf32> to vector<2x8xf32>
    %69 = vector.shape_cast %68 : vector<2x8xf32> to vector<2x8x1xf32>
    %70 = vector.broadcast %69 : vector<2x8x1xf32> to vector<2x8x8xf32>
    %71 = arith.divf %67, %70 : vector<2x8x8xf32>
    %72 = arith.addf %56, %71 : vector<2x8x8xf32>
    %cst_21 = arith.constant 5.000000e-01 : f32
    %73 = vector.broadcast %cst_21 : f32 to vector<2x8x8xf32>
    %74 = arith.mulf %72, %73 : vector<2x8x8xf32>
    "tpu.trace_start"() <{level = 10 : i32, message = "bqk,bkd->bqd"}> : () -> ()
    %cst_22 = arith.constant dense<0.000000e+00> : vector<2x8x128xf32>
    %75 = tpu.matmul %74, %16, %cst_22 {dimension_numbers = #tpu.dot_dimension_numbers<[2], [1], [1], [2], [0, 0, 0, 1, 1, 2], [0], [0]>} : vector<2x8x8xf32>, vector<2x8x128xf32>, vector<2x8x128xf32> -> vector<2x8x128xf32>
    "tpu.trace_stop"() : () -> ()
    %cst_23 = arith.constant dense<0.000000e+00> : vector<2x128xf32>
    %76 = vector.multi_reduction <add>, %75, %cst_23 [1] : vector<2x8x128xf32> to vector<2x128xf32>
    %cst_24 = arith.constant 1.250000e-01 : f32
    %77 = vector.broadcast %cst_24 : f32 to vector<2x128xf32>
    %78 = arith.mulf %76, %77 : vector<2x128xf32>
    %c1 = arith.constant 1 : index
    %c0_25 = arith.constant 0 : index
    %c0_26 = arith.constant 0 : index
    %c0_27 = arith.constant 0 : index
    %79 = vector.load %arg1[%c1, %c0_25, %c0_26, %c0_27] : memref<2x2x8x128xf32, #tpu.memory_space<vmem>>, vector<1x2x8x128xf32>
    %80 = vector.shape_cast %79 : vector<1x2x8x128xf32> to vector<2x8x128xf32>
    %81 = vector.shape_cast %80 : vector<2x8x128xf32> to vector<16x128xf32>
    %c1_28 = arith.constant 1 : index
    %c0_29 = arith.constant 0 : index
    %c0_30 = arith.constant 0 : index
    %c0_31 = arith.constant 0 : index
    %82 = vector.load %arg2[%c1_28, %c0_29, %c0_30, %c0_31] : memref<2x2x128x128xf32, #tpu.memory_space<vmem>>, vector<1x2x128x128xf32>
    %83 = vector.shape_cast %82 : vector<1x2x128x128xf32> to vector<2x128x128xf32>
    %c1_32 = arith.constant 1 : index
    %c0_33 = arith.constant 0 : index
    %c0_34 = arith.constant 0 : index
    %84 = vector.load %arg3[%c1_32, %c0_33, %c0_34] : memref<2x2x128xf32, #tpu.memory_space<vmem>>, vector<1x2x128xf32>
    %85 = vector.shape_cast %84 : vector<1x2x128xf32> to vector<2x128xf32>
    %86 = vector.extract_strided_slice %83 {offsets = [0, 0, 0], sizes = [1, 128, 128], strides = [1, 1, 1]} : vector<2x128x128xf32> to vector<1x128x128xf32>
    %87 = vector.shape_cast %86 : vector<1x128x128xf32> to vector<128x128xf32>
    %cst_35 = arith.constant dense<0.000000e+00> : vector<16x128xf32>
    %88 = tpu.matmul %81, %87, %cst_35 {dimension_numbers = #tpu.dot_dimension_numbers<[1], [0], [0], [1], [0, 0, 1, 1], [], []>} : vector<16x128xf32>, vector<128x128xf32>, vector<16x128xf32> -> vector<16x128xf32>
    %89 = vector.extract_strided_slice %85 {offsets = [0, 0], sizes = [1, 128], strides = [1, 1]} : vector<2x128xf32> to vector<1x128xf32>
    %90 = vector.shape_cast %89 : vector<1x128xf32> to vector<128xf32>
    %91 = vector.shape_cast %90 : vector<128xf32> to vector<1x128xf32>
    %92 = vector.broadcast %91 : vector<1x128xf32> to vector<16x128xf32>
    %93 = arith.addf %88, %92 : vector<16x128xf32>
    %94 = vector.shape_cast %93 : vector<16x128xf32> to vector<2x8x128xf32>
    %95 = vector.extract_strided_slice %83 {offsets = [1, 0, 0], sizes = [1, 128, 128], strides = [1, 1, 1]} : vector<2x128x128xf32> to vector<1x128x128xf32>
    %96 = vector.shape_cast %95 : vector<1x128x128xf32> to vector<128x128xf32>
    %cst_36 = arith.constant dense<0.000000e+00> : vector<16x128xf32>
    %97 = tpu.matmul %81, %96, %cst_36 {dimension_numbers = #tpu.dot_dimension_numbers<[1], [0], [0], [1], [0, 0, 1, 1], [], []>} : vector<16x128xf32>, vector<128x128xf32>, vector<16x128xf32> -> vector<16x128xf32>
    %98 = vector.extract_strided_slice %85 {offsets = [1, 0], sizes = [1, 128], strides = [1, 1]} : vector<2x128xf32> to vector<1x128xf32>
    %99 = vector.shape_cast %98 : vector<1x128xf32> to vector<128xf32>
    %100 = vector.shape_cast %99 : vector<128xf32> to vector<1x128xf32>
    %101 = vector.broadcast %100 : vector<1x128xf32> to vector<16x128xf32>
    %102 = arith.addf %97, %101 : vector<16x128xf32>
    %103 = vector.shape_cast %102 : vector<16x128xf32> to vector<2x8x128xf32>
    %cst_37 = arith.constant 0.000000e+00 : f32
    %104 = vector.broadcast %cst_37 : f32 to vector<2x8x8xf32>
    %cst_38 = arith.constant 1.250000e-01 : f32
    %105 = vector.broadcast %cst_38 : f32 to vector<1x128xf32>
    %106 = arith.mulf %7, %105 : vector<1x128xf32>
    %107 = vector.shape_cast %106 : vector<1x128xf32> to vector<1x1x128xf32>
    %108 = vector.broadcast %107 : vector<1x1x128xf32> to vector<2x8x128xf32>
    %109 = arith.mulf %94, %108 : vector<2x8x128xf32>
    "tpu.trace_start"() <{level = 10 : i32, message = "bqd,bkd->bqk"}> : () -> ()
    %cst_39 = arith.constant dense<0.000000e+00> : vector<2x8x8xf32>
    %110 = tpu.matmul %109, %103, %cst_39 {dimension_numbers = #tpu.dot_dimension_numbers<[2], [2], [1], [1], [0, 0, 0, 1, 1, 1], [0], [0]>} : vector<2x8x128xf32>, vector<2x8x128xf32>, vector<2x8x8xf32> -> vector<2x8x8xf32>
    "tpu.trace_stop"() : () -> ()
    %cst_40 = arith.constant dense<0xFF800000> : vector<2x8xf32>
    %111 = vector.multi_reduction <maximumf>, %110, %cst_40 [2] : vector<2x8x8xf32> to vector<2x8xf32>
    %112 = vector.shape_cast %111 : vector<2x8xf32> to vector<2x8x1xf32>
    %113 = vector.broadcast %112 : vector<2x8x1xf32> to vector<2x8x8xf32>
    %114 = arith.subf %110, %113 : vector<2x8x8xf32>
    %115 = math.exp %114 : vector<2x8x8xf32>
    %cst_41 = arith.constant dense<0.000000e+00> : vector<2x8xf32>
    %116 = vector.multi_reduction <add>, %115, %cst_41 [2] : vector<2x8x8xf32> to vector<2x8xf32>
    %117 = vector.shape_cast %116 : vector<2x8xf32> to vector<2x8x1xf32>
    %118 = vector.broadcast %117 : vector<2x8x1xf32> to vector<2x8x8xf32>
    %119 = arith.divf %115, %118 : vector<2x8x8xf32>
    %120 = arith.addf %104, %119 : vector<2x8x8xf32>
    %cst_42 = arith.constant 1.250000e-01 : f32
    %121 = vector.broadcast %cst_42 : f32 to vector<1x128xf32>
    %122 = arith.mulf %14, %121 : vector<1x128xf32>
    %123 = vector.shape_cast %122 : vector<1x128xf32> to vector<1x1x128xf32>
    %124 = vector.broadcast %123 : vector<1x1x128xf32> to vector<2x8x128xf32>
    %125 = arith.mulf %94, %124 : vector<2x8x128xf32>
    "tpu.trace_start"() <{level = 10 : i32, message = "bqd,bkd->bqk"}> : () -> ()
    %cst_43 = arith.constant dense<0.000000e+00> : vector<2x8x8xf32>
    %126 = tpu.matmul %125, %103, %cst_43 {dimension_numbers = #tpu.dot_dimension_numbers<[2], [2], [1], [1], [0, 0, 0, 1, 1, 1], [0], [0]>} : vector<2x8x128xf32>, vector<2x8x128xf32>, vector<2x8x8xf32> -> vector<2x8x8xf32>
    "tpu.trace_stop"() : () -> ()
    %cst_44 = arith.constant dense<0xFF800000> : vector<2x8xf32>
    %127 = vector.multi_reduction <maximumf>, %126, %cst_44 [2] : vector<2x8x8xf32> to vector<2x8xf32>
    %128 = vector.shape_cast %127 : vector<2x8xf32> to vector<2x8x1xf32>
    %129 = vector.broadcast %128 : vector<2x8x1xf32> to vector<2x8x8xf32>
    %130 = arith.subf %126, %129 : vector<2x8x8xf32>
    %131 = math.exp %130 : vector<2x8x8xf32>
    %cst_45 = arith.constant dense<0.000000e+00> : vector<2x8xf32>
    %132 = vector.multi_reduction <add>, %131, %cst_45 [2] : vector<2x8x8xf32> to vector<2x8xf32>
    %133 = vector.shape_cast %132 : vector<2x8xf32> to vector<2x8x1xf32>
    %134 = vector.broadcast %133 : vector<2x8x1xf32> to vector<2x8x8xf32>
    %135 = arith.divf %131, %134 : vector<2x8x8xf32>
    %136 = arith.addf %120, %135 : vector<2x8x8xf32>
    %cst_46 = arith.constant 5.000000e-01 : f32
    %137 = vector.broadcast %cst_46 : f32 to vector<2x8x8xf32>
    %138 = arith.mulf %136, %137 : vector<2x8x8xf32>
    "tpu.trace_start"() <{level = 10 : i32, message = "bqk,bkd->bqd"}> : () -> ()
    %cst_47 = arith.constant dense<0.000000e+00> : vector<2x8x128xf32>
    %139 = tpu.matmul %138, %80, %cst_47 {dimension_numbers = #tpu.dot_dimension_numbers<[2], [1], [1], [2], [0, 0, 0, 1, 1, 2], [0], [0]>} : vector<2x8x8xf32>, vector<2x8x128xf32>, vector<2x8x128xf32> -> vector<2x8x128xf32>
    "tpu.trace_stop"() : () -> ()
    %cst_48 = arith.constant dense<0.000000e+00> : vector<2x128xf32>
    %140 = vector.multi_reduction <add>, %139, %cst_48 [1] : vector<2x8x128xf32> to vector<2x128xf32>
    %cst_49 = arith.constant 1.250000e-01 : f32
    %141 = vector.broadcast %cst_49 : f32 to vector<2x128xf32>
    %142 = arith.mulf %140, %141 : vector<2x128xf32>
    %143 = tpu.concatenate %78, %142 in 1 : vector<2x128xf32>, vector<2x128xf32> -> vector<2x256xf32>
    %c0_50 = arith.constant 0 : index
    %c0_51 = arith.constant 0 : index
    %144 = vector.load %arg6[%c0_50, %c0_51] : memref<2x256xf32, #tpu.memory_space<vmem>>, vector<2x256xf32>
    tpu.vector_store %arg6[%c0_50, %c0_51], %143 {strides = array<i32>} : memref<2x256xf32, #tpu.memory_space<vmem>>, vector<2x256xf32>,
    %c0_52 = arith.constant 0 : index
    %c0_53 = arith.constant 0 : index
    %145 = vector.load %arg4[%c0_52, %c0_53] : memref<256x128xf32, #tpu.memory_space<vmem>>, vector<256x128xf32>
    %cst_54 = arith.constant dense<0.000000e+00> : vector<2x128xf32>
    %146 = tpu.matmul %143, %145, %cst_54 {dimension_numbers = #tpu.dot_dimension_numbers<[1], [0], [0], [1], [0, 0, 1, 1], [], []>} : vector<2x256xf32>, vector<256x128xf32>, vector<2x128xf32> -> vector<2x128xf32>
    %c0_55 = arith.constant 0 : index
    %c0_56 = arith.constant 0 : index
    %147 = vector.load %arg5[%c0_55, %c0_56] : memref<1x128xf32, #tpu.memory_space<vmem>>, vector<1x128xf32>
    %148 = vector.broadcast %147 : vector<1x128xf32> to vector<2x128xf32>
    %149 = arith.addf %146, %148 : vector<2x128xf32>
    %cst_57 = arith.constant 0.000000e+00 : f32
    %150 = vector.broadcast %cst_57 : f32 to vector<2x128xf32>
    %151 = arith.subf %150, %149 : vector<2x128xf32>
    %152 = math.exp %151 : vector<2x128xf32>
    %cst_58 = arith.constant 1.000000e+00 : f32
    %153 = vector.broadcast %cst_58 : f32 to vector<2x128xf32>
    %154 = arith.addf %153, %152 : vector<2x128xf32>
    %cst_59 = arith.constant 1.000000e+00 : f32
    %155 = vector.broadcast %cst_59 : f32 to vector<2x128xf32>
    %156 = arith.divf %155, %154 : vector<2x128xf32>
    %c0_60 = arith.constant 0 : index
    %c0_61 = arith.constant 0 : index
    %157 = vector.load %arg7[%c0_60, %c0_61] : memref<2x128xf32, #tpu.memory_space<vmem>>, vector<2x128xf32>
    tpu.vector_store %arg7[%c0_60, %c0_61], %156 {strides = array<i32>} : memref<2x128xf32, #tpu.memory_space<vmem>>, vector<2x128xf32>,
    return
  }
  func.func @transform_0(%arg0: i32) -> (i32, i32, i32, i32) {
    %c0_i32 = arith.constant 0 : i32
    %c0_i32_0 = arith.constant 0 : i32
    %c0_i32_1 = arith.constant 0 : i32
    %c0_i32_2 = arith.constant 0 : i32
    %c0_i32_3 = arith.constant 0 : i32
    return %c0_i32, %c0_i32_0, %c0_i32_1, %c0_i32_2 : i32, i32, i32, i32
  }
  func.func @transform_1(%arg0: i32) -> (i32, i32, i32, i32) {
    %c0_i32 = arith.constant 0 : i32
    %c0_i32_0 = arith.constant 0 : i32
    %c0_i32_1 = arith.constant 0 : i32
    %c0_i32_2 = arith.constant 0 : i32
    %c0_i32_3 = arith.constant 0 : i32
    return %c0_i32, %c0_i32_0, %c0_i32_1, %c0_i32_2 : i32, i32, i32, i32
  }
  func.func @transform_2(%arg0: i32) -> (i32, i32, i32) {
    %c0_i32 = arith.constant 0 : i32
    %c0_i32_0 = arith.constant 0 : i32
    %c0_i32_1 = arith.constant 0 : i32
    %c0_i32_2 = arith.constant 0 : i32
    return %c0_i32, %c0_i32_0, %c0_i32_1 : i32, i32, i32
  }
  func.func @transform_3(%arg0: i32) -> (i32, i32) {
    %c0_i32 = arith.constant 0 : i32
    %c0_i32_0 = arith.constant 0 : i32
    %c0_i32_1 = arith.constant 0 : i32
    return %c0_i32, %c0_i32_0 : i32, i32
  }
  func.func @transform_4(%arg0: i32) -> (i32, i32) {
    %c0_i32 = arith.constant 0 : i32
    %c0_i32_0 = arith.constant 0 : i32
    %c0_i32_1 = arith.constant 0 : i32
    return %c0_i32, %c0_i32_0 : i32, i32
  }
  func.func @transform_5(%arg0: i32) -> (i32, i32) {
    %c0_i32 = arith.constant 0 : i32
    %c0_i32_0 = arith.constant 0 : i32
    %c0_i32_1 = arith.constant 0 : i32
    return %c0_i32, %c0_i32_0 : i32, i32
  }
  func.func @transform_6(%arg0: i32) -> (i32, i32) {
    %c0_i32 = arith.constant 0 : i32
    %c0_i32_0 = arith.constant 0 : i32
    %c0_i32_1 = arith.constant 0 : i32
    return %c0_i32, %c0_i32_0 : i32, i32
  }
}

module attributes {stable_mosaic.version = 11 : i64} {
  func.func @_phase_kernel(%arg0: i32, %arg1: memref<1x2x8x128xf32, #tpu.memory_space<vmem>>, %arg2: memref<1x128x128xf32, #tpu.memory_space<vmem>>, %arg3: memref<1x1x128x768xf32, #tpu.memory_space<vmem>>, %arg4: memref<1x13x128xf32, #tpu.memory_space<vmem>>, %arg5: memref<1x2x8x128xf32, #tpu.memory_space<vmem>>) attributes {dimension_semantics = [#tpu.dimension_semantics<parallel>], iteration_bounds = array<i64: 2>, scalar_prefetch = 0 : i64, scratch_operands = 0 : i64, tpu.core_type = #tpu.core_type<tc>, window_params = [{transform_indices = @transform_0, window_bounds = array<i64: 1, 2, 8, 128>}, {transform_indices = @transform_1, window_bounds = array<i64: 1, 128, 128>}, {transform_indices = @transform_2, window_bounds = array<i64: 1, 1, 128, 768>}, {transform_indices = @transform_3, window_bounds = array<i64: 1, 13, 128>}, {transform_indices = @transform_4, window_bounds = array<i64: 1, 2, 8, 128>}]} {
    %0 = tpu.iota {dimensions = array<i32: 1>} : vector<1x128xi32>
    %c0_i32 = arith.constant 0 : i32
    %1 = vector.broadcast %c0_i32 : i32 to vector<1x128xi32>
    %2 = arith.cmpi sge, %0, %1 : vector<1x128xi32>
    %c32_i32 = arith.constant 32 : i32
    %3 = vector.broadcast %c32_i32 : i32 to vector<1x128xi32>
    %4 = arith.cmpi slt, %0, %3 : vector<1x128xi32>
    %5 = arith.andi %2, %4 : vector<1x128xi1>
    %6 = arith.extui %5 : vector<1x128xi1> to vector<1x128xi32>
    %7 = arith.sitofp %6 : vector<1x128xi32> to vector<1x128xf32>
    %c32_i32_0 = arith.constant 32 : i32
    %8 = vector.broadcast %c32_i32_0 : i32 to vector<1x128xi32>
    %9 = arith.cmpi sge, %0, %8 : vector<1x128xi32>
    %c64_i32 = arith.constant 64 : i32
    %10 = vector.broadcast %c64_i32 : i32 to vector<1x128xi32>
    %11 = arith.cmpi slt, %0, %10 : vector<1x128xi32>
    %12 = arith.andi %9, %11 : vector<1x128xi1>
    %13 = arith.extui %12 : vector<1x128xi1> to vector<1x128xi32>
    %14 = arith.sitofp %13 : vector<1x128xi32> to vector<1x128xf32>
    %c64_i32_1 = arith.constant 64 : i32
    %15 = vector.broadcast %c64_i32_1 : i32 to vector<1x128xi32>
    %16 = arith.cmpi sge, %0, %15 : vector<1x128xi32>
    %c96_i32 = arith.constant 96 : i32
    %17 = vector.broadcast %c96_i32 : i32 to vector<1x128xi32>
    %18 = arith.cmpi slt, %0, %17 : vector<1x128xi32>
    %19 = arith.andi %16, %18 : vector<1x128xi1>
    %20 = arith.extui %19 : vector<1x128xi1> to vector<1x128xi32>
    %21 = arith.sitofp %20 : vector<1x128xi32> to vector<1x128xf32>
    %c96_i32_2 = arith.constant 96 : i32
    %22 = vector.broadcast %c96_i32_2 : i32 to vector<1x128xi32>
    %23 = arith.cmpi sge, %0, %22 : vector<1x128xi32>
    %c128_i32 = arith.constant 128 : i32
    %24 = vector.broadcast %c128_i32 : i32 to vector<1x128xi32>
    %25 = arith.cmpi slt, %0, %24 : vector<1x128xi32>
    %26 = arith.andi %23, %25 : vector<1x128xi1>
    %27 = arith.extui %26 : vector<1x128xi1> to vector<1x128xi32>
    %28 = arith.sitofp %27 : vector<1x128xi32> to vector<1x128xf32>
    %c0_i32_3 = arith.constant 0 : i32
    %29 = vector.broadcast %c0_i32_3 : i32 to vector<1x128xi32>
    %30 = arith.cmpi sge, %0, %29 : vector<1x128xi32>
    %c16_i32 = arith.constant 16 : i32
    %31 = vector.broadcast %c16_i32 : i32 to vector<1x128xi32>
    %32 = arith.cmpi slt, %0, %31 : vector<1x128xi32>
    %33 = arith.andi %30, %32 : vector<1x128xi1>
    %34 = arith.extui %33 : vector<1x128xi1> to vector<1x128xi32>
    %35 = arith.sitofp %34 : vector<1x128xi32> to vector<1x128xf32>
    %c16_i32_4 = arith.constant 16 : i32
    %36 = vector.broadcast %c16_i32_4 : i32 to vector<1x128xi32>
    %37 = arith.cmpi sge, %0, %36 : vector<1x128xi32>
    %c32_i32_5 = arith.constant 32 : i32
    %38 = vector.broadcast %c32_i32_5 : i32 to vector<1x128xi32>
    %39 = arith.cmpi slt, %0, %38 : vector<1x128xi32>
    %40 = arith.andi %37, %39 : vector<1x128xi1>
    %41 = arith.extui %40 : vector<1x128xi1> to vector<1x128xi32>
    %42 = arith.sitofp %41 : vector<1x128xi32> to vector<1x128xf32>
    %c32_i32_6 = arith.constant 32 : i32
    %43 = vector.broadcast %c32_i32_6 : i32 to vector<1x128xi32>
    %44 = arith.cmpi sge, %0, %43 : vector<1x128xi32>
    %c48_i32 = arith.constant 48 : i32
    %45 = vector.broadcast %c48_i32 : i32 to vector<1x128xi32>
    %46 = arith.cmpi slt, %0, %45 : vector<1x128xi32>
    %47 = arith.andi %44, %46 : vector<1x128xi1>
    %48 = arith.extui %47 : vector<1x128xi1> to vector<1x128xi32>
    %49 = arith.sitofp %48 : vector<1x128xi32> to vector<1x128xf32>
    %c48_i32_7 = arith.constant 48 : i32
    %50 = vector.broadcast %c48_i32_7 : i32 to vector<1x128xi32>
    %51 = arith.cmpi sge, %0, %50 : vector<1x128xi32>
    %c64_i32_8 = arith.constant 64 : i32
    %52 = vector.broadcast %c64_i32_8 : i32 to vector<1x128xi32>
    %53 = arith.cmpi slt, %0, %52 : vector<1x128xi32>
    %54 = arith.andi %51, %53 : vector<1x128xi1>
    %55 = arith.extui %54 : vector<1x128xi1> to vector<1x128xi32>
    %56 = arith.sitofp %55 : vector<1x128xi32> to vector<1x128xf32>
    %c64_i32_9 = arith.constant 64 : i32
    %57 = vector.broadcast %c64_i32_9 : i32 to vector<1x128xi32>
    %58 = arith.cmpi sge, %0, %57 : vector<1x128xi32>
    %c80_i32 = arith.constant 80 : i32
    %59 = vector.broadcast %c80_i32 : i32 to vector<1x128xi32>
    %60 = arith.cmpi slt, %0, %59 : vector<1x128xi32>
    %61 = arith.andi %58, %60 : vector<1x128xi1>
    %62 = arith.extui %61 : vector<1x128xi1> to vector<1x128xi32>
    %63 = arith.sitofp %62 : vector<1x128xi32> to vector<1x128xf32>
    %c80_i32_10 = arith.constant 80 : i32
    %64 = vector.broadcast %c80_i32_10 : i32 to vector<1x128xi32>
    %65 = arith.cmpi sge, %0, %64 : vector<1x128xi32>
    %c96_i32_11 = arith.constant 96 : i32
    %66 = vector.broadcast %c96_i32_11 : i32 to vector<1x128xi32>
    %67 = arith.cmpi slt, %0, %66 : vector<1x128xi32>
    %68 = arith.andi %65, %67 : vector<1x128xi1>
    %69 = arith.extui %68 : vector<1x128xi1> to vector<1x128xi32>
    %70 = arith.sitofp %69 : vector<1x128xi32> to vector<1x128xf32>
    %c96_i32_12 = arith.constant 96 : i32
    %71 = vector.broadcast %c96_i32_12 : i32 to vector<1x128xi32>
    %72 = arith.cmpi sge, %0, %71 : vector<1x128xi32>
    %c112_i32 = arith.constant 112 : i32
    %73 = vector.broadcast %c112_i32 : i32 to vector<1x128xi32>
    %74 = arith.cmpi slt, %0, %73 : vector<1x128xi32>
    %75 = arith.andi %72, %74 : vector<1x128xi1>
    %76 = arith.extui %75 : vector<1x128xi1> to vector<1x128xi32>
    %77 = arith.sitofp %76 : vector<1x128xi32> to vector<1x128xf32>
    %c112_i32_13 = arith.constant 112 : i32
    %78 = vector.broadcast %c112_i32_13 : i32 to vector<1x128xi32>
    %79 = arith.cmpi sge, %0, %78 : vector<1x128xi32>
    %c128_i32_14 = arith.constant 128 : i32
    %80 = vector.broadcast %c128_i32_14 : i32 to vector<1x128xi32>
    %81 = arith.cmpi slt, %0, %80 : vector<1x128xi32>
    %82 = arith.andi %79, %81 : vector<1x128xi1>
    %83 = arith.extui %82 : vector<1x128xi1> to vector<1x128xi32>
    %84 = arith.sitofp %83 : vector<1x128xi32> to vector<1x128xf32>
    %c0 = arith.constant 0 : index
    %c0_15 = arith.constant 0 : index
    %c0_16 = arith.constant 0 : index
    %85 = vector.load %arg4[%c0, %c0_15, %c0_16] : memref<1x13x128xf32, #tpu.memory_space<vmem>>, vector<1x13x128xf32>
    %86 = vector.shape_cast %85 : vector<1x13x128xf32> to vector<13x128xf32>
    %c0_17 = arith.constant 0 : index
    %c0_18 = arith.constant 0 : index
    %c0_19 = arith.constant 0 : index
    %c0_20 = arith.constant 0 : index
    %87 = vector.load %arg1[%c0_17, %c0_18, %c0_19, %c0_20] : memref<1x2x8x128xf32, #tpu.memory_space<vmem>>, vector<1x2x8x128xf32>
    %88 = vector.shape_cast %87 : vector<1x2x8x128xf32> to vector<2x8x128xf32>
    %89 = vector.shape_cast %88 : vector<2x8x128xf32> to vector<16x128xf32>
    %c0_21 = arith.constant 0 : index
    %c0_22 = arith.constant 0 : index
    %c0_23 = arith.constant 0 : index
    %90 = vector.load %arg2[%c0_21, %c0_22, %c0_23] : memref<1x128x128xf32, #tpu.memory_space<vmem>>, vector<1x128x128xf32>
    %91 = vector.shape_cast %90 : vector<1x128x128xf32> to vector<128x128xf32>
    %cst = arith.constant dense<0.000000e+00> : vector<16x128xf32>
    %92 = tpu.matmul %89, %91, %cst {dimension_numbers = #tpu.dot_dimension_numbers<[1], [0], [0], [1], [0, 0, 1, 1], [], []>} : vector<16x128xf32>, vector<128x128xf32>, vector<16x128xf32> -> vector<16x128xf32>
    %93 = vector.extract_strided_slice %86 {offsets = [0, 0], sizes = [1, 128], strides = [1, 1]} : vector<13x128xf32> to vector<1x128xf32>
    %94 = vector.shape_cast %93 : vector<1x128xf32> to vector<128xf32>
    %95 = vector.shape_cast %94 : vector<128xf32> to vector<1x128xf32>
    %96 = vector.broadcast %95 : vector<1x128xf32> to vector<16x128xf32>
    %97 = arith.addf %92, %96 : vector<16x128xf32>
    %cst_24 = arith.constant 0.000000e+00 : f32
    %98 = vector.broadcast %cst_24 : f32 to vector<16x128xf32>
    %99 = arith.maximumf %97, %98 : vector<16x128xf32>
    %c0_25 = arith.constant 0 : index
    %c0_26 = arith.constant 0 : index
    %c0_27 = arith.constant 0 : index
    %c0_28 = arith.constant 0 : index
    %100 = vector.load %arg3[%c0_25, %c0_26, %c0_27, %c0_28] : memref<1x1x128x768xf32, #tpu.memory_space<vmem>>, vector<1x1x128x768xf32>
    %101 = vector.shape_cast %100 : vector<1x1x128x768xf32> to vector<128x768xf32>
    %102 = vector.extract_strided_slice %101 {offsets = [0, 0], sizes = [128, 384], strides = [1, 1]} : vector<128x768xf32> to vector<128x384xf32>
    %103 = vector.extract_strided_slice %101 {offsets = [0, 384], sizes = [128, 128], strides = [1, 1]} : vector<128x768xf32> to vector<128x128xf32>
    %104 = vector.extract_strided_slice %101 {offsets = [0, 512], sizes = [128, 128], strides = [1, 1]} : vector<128x768xf32> to vector<128x128xf32>
    %105 = vector.extract_strided_slice %101 {offsets = [0, 640], sizes = [128, 128], strides = [1, 1]} : vector<128x768xf32> to vector<128x128xf32>
    %106 = vector.extract_strided_slice %86 {offsets = [3, 0], sizes = [1, 128], strides = [1, 1]} : vector<13x128xf32> to vector<1x128xf32>
    %107 = vector.shape_cast %106 : vector<1x128xf32> to vector<128xf32>
    %108 = vector.shape_cast %107 : vector<128xf32> to vector<1x128xf32>
    %109 = vector.extract_strided_slice %86 {offsets = [4, 0], sizes = [1, 128], strides = [1, 1]} : vector<13x128xf32> to vector<1x128xf32>
    %110 = vector.shape_cast %109 : vector<1x128xf32> to vector<128xf32>
    %111 = vector.shape_cast %110 : vector<128xf32> to vector<1x128xf32>
    %112 = vector.extract_strided_slice %86 {offsets = [5, 0], sizes = [1, 128], strides = [1, 1]} : vector<13x128xf32> to vector<1x128xf32>
    %113 = vector.shape_cast %112 : vector<1x128xf32> to vector<128xf32>
    %114 = vector.shape_cast %113 : vector<128xf32> to vector<1x128xf32>
    %115 = tpu.concatenate %108, %111, %114 in 1 : vector<1x128xf32>, vector<1x128xf32>, vector<1x128xf32> -> vector<1x384xf32>
    %cst_29 = arith.constant dense<0.000000e+00> : vector<16x384xf32>
    %116 = tpu.matmul %99, %102, %cst_29 {dimension_numbers = #tpu.dot_dimension_numbers<[1], [0], [0], [1], [0, 0, 1, 1], [], []>} : vector<16x128xf32>, vector<128x384xf32>, vector<16x384xf32> -> vector<16x384xf32>
    %117 = vector.broadcast %115 : vector<1x384xf32> to vector<16x384xf32>
    %118 = arith.addf %116, %117 : vector<16x384xf32>
    %119 = vector.extract_strided_slice %118 {offsets = [0, 0], sizes = [16, 128], strides = [1, 1]} : vector<16x384xf32> to vector<16x128xf32>
    %120 = vector.shape_cast %119 : vector<16x128xf32> to vector<2x8x128xf32>
    %121 = vector.extract_strided_slice %118 {offsets = [0, 128], sizes = [16, 128], strides = [1, 1]} : vector<16x384xf32> to vector<16x128xf32>
    %122 = vector.shape_cast %121 : vector<16x128xf32> to vector<2x8x128xf32>
    %123 = vector.extract_strided_slice %118 {offsets = [0, 256], sizes = [16, 128], strides = [1, 1]} : vector<16x384xf32> to vector<16x128xf32>
    %124 = vector.shape_cast %123 : vector<16x128xf32> to vector<2x8x128xf32>
    %cst_30 = arith.constant 0.000000e+00 : f32
    %125 = vector.broadcast %cst_30 : f32 to vector<2x8x128xf32>
    %cst_31 = arith.constant 2.500000e-01 : f32
    %126 = vector.broadcast %cst_31 : f32 to vector<1x128xf32>
    %127 = arith.mulf %35, %126 : vector<1x128xf32>
    %128 = vector.shape_cast %127 : vector<1x128xf32> to vector<1x1x128xf32>
    %129 = vector.broadcast %128 : vector<1x1x128xf32> to vector<2x8x128xf32>
    %130 = arith.mulf %120, %129 : vector<2x8x128xf32>
    "tpu.trace_start"() <{level = 10 : i32, message = "bqd,bkd->bqk"}> : () -> ()
    %cst_32 = arith.constant dense<0.000000e+00> : vector<2x8x8xf32>
    %131 = tpu.matmul %130, %122, %cst_32 {dimension_numbers = #tpu.dot_dimension_numbers<[2], [2], [1], [1], [0, 0, 0, 1, 1, 1], [0], [0]>} : vector<2x8x128xf32>, vector<2x8x128xf32>, vector<2x8x8xf32> -> vector<2x8x8xf32>
    "tpu.trace_stop"() : () -> ()
    %cst_33 = arith.constant dense<0xFF800000> : vector<2x8xf32>
    %132 = vector.multi_reduction <maximumf>, %131, %cst_33 [2] : vector<2x8x8xf32> to vector<2x8xf32>
    %133 = vector.shape_cast %132 : vector<2x8xf32> to vector<2x8x1xf32>
    %134 = vector.broadcast %133 : vector<2x8x1xf32> to vector<2x8x8xf32>
    %135 = arith.subf %131, %134 : vector<2x8x8xf32>
    %136 = math.exp %135 : vector<2x8x8xf32>
    %cst_34 = arith.constant dense<0.000000e+00> : vector<2x8xf32>
    %137 = vector.multi_reduction <add>, %136, %cst_34 [2] : vector<2x8x8xf32> to vector<2x8xf32>
    %138 = vector.shape_cast %137 : vector<2x8xf32> to vector<2x8x1xf32>
    %139 = vector.broadcast %138 : vector<2x8x1xf32> to vector<2x8x8xf32>
    %140 = arith.divf %136, %139 : vector<2x8x8xf32>
    %141 = vector.shape_cast %35 : vector<1x128xf32> to vector<1x1x128xf32>
    %142 = vector.broadcast %141 : vector<1x1x128xf32> to vector<2x8x128xf32>
    %143 = arith.mulf %124, %142 : vector<2x8x128xf32>
    "tpu.trace_start"() <{level = 10 : i32, message = "bqk,bkd->bqd"}> : () -> ()
    %cst_35 = arith.constant dense<0.000000e+00> : vector<2x8x128xf32>
    %144 = tpu.matmul %140, %143, %cst_35 {dimension_numbers = #tpu.dot_dimension_numbers<[2], [1], [1], [2], [0, 0, 0, 1, 1, 2], [0], [0]>} : vector<2x8x8xf32>, vector<2x8x128xf32>, vector<2x8x128xf32> -> vector<2x8x128xf32>
    "tpu.trace_stop"() : () -> ()
    %145 = arith.addf %125, %144 : vector<2x8x128xf32>
    %cst_36 = arith.constant 2.500000e-01 : f32
    %146 = vector.broadcast %cst_36 : f32 to vector<1x128xf32>
    %147 = arith.mulf %42, %146 : vector<1x128xf32>
    %148 = vector.shape_cast %147 : vector<1x128xf32> to vector<1x1x128xf32>
    %149 = vector.broadcast %148 : vector<1x1x128xf32> to vector<2x8x128xf32>
    %150 = arith.mulf %120, %149 : vector<2x8x128xf32>
    "tpu.trace_start"() <{level = 10 : i32, message = "bqd,bkd->bqk"}> : () -> ()
    %cst_37 = arith.constant dense<0.000000e+00> : vector<2x8x8xf32>
    %151 = tpu.matmul %150, %122, %cst_37 {dimension_numbers = #tpu.dot_dimension_numbers<[2], [2], [1], [1], [0, 0, 0, 1, 1, 1], [0], [0]>} : vector<2x8x128xf32>, vector<2x8x128xf32>, vector<2x8x8xf32> -> vector<2x8x8xf32>
    "tpu.trace_stop"() : () -> ()
    %cst_38 = arith.constant dense<0xFF800000> : vector<2x8xf32>
    %152 = vector.multi_reduction <maximumf>, %151, %cst_38 [2] : vector<2x8x8xf32> to vector<2x8xf32>
    %153 = vector.shape_cast %152 : vector<2x8xf32> to vector<2x8x1xf32>
    %154 = vector.broadcast %153 : vector<2x8x1xf32> to vector<2x8x8xf32>
    %155 = arith.subf %151, %154 : vector<2x8x8xf32>
    %156 = math.exp %155 : vector<2x8x8xf32>
    %cst_39 = arith.constant dense<0.000000e+00> : vector<2x8xf32>
    %157 = vector.multi_reduction <add>, %156, %cst_39 [2] : vector<2x8x8xf32> to vector<2x8xf32>
    %158 = vector.shape_cast %157 : vector<2x8xf32> to vector<2x8x1xf32>
    %159 = vector.broadcast %158 : vector<2x8x1xf32> to vector<2x8x8xf32>
    %160 = arith.divf %156, %159 : vector<2x8x8xf32>
    %161 = vector.shape_cast %42 : vector<1x128xf32> to vector<1x1x128xf32>
    %162 = vector.broadcast %161 : vector<1x1x128xf32> to vector<2x8x128xf32>
    %163 = arith.mulf %124, %162 : vector<2x8x128xf32>
    "tpu.trace_start"() <{level = 10 : i32, message = "bqk,bkd->bqd"}> : () -> ()
    %cst_40 = arith.constant dense<0.000000e+00> : vector<2x8x128xf32>
    %164 = tpu.matmul %160, %163, %cst_40 {dimension_numbers = #tpu.dot_dimension_numbers<[2], [1], [1], [2], [0, 0, 0, 1, 1, 2], [0], [0]>} : vector<2x8x8xf32>, vector<2x8x128xf32>, vector<2x8x128xf32> -> vector<2x8x128xf32>
    "tpu.trace_stop"() : () -> ()
    %165 = arith.addf %145, %164 : vector<2x8x128xf32>
    %cst_41 = arith.constant 2.500000e-01 : f32
    %166 = vector.broadcast %cst_41 : f32 to vector<1x128xf32>
    %167 = arith.mulf %49, %166 : vector<1x128xf32>
    %168 = vector.shape_cast %167 : vector<1x128xf32> to vector<1x1x128xf32>
    %169 = vector.broadcast %168 : vector<1x1x128xf32> to vector<2x8x128xf32>
    %170 = arith.mulf %120, %169 : vector<2x8x128xf32>
    "tpu.trace_start"() <{level = 10 : i32, message = "bqd,bkd->bqk"}> : () -> ()
    %cst_42 = arith.constant dense<0.000000e+00> : vector<2x8x8xf32>
    %171 = tpu.matmul %170, %122, %cst_42 {dimension_numbers = #tpu.dot_dimension_numbers<[2], [2], [1], [1], [0, 0, 0, 1, 1, 1], [0], [0]>} : vector<2x8x128xf32>, vector<2x8x128xf32>, vector<2x8x8xf32> -> vector<2x8x8xf32>
    "tpu.trace_stop"() : () -> ()
    %cst_43 = arith.constant dense<0xFF800000> : vector<2x8xf32>
    %172 = vector.multi_reduction <maximumf>, %171, %cst_43 [2] : vector<2x8x8xf32> to vector<2x8xf32>
    %173 = vector.shape_cast %172 : vector<2x8xf32> to vector<2x8x1xf32>
    %174 = vector.broadcast %173 : vector<2x8x1xf32> to vector<2x8x8xf32>
    %175 = arith.subf %171, %174 : vector<2x8x8xf32>
    %176 = math.exp %175 : vector<2x8x8xf32>
    %cst_44 = arith.constant dense<0.000000e+00> : vector<2x8xf32>
    %177 = vector.multi_reduction <add>, %176, %cst_44 [2] : vector<2x8x8xf32> to vector<2x8xf32>
    %178 = vector.shape_cast %177 : vector<2x8xf32> to vector<2x8x1xf32>
    %179 = vector.broadcast %178 : vector<2x8x1xf32> to vector<2x8x8xf32>
    %180 = arith.divf %176, %179 : vector<2x8x8xf32>
    %181 = vector.shape_cast %49 : vector<1x128xf32> to vector<1x1x128xf32>
    %182 = vector.broadcast %181 : vector<1x1x128xf32> to vector<2x8x128xf32>
    %183 = arith.mulf %124, %182 : vector<2x8x128xf32>
    "tpu.trace_start"() <{level = 10 : i32, message = "bqk,bkd->bqd"}> : () -> ()
    %cst_45 = arith.constant dense<0.000000e+00> : vector<2x8x128xf32>
    %184 = tpu.matmul %180, %183, %cst_45 {dimension_numbers = #tpu.dot_dimension_numbers<[2], [1], [1], [2], [0, 0, 0, 1, 1, 2], [0], [0]>} : vector<2x8x8xf32>, vector<2x8x128xf32>, vector<2x8x128xf32> -> vector<2x8x128xf32>
    "tpu.trace_stop"() : () -> ()
    %185 = arith.addf %165, %184 : vector<2x8x128xf32>
    %cst_46 = arith.constant 2.500000e-01 : f32
    %186 = vector.broadcast %cst_46 : f32 to vector<1x128xf32>
    %187 = arith.mulf %56, %186 : vector<1x128xf32>
    %188 = vector.shape_cast %187 : vector<1x128xf32> to vector<1x1x128xf32>
    %189 = vector.broadcast %188 : vector<1x1x128xf32> to vector<2x8x128xf32>
    %190 = arith.mulf %120, %189 : vector<2x8x128xf32>
    "tpu.trace_start"() <{level = 10 : i32, message = "bqd,bkd->bqk"}> : () -> ()
    %cst_47 = arith.constant dense<0.000000e+00> : vector<2x8x8xf32>
    %191 = tpu.matmul %190, %122, %cst_47 {dimension_numbers = #tpu.dot_dimension_numbers<[2], [2], [1], [1], [0, 0, 0, 1, 1, 1], [0], [0]>} : vector<2x8x128xf32>, vector<2x8x128xf32>, vector<2x8x8xf32> -> vector<2x8x8xf32>
    "tpu.trace_stop"() : () -> ()
    %cst_48 = arith.constant dense<0xFF800000> : vector<2x8xf32>
    %192 = vector.multi_reduction <maximumf>, %191, %cst_48 [2] : vector<2x8x8xf32> to vector<2x8xf32>
    %193 = vector.shape_cast %192 : vector<2x8xf32> to vector<2x8x1xf32>
    %194 = vector.broadcast %193 : vector<2x8x1xf32> to vector<2x8x8xf32>
    %195 = arith.subf %191, %194 : vector<2x8x8xf32>
    %196 = math.exp %195 : vector<2x8x8xf32>
    %cst_49 = arith.constant dense<0.000000e+00> : vector<2x8xf32>
    %197 = vector.multi_reduction <add>, %196, %cst_49 [2] : vector<2x8x8xf32> to vector<2x8xf32>
    %198 = vector.shape_cast %197 : vector<2x8xf32> to vector<2x8x1xf32>
    %199 = vector.broadcast %198 : vector<2x8x1xf32> to vector<2x8x8xf32>
    %200 = arith.divf %196, %199 : vector<2x8x8xf32>
    %201 = vector.shape_cast %56 : vector<1x128xf32> to vector<1x1x128xf32>
    %202 = vector.broadcast %201 : vector<1x1x128xf32> to vector<2x8x128xf32>
    %203 = arith.mulf %124, %202 : vector<2x8x128xf32>
    "tpu.trace_start"() <{level = 10 : i32, message = "bqk,bkd->bqd"}> : () -> ()
    %cst_50 = arith.constant dense<0.000000e+00> : vector<2x8x128xf32>
    %204 = tpu.matmul %200, %203, %cst_50 {dimension_numbers = #tpu.dot_dimension_numbers<[2], [1], [1], [2], [0, 0, 0, 1, 1, 2], [0], [0]>} : vector<2x8x8xf32>, vector<2x8x128xf32>, vector<2x8x128xf32> -> vector<2x8x128xf32>
    "tpu.trace_stop"() : () -> ()
    %205 = arith.addf %185, %204 : vector<2x8x128xf32>
    %cst_51 = arith.constant 2.500000e-01 : f32
    %206 = vector.broadcast %cst_51 : f32 to vector<1x128xf32>
    %207 = arith.mulf %63, %206 : vector<1x128xf32>
    %208 = vector.shape_cast %207 : vector<1x128xf32> to vector<1x1x128xf32>
    %209 = vector.broadcast %208 : vector<1x1x128xf32> to vector<2x8x128xf32>
    %210 = arith.mulf %120, %209 : vector<2x8x128xf32>
    "tpu.trace_start"() <{level = 10 : i32, message = "bqd,bkd->bqk"}> : () -> ()
    %cst_52 = arith.constant dense<0.000000e+00> : vector<2x8x8xf32>
    %211 = tpu.matmul %210, %122, %cst_52 {dimension_numbers = #tpu.dot_dimension_numbers<[2], [2], [1], [1], [0, 0, 0, 1, 1, 1], [0], [0]>} : vector<2x8x128xf32>, vector<2x8x128xf32>, vector<2x8x8xf32> -> vector<2x8x8xf32>
    "tpu.trace_stop"() : () -> ()
    %cst_53 = arith.constant dense<0xFF800000> : vector<2x8xf32>
    %212 = vector.multi_reduction <maximumf>, %211, %cst_53 [2] : vector<2x8x8xf32> to vector<2x8xf32>
    %213 = vector.shape_cast %212 : vector<2x8xf32> to vector<2x8x1xf32>
    %214 = vector.broadcast %213 : vector<2x8x1xf32> to vector<2x8x8xf32>
    %215 = arith.subf %211, %214 : vector<2x8x8xf32>
    %216 = math.exp %215 : vector<2x8x8xf32>
    %cst_54 = arith.constant dense<0.000000e+00> : vector<2x8xf32>
    %217 = vector.multi_reduction <add>, %216, %cst_54 [2] : vector<2x8x8xf32> to vector<2x8xf32>
    %218 = vector.shape_cast %217 : vector<2x8xf32> to vector<2x8x1xf32>
    %219 = vector.broadcast %218 : vector<2x8x1xf32> to vector<2x8x8xf32>
    %220 = arith.divf %216, %219 : vector<2x8x8xf32>
    %221 = vector.shape_cast %63 : vector<1x128xf32> to vector<1x1x128xf32>
    %222 = vector.broadcast %221 : vector<1x1x128xf32> to vector<2x8x128xf32>
    %223 = arith.mulf %124, %222 : vector<2x8x128xf32>
    "tpu.trace_start"() <{level = 10 : i32, message = "bqk,bkd->bqd"}> : () -> ()
    %cst_55 = arith.constant dense<0.000000e+00> : vector<2x8x128xf32>
    %224 = tpu.matmul %220, %223, %cst_55 {dimension_numbers = #tpu.dot_dimension_numbers<[2], [1], [1], [2], [0, 0, 0, 1, 1, 2], [0], [0]>} : vector<2x8x8xf32>, vector<2x8x128xf32>, vector<2x8x128xf32> -> vector<2x8x128xf32>
    "tpu.trace_stop"() : () -> ()
    %225 = arith.addf %205, %224 : vector<2x8x128xf32>
    %cst_56 = arith.constant 2.500000e-01 : f32
    %226 = vector.broadcast %cst_56 : f32 to vector<1x128xf32>
    %227 = arith.mulf %70, %226 : vector<1x128xf32>
    %228 = vector.shape_cast %227 : vector<1x128xf32> to vector<1x1x128xf32>
    %229 = vector.broadcast %228 : vector<1x1x128xf32> to vector<2x8x128xf32>
    %230 = arith.mulf %120, %229 : vector<2x8x128xf32>
    "tpu.trace_start"() <{level = 10 : i32, message = "bqd,bkd->bqk"}> : () -> ()
    %cst_57 = arith.constant dense<0.000000e+00> : vector<2x8x8xf32>
    %231 = tpu.matmul %230, %122, %cst_57 {dimension_numbers = #tpu.dot_dimension_numbers<[2], [2], [1], [1], [0, 0, 0, 1, 1, 1], [0], [0]>} : vector<2x8x128xf32>, vector<2x8x128xf32>, vector<2x8x8xf32> -> vector<2x8x8xf32>
    "tpu.trace_stop"() : () -> ()
    %cst_58 = arith.constant dense<0xFF800000> : vector<2x8xf32>
    %232 = vector.multi_reduction <maximumf>, %231, %cst_58 [2] : vector<2x8x8xf32> to vector<2x8xf32>
    %233 = vector.shape_cast %232 : vector<2x8xf32> to vector<2x8x1xf32>
    %234 = vector.broadcast %233 : vector<2x8x1xf32> to vector<2x8x8xf32>
    %235 = arith.subf %231, %234 : vector<2x8x8xf32>
    %236 = math.exp %235 : vector<2x8x8xf32>
    %cst_59 = arith.constant dense<0.000000e+00> : vector<2x8xf32>
    %237 = vector.multi_reduction <add>, %236, %cst_59 [2] : vector<2x8x8xf32> to vector<2x8xf32>
    %238 = vector.shape_cast %237 : vector<2x8xf32> to vector<2x8x1xf32>
    %239 = vector.broadcast %238 : vector<2x8x1xf32> to vector<2x8x8xf32>
    %240 = arith.divf %236, %239 : vector<2x8x8xf32>
    %241 = vector.shape_cast %70 : vector<1x128xf32> to vector<1x1x128xf32>
    %242 = vector.broadcast %241 : vector<1x1x128xf32> to vector<2x8x128xf32>
    %243 = arith.mulf %124, %242 : vector<2x8x128xf32>
    "tpu.trace_start"() <{level = 10 : i32, message = "bqk,bkd->bqd"}> : () -> ()
    %cst_60 = arith.constant dense<0.000000e+00> : vector<2x8x128xf32>
    %244 = tpu.matmul %240, %243, %cst_60 {dimension_numbers = #tpu.dot_dimension_numbers<[2], [1], [1], [2], [0, 0, 0, 1, 1, 2], [0], [0]>} : vector<2x8x8xf32>, vector<2x8x128xf32>, vector<2x8x128xf32> -> vector<2x8x128xf32>
    "tpu.trace_stop"() : () -> ()
    %245 = arith.addf %225, %244 : vector<2x8x128xf32>
    %cst_61 = arith.constant 2.500000e-01 : f32
    %246 = vector.broadcast %cst_61 : f32 to vector<1x128xf32>
    %247 = arith.mulf %77, %246 : vector<1x128xf32>
    %248 = vector.shape_cast %247 : vector<1x128xf32> to vector<1x1x128xf32>
    %249 = vector.broadcast %248 : vector<1x1x128xf32> to vector<2x8x128xf32>
    %250 = arith.mulf %120, %249 : vector<2x8x128xf32>
    "tpu.trace_start"() <{level = 10 : i32, message = "bqd,bkd->bqk"}> : () -> ()
    %cst_62 = arith.constant dense<0.000000e+00> : vector<2x8x8xf32>
    %251 = tpu.matmul %250, %122, %cst_62 {dimension_numbers = #tpu.dot_dimension_numbers<[2], [2], [1], [1], [0, 0, 0, 1, 1, 1], [0], [0]>} : vector<2x8x128xf32>, vector<2x8x128xf32>, vector<2x8x8xf32> -> vector<2x8x8xf32>
    "tpu.trace_stop"() : () -> ()
    %cst_63 = arith.constant dense<0xFF800000> : vector<2x8xf32>
    %252 = vector.multi_reduction <maximumf>, %251, %cst_63 [2] : vector<2x8x8xf32> to vector<2x8xf32>
    %253 = vector.shape_cast %252 : vector<2x8xf32> to vector<2x8x1xf32>
    %254 = vector.broadcast %253 : vector<2x8x1xf32> to vector<2x8x8xf32>
    %255 = arith.subf %251, %254 : vector<2x8x8xf32>
    %256 = math.exp %255 : vector<2x8x8xf32>
    %cst_64 = arith.constant dense<0.000000e+00> : vector<2x8xf32>
    %257 = vector.multi_reduction <add>, %256, %cst_64 [2] : vector<2x8x8xf32> to vector<2x8xf32>
    %258 = vector.shape_cast %257 : vector<2x8xf32> to vector<2x8x1xf32>
    %259 = vector.broadcast %258 : vector<2x8x1xf32> to vector<2x8x8xf32>
    %260 = arith.divf %256, %259 : vector<2x8x8xf32>
    %261 = vector.shape_cast %77 : vector<1x128xf32> to vector<1x1x128xf32>
    %262 = vector.broadcast %261 : vector<1x1x128xf32> to vector<2x8x128xf32>
    %263 = arith.mulf %124, %262 : vector<2x8x128xf32>
    "tpu.trace_start"() <{level = 10 : i32, message = "bqk,bkd->bqd"}> : () -> ()
    %cst_65 = arith.constant dense<0.000000e+00> : vector<2x8x128xf32>
    %264 = tpu.matmul %260, %263, %cst_65 {dimension_numbers = #tpu.dot_dimension_numbers<[2], [1], [1], [2], [0, 0, 0, 1, 1, 2], [0], [0]>} : vector<2x8x8xf32>, vector<2x8x128xf32>, vector<2x8x128xf32> -> vector<2x8x128xf32>
    "tpu.trace_stop"() : () -> ()
    %265 = arith.addf %245, %264 : vector<2x8x128xf32>
    %cst_66 = arith.constant 2.500000e-01 : f32
    %266 = vector.broadcast %cst_66 : f32 to vector<1x128xf32>
    %267 = arith.mulf %84, %266 : vector<1x128xf32>
    %268 = vector.shape_cast %267 : vector<1x128xf32> to vector<1x1x128xf32>
    %269 = vector.broadcast %268 : vector<1x1x128xf32> to vector<2x8x128xf32>
    %270 = arith.mulf %120, %269 : vector<2x8x128xf32>
    "tpu.trace_start"() <{level = 10 : i32, message = "bqd,bkd->bqk"}> : () -> ()
    %cst_67 = arith.constant dense<0.000000e+00> : vector<2x8x8xf32>
    %271 = tpu.matmul %270, %122, %cst_67 {dimension_numbers = #tpu.dot_dimension_numbers<[2], [2], [1], [1], [0, 0, 0, 1, 1, 1], [0], [0]>} : vector<2x8x128xf32>, vector<2x8x128xf32>, vector<2x8x8xf32> -> vector<2x8x8xf32>
    "tpu.trace_stop"() : () -> ()
    %cst_68 = arith.constant dense<0xFF800000> : vector<2x8xf32>
    %272 = vector.multi_reduction <maximumf>, %271, %cst_68 [2] : vector<2x8x8xf32> to vector<2x8xf32>
    %273 = vector.shape_cast %272 : vector<2x8xf32> to vector<2x8x1xf32>
    %274 = vector.broadcast %273 : vector<2x8x1xf32> to vector<2x8x8xf32>
    %275 = arith.subf %271, %274 : vector<2x8x8xf32>
    %276 = math.exp %275 : vector<2x8x8xf32>
    %cst_69 = arith.constant dense<0.000000e+00> : vector<2x8xf32>
    %277 = vector.multi_reduction <add>, %276, %cst_69 [2] : vector<2x8x8xf32> to vector<2x8xf32>
    %278 = vector.shape_cast %277 : vector<2x8xf32> to vector<2x8x1xf32>
    %279 = vector.broadcast %278 : vector<2x8x1xf32> to vector<2x8x8xf32>
    %280 = arith.divf %276, %279 : vector<2x8x8xf32>
    %281 = vector.shape_cast %84 : vector<1x128xf32> to vector<1x1x128xf32>
    %282 = vector.broadcast %281 : vector<1x1x128xf32> to vector<2x8x128xf32>
    %283 = arith.mulf %124, %282 : vector<2x8x128xf32>
    "tpu.trace_start"() <{level = 10 : i32, message = "bqk,bkd->bqd"}> : () -> ()
    %cst_70 = arith.constant dense<0.000000e+00> : vector<2x8x128xf32>
    %284 = tpu.matmul %280, %283, %cst_70 {dimension_numbers = #tpu.dot_dimension_numbers<[2], [1], [1], [2], [0, 0, 0, 1, 1, 2], [0], [0]>} : vector<2x8x8xf32>, vector<2x8x128xf32>, vector<2x8x128xf32> -> vector<2x8x128xf32>
    "tpu.trace_stop"() : () -> ()
    %285 = arith.addf %265, %284 : vector<2x8x128xf32>
    %286 = vector.shape_cast %285 : vector<2x8x128xf32> to vector<16x128xf32>
    %cst_71 = arith.constant dense<0.000000e+00> : vector<16x128xf32>
    %287 = tpu.matmul %286, %103, %cst_71 {dimension_numbers = #tpu.dot_dimension_numbers<[1], [0], [0], [1], [0, 0, 1, 1], [], []>} : vector<16x128xf32>, vector<128x128xf32>, vector<16x128xf32> -> vector<16x128xf32>
    %288 = vector.extract_strided_slice %86 {offsets = [6, 0], sizes = [1, 128], strides = [1, 1]} : vector<13x128xf32> to vector<1x128xf32>
    %289 = vector.shape_cast %288 : vector<1x128xf32> to vector<128xf32>
    %290 = vector.shape_cast %289 : vector<128xf32> to vector<1x128xf32>
    %291 = vector.broadcast %290 : vector<1x128xf32> to vector<16x128xf32>
    %292 = arith.addf %287, %291 : vector<16x128xf32>
    %293 = arith.addf %99, %292 : vector<16x128xf32>
    %294 = vector.extract_strided_slice %86 {offsets = [7, 0], sizes = [1, 128], strides = [1, 1]} : vector<13x128xf32> to vector<1x128xf32>
    %295 = vector.shape_cast %294 : vector<1x128xf32> to vector<128xf32>
    %296 = vector.shape_cast %295 : vector<128xf32> to vector<1x128xf32>
    %297 = vector.extract_strided_slice %86 {offsets = [8, 0], sizes = [1, 128], strides = [1, 1]} : vector<13x128xf32> to vector<1x128xf32>
    %298 = vector.shape_cast %297 : vector<1x128xf32> to vector<128xf32>
    %299 = vector.shape_cast %298 : vector<128xf32> to vector<1x128xf32>
    %cst_72 = arith.constant 0.000000e+00 : f32
    %300 = vector.broadcast %cst_72 : f32 to vector<16x128xf32>
    %301 = vector.broadcast %7 : vector<1x128xf32> to vector<16x128xf32>
    %302 = arith.mulf %293, %301 : vector<16x128xf32>
    %cst_73 = arith.constant dense<0.000000e+00> : vector<16xf32>
    %303 = vector.multi_reduction <add>, %302, %cst_73 [1] : vector<16x128xf32> to vector<16xf32>
    %304 = vector.shape_cast %303 : vector<16xf32> to vector<16x1xf32>
    %cst_74 = arith.constant 3.125000e-02 : f32
    %305 = vector.broadcast %cst_74 : f32 to vector<16x1xf32>
    %306 = arith.mulf %304, %305 : vector<16x1xf32>
    %307 = vector.broadcast %306 : vector<16x1xf32> to vector<16x128xf32>
    %308 = arith.subf %293, %307 : vector<16x128xf32>
    %309 = vector.broadcast %7 : vector<1x128xf32> to vector<16x128xf32>
    %310 = arith.mulf %308, %309 : vector<16x128xf32>
    %311 = arith.mulf %310, %310 : vector<16x128xf32>
    %cst_75 = arith.constant dense<0.000000e+00> : vector<16xf32>
    %312 = vector.multi_reduction <add>, %311, %cst_75 [1] : vector<16x128xf32> to vector<16xf32>
    %313 = vector.shape_cast %312 : vector<16xf32> to vector<16x1xf32>
    %cst_76 = arith.constant 3.125000e-02 : f32
    %314 = vector.broadcast %cst_76 : f32 to vector<16x1xf32>
    %315 = arith.mulf %313, %314 : vector<16x1xf32>
    %cst_77 = arith.constant 9.99999974E-6 : f32
    %316 = vector.broadcast %cst_77 : f32 to vector<16x1xf32>
    %317 = arith.addf %315, %316 : vector<16x1xf32>
    %318 = math.rsqrt %317 : vector<16x1xf32>
    %319 = vector.broadcast %318 : vector<16x1xf32> to vector<16x128xf32>
    %320 = arith.mulf %310, %319 : vector<16x128xf32>
    %321 = arith.addf %300, %320 : vector<16x128xf32>
    %322 = vector.broadcast %14 : vector<1x128xf32> to vector<16x128xf32>
    %323 = arith.mulf %293, %322 : vector<16x128xf32>
    %cst_78 = arith.constant dense<0.000000e+00> : vector<16xf32>
    %324 = vector.multi_reduction <add>, %323, %cst_78 [1] : vector<16x128xf32> to vector<16xf32>
    %325 = vector.shape_cast %324 : vector<16xf32> to vector<16x1xf32>
    %cst_79 = arith.constant 3.125000e-02 : f32
    %326 = vector.broadcast %cst_79 : f32 to vector<16x1xf32>
    %327 = arith.mulf %325, %326 : vector<16x1xf32>
    %328 = vector.broadcast %327 : vector<16x1xf32> to vector<16x128xf32>
    %329 = arith.subf %293, %328 : vector<16x128xf32>
    %330 = vector.broadcast %14 : vector<1x128xf32> to vector<16x128xf32>
    %331 = arith.mulf %329, %330 : vector<16x128xf32>
    %332 = arith.mulf %331, %331 : vector<16x128xf32>
    %cst_80 = arith.constant dense<0.000000e+00> : vector<16xf32>
    %333 = vector.multi_reduction <add>, %332, %cst_80 [1] : vector<16x128xf32> to vector<16xf32>
    %334 = vector.shape_cast %333 : vector<16xf32> to vector<16x1xf32>
    %cst_81 = arith.constant 3.125000e-02 : f32
    %335 = vector.broadcast %cst_81 : f32 to vector<16x1xf32>
    %336 = arith.mulf %334, %335 : vector<16x1xf32>
    %cst_82 = arith.constant 9.99999974E-6 : f32
    %337 = vector.broadcast %cst_82 : f32 to vector<16x1xf32>
    %338 = arith.addf %336, %337 : vector<16x1xf32>
    %339 = math.rsqrt %338 : vector<16x1xf32>
    %340 = vector.broadcast %339 : vector<16x1xf32> to vector<16x128xf32>
    %341 = arith.mulf %331, %340 : vector<16x128xf32>
    %342 = arith.addf %321, %341 : vector<16x128xf32>
    %343 = vector.broadcast %21 : vector<1x128xf32> to vector<16x128xf32>
    %344 = arith.mulf %293, %343 : vector<16x128xf32>
    %cst_83 = arith.constant dense<0.000000e+00> : vector<16xf32>
    %345 = vector.multi_reduction <add>, %344, %cst_83 [1] : vector<16x128xf32> to vector<16xf32>
    %346 = vector.shape_cast %345 : vector<16xf32> to vector<16x1xf32>
    %cst_84 = arith.constant 3.125000e-02 : f32
    %347 = vector.broadcast %cst_84 : f32 to vector<16x1xf32>
    %348 = arith.mulf %346, %347 : vector<16x1xf32>
    %349 = vector.broadcast %348 : vector<16x1xf32> to vector<16x128xf32>
    %350 = arith.subf %293, %349 : vector<16x128xf32>
    %351 = vector.broadcast %21 : vector<1x128xf32> to vector<16x128xf32>
    %352 = arith.mulf %350, %351 : vector<16x128xf32>
    %353 = arith.mulf %352, %352 : vector<16x128xf32>
    %cst_85 = arith.constant dense<0.000000e+00> : vector<16xf32>
    %354 = vector.multi_reduction <add>, %353, %cst_85 [1] : vector<16x128xf32> to vector<16xf32>
    %355 = vector.shape_cast %354 : vector<16xf32> to vector<16x1xf32>
    %cst_86 = arith.constant 3.125000e-02 : f32
    %356 = vector.broadcast %cst_86 : f32 to vector<16x1xf32>
    %357 = arith.mulf %355, %356 : vector<16x1xf32>
    %cst_87 = arith.constant 9.99999974E-6 : f32
    %358 = vector.broadcast %cst_87 : f32 to vector<16x1xf32>
    %359 = arith.addf %357, %358 : vector<16x1xf32>
    %360 = math.rsqrt %359 : vector<16x1xf32>
    %361 = vector.broadcast %360 : vector<16x1xf32> to vector<16x128xf32>
    %362 = arith.mulf %352, %361 : vector<16x128xf32>
    %363 = arith.addf %342, %362 : vector<16x128xf32>
    %364 = vector.broadcast %28 : vector<1x128xf32> to vector<16x128xf32>
    %365 = arith.mulf %293, %364 : vector<16x128xf32>
    %cst_88 = arith.constant dense<0.000000e+00> : vector<16xf32>
    %366 = vector.multi_reduction <add>, %365, %cst_88 [1] : vector<16x128xf32> to vector<16xf32>
    %367 = vector.shape_cast %366 : vector<16xf32> to vector<16x1xf32>
    %cst_89 = arith.constant 3.125000e-02 : f32
    %368 = vector.broadcast %cst_89 : f32 to vector<16x1xf32>
    %369 = arith.mulf %367, %368 : vector<16x1xf32>
    %370 = vector.broadcast %369 : vector<16x1xf32> to vector<16x128xf32>
    %371 = arith.subf %293, %370 : vector<16x128xf32>
    %372 = vector.broadcast %28 : vector<1x128xf32> to vector<16x128xf32>
    %373 = arith.mulf %371, %372 : vector<16x128xf32>
    %374 = arith.mulf %373, %373 : vector<16x128xf32>
    %cst_90 = arith.constant dense<0.000000e+00> : vector<16xf32>
    %375 = vector.multi_reduction <add>, %374, %cst_90 [1] : vector<16x128xf32> to vector<16xf32>
    %376 = vector.shape_cast %375 : vector<16xf32> to vector<16x1xf32>
    %cst_91 = arith.constant 3.125000e-02 : f32
    %377 = vector.broadcast %cst_91 : f32 to vector<16x1xf32>
    %378 = arith.mulf %376, %377 : vector<16x1xf32>
    %cst_92 = arith.constant 9.99999974E-6 : f32
    %379 = vector.broadcast %cst_92 : f32 to vector<16x1xf32>
    %380 = arith.addf %378, %379 : vector<16x1xf32>
    %381 = math.rsqrt %380 : vector<16x1xf32>
    %382 = vector.broadcast %381 : vector<16x1xf32> to vector<16x128xf32>
    %383 = arith.mulf %373, %382 : vector<16x128xf32>
    %384 = arith.addf %363, %383 : vector<16x128xf32>
    %385 = vector.broadcast %296 : vector<1x128xf32> to vector<16x128xf32>
    %386 = arith.mulf %384, %385 : vector<16x128xf32>
    %387 = vector.broadcast %299 : vector<1x128xf32> to vector<16x128xf32>
    %388 = arith.addf %386, %387 : vector<16x128xf32>
    %cst_93 = arith.constant dense<0.000000e+00> : vector<16x128xf32>
    %389 = tpu.matmul %388, %104, %cst_93 {dimension_numbers = #tpu.dot_dimension_numbers<[1], [0], [0], [1], [0, 0, 1, 1], [], []>} : vector<16x128xf32>, vector<128x128xf32>, vector<16x128xf32> -> vector<16x128xf32>
    %390 = vector.extract_strided_slice %86 {offsets = [9, 0], sizes = [1, 128], strides = [1, 1]} : vector<13x128xf32> to vector<1x128xf32>
    %391 = vector.shape_cast %390 : vector<1x128xf32> to vector<128xf32>
    %392 = vector.shape_cast %391 : vector<128xf32> to vector<1x128xf32>
    %393 = vector.broadcast %392 : vector<1x128xf32> to vector<16x128xf32>
    %394 = arith.addf %389, %393 : vector<16x128xf32>
    %cst_94 = arith.constant 5.000000e-01 : f32
    %395 = vector.broadcast %cst_94 : f32 to vector<16x128xf32>
    %396 = arith.mulf %395, %394 : vector<16x128xf32>
    %cst_95 = arith.constant 0.707106769 : f32
    %397 = vector.broadcast %cst_95 : f32 to vector<16x128xf32>
    %398 = arith.mulf %394, %397 : vector<16x128xf32>
    %cst_96 = arith.constant 0.000000e+00 : f32
    %399 = vector.broadcast %cst_96 : f32 to vector<16x128xf32>
    %400 = arith.cmpf oge, %398, %399 : vector<16x128xf32>
    %cst_97 = arith.constant 1.000000e+00 : f32
    %cst_98 = arith.constant -1.000000e+00 : f32
    %401 = vector.broadcast %cst_97 : f32 to vector<16x128xf32>
    %402 = vector.broadcast %cst_98 : f32 to vector<16x128xf32>
    %403 = arith.select %400, %401, %402 : vector<16x128xi1>, vector<16x128xf32>
    %404 = math.absf %398 : vector<16x128xf32>
    %cst_99 = arith.constant 0.327591091 : f32
    %405 = vector.broadcast %cst_99 : f32 to vector<16x128xf32>
    %406 = arith.mulf %405, %404 : vector<16x128xf32>
    %cst_100 = arith.constant 1.000000e+00 : f32
    %407 = vector.broadcast %cst_100 : f32 to vector<16x128xf32>
    %408 = arith.addf %407, %406 : vector<16x128xf32>
    %cst_101 = arith.constant 1.000000e+00 : f32
    %409 = vector.broadcast %cst_101 : f32 to vector<16x128xf32>
    %410 = arith.divf %409, %408 : vector<16x128xf32>
    %cst_102 = arith.constant 1.06140542 : f32
    %411 = vector.broadcast %cst_102 : f32 to vector<16x128xf32>
    %412 = arith.mulf %411, %410 : vector<16x128xf32>
    %cst_103 = arith.constant -1.45315206 : f32
    %413 = vector.broadcast %cst_103 : f32 to vector<16x128xf32>
    %414 = arith.addf %412, %413 : vector<16x128xf32>
    %415 = arith.mulf %414, %410 : vector<16x128xf32>
    %cst_104 = arith.constant 1.42141378 : f32
    %416 = vector.broadcast %cst_104 : f32 to vector<16x128xf32>
    %417 = arith.addf %415, %416 : vector<16x128xf32>
    %418 = arith.mulf %417, %410 : vector<16x128xf32>
    %cst_105 = arith.constant -0.284496725 : f32
    %419 = vector.broadcast %cst_105 : f32 to vector<16x128xf32>
    %420 = arith.addf %418, %419 : vector<16x128xf32>
    %421 = arith.mulf %420, %410 : vector<16x128xf32>
    %cst_106 = arith.constant 0.254829586 : f32
    %422 = vector.broadcast %cst_106 : f32 to vector<16x128xf32>
    %423 = arith.addf %421, %422 : vector<16x128xf32>
    %424 = arith.mulf %423, %410 : vector<16x128xf32>
    %425 = arith.mulf %404, %404 : vector<16x128xf32>
    %cst_107 = arith.constant 0.000000e+00 : f32
    %426 = vector.broadcast %cst_107 : f32 to vector<16x128xf32>
    %427 = arith.subf %426, %425 : vector<16x128xf32>
    %428 = math.exp %427 : vector<16x128xf32>
    %429 = arith.mulf %424, %428 : vector<16x128xf32>
    %cst_108 = arith.constant 1.000000e+00 : f32
    %430 = vector.broadcast %cst_108 : f32 to vector<16x128xf32>
    %431 = arith.subf %430, %429 : vector<16x128xf32>
    %432 = arith.mulf %403, %431 : vector<16x128xf32>
    %cst_109 = arith.constant 1.000000e+00 : f32
    %433 = vector.broadcast %cst_109 : f32 to vector<16x128xf32>
    %434 = arith.addf %433, %432 : vector<16x128xf32>
    %435 = arith.mulf %396, %434 : vector<16x128xf32>
    %cst_110 = arith.constant dense<0.000000e+00> : vector<16x128xf32>
    %436 = tpu.matmul %435, %105, %cst_110 {dimension_numbers = #tpu.dot_dimension_numbers<[1], [0], [0], [1], [0, 0, 1, 1], [], []>} : vector<16x128xf32>, vector<128x128xf32>, vector<16x128xf32> -> vector<16x128xf32>
    %437 = vector.extract_strided_slice %86 {offsets = [10, 0], sizes = [1, 128], strides = [1, 1]} : vector<13x128xf32> to vector<1x128xf32>
    %438 = vector.shape_cast %437 : vector<1x128xf32> to vector<128xf32>
    %439 = vector.shape_cast %438 : vector<128xf32> to vector<1x128xf32>
    %440 = vector.broadcast %439 : vector<1x128xf32> to vector<16x128xf32>
    %441 = arith.addf %436, %440 : vector<16x128xf32>
    %442 = arith.addf %388, %441 : vector<16x128xf32>
    %443 = vector.extract_strided_slice %86 {offsets = [11, 0], sizes = [1, 128], strides = [1, 1]} : vector<13x128xf32> to vector<1x128xf32>
    %444 = vector.shape_cast %443 : vector<1x128xf32> to vector<128xf32>
    %445 = vector.shape_cast %444 : vector<128xf32> to vector<1x128xf32>
    %446 = vector.extract_strided_slice %86 {offsets = [12, 0], sizes = [1, 128], strides = [1, 1]} : vector<13x128xf32> to vector<1x128xf32>
    %447 = vector.shape_cast %446 : vector<1x128xf32> to vector<128xf32>
    %448 = vector.shape_cast %447 : vector<128xf32> to vector<1x128xf32>
    %cst_111 = arith.constant 0.000000e+00 : f32
    %449 = vector.broadcast %cst_111 : f32 to vector<16x128xf32>
    %450 = vector.broadcast %7 : vector<1x128xf32> to vector<16x128xf32>
    %451 = arith.mulf %442, %450 : vector<16x128xf32>
    %cst_112 = arith.constant dense<0.000000e+00> : vector<16xf32>
    %452 = vector.multi_reduction <add>, %451, %cst_112 [1] : vector<16x128xf32> to vector<16xf32>
    %453 = vector.shape_cast %452 : vector<16xf32> to vector<16x1xf32>
    %cst_113 = arith.constant 3.125000e-02 : f32
    %454 = vector.broadcast %cst_113 : f32 to vector<16x1xf32>
    %455 = arith.mulf %453, %454 : vector<16x1xf32>
    %456 = vector.broadcast %455 : vector<16x1xf32> to vector<16x128xf32>
    %457 = arith.subf %442, %456 : vector<16x128xf32>
    %458 = vector.broadcast %7 : vector<1x128xf32> to vector<16x128xf32>
    %459 = arith.mulf %457, %458 : vector<16x128xf32>
    %460 = arith.mulf %459, %459 : vector<16x128xf32>
    %cst_114 = arith.constant dense<0.000000e+00> : vector<16xf32>
    %461 = vector.multi_reduction <add>, %460, %cst_114 [1] : vector<16x128xf32> to vector<16xf32>
    %462 = vector.shape_cast %461 : vector<16xf32> to vector<16x1xf32>
    %cst_115 = arith.constant 3.125000e-02 : f32
    %463 = vector.broadcast %cst_115 : f32 to vector<16x1xf32>
    %464 = arith.mulf %462, %463 : vector<16x1xf32>
    %cst_116 = arith.constant 9.99999974E-6 : f32
    %465 = vector.broadcast %cst_116 : f32 to vector<16x1xf32>
    %466 = arith.addf %464, %465 : vector<16x1xf32>
    %467 = math.rsqrt %466 : vector<16x1xf32>
    %468 = vector.broadcast %467 : vector<16x1xf32> to vector<16x128xf32>
    %469 = arith.mulf %459, %468 : vector<16x128xf32>
    %470 = arith.addf %449, %469 : vector<16x128xf32>
    %471 = vector.broadcast %14 : vector<1x128xf32> to vector<16x128xf32>
    %472 = arith.mulf %442, %471 : vector<16x128xf32>
    %cst_117 = arith.constant dense<0.000000e+00> : vector<16xf32>
    %473 = vector.multi_reduction <add>, %472, %cst_117 [1] : vector<16x128xf32> to vector<16xf32>
    %474 = vector.shape_cast %473 : vector<16xf32> to vector<16x1xf32>
    %cst_118 = arith.constant 3.125000e-02 : f32
    %475 = vector.broadcast %cst_118 : f32 to vector<16x1xf32>
    %476 = arith.mulf %474, %475 : vector<16x1xf32>
    %477 = vector.broadcast %476 : vector<16x1xf32> to vector<16x128xf32>
    %478 = arith.subf %442, %477 : vector<16x128xf32>
    %479 = vector.broadcast %14 : vector<1x128xf32> to vector<16x128xf32>
    %480 = arith.mulf %478, %479 : vector<16x128xf32>
    %481 = arith.mulf %480, %480 : vector<16x128xf32>
    %cst_119 = arith.constant dense<0.000000e+00> : vector<16xf32>
    %482 = vector.multi_reduction <add>, %481, %cst_119 [1] : vector<16x128xf32> to vector<16xf32>
    %483 = vector.shape_cast %482 : vector<16xf32> to vector<16x1xf32>
    %cst_120 = arith.constant 3.125000e-02 : f32
    %484 = vector.broadcast %cst_120 : f32 to vector<16x1xf32>
    %485 = arith.mulf %483, %484 : vector<16x1xf32>
    %cst_121 = arith.constant 9.99999974E-6 : f32
    %486 = vector.broadcast %cst_121 : f32 to vector<16x1xf32>
    %487 = arith.addf %485, %486 : vector<16x1xf32>
    %488 = math.rsqrt %487 : vector<16x1xf32>
    %489 = vector.broadcast %488 : vector<16x1xf32> to vector<16x128xf32>
    %490 = arith.mulf %480, %489 : vector<16x128xf32>
    %491 = arith.addf %470, %490 : vector<16x128xf32>
    %492 = vector.broadcast %21 : vector<1x128xf32> to vector<16x128xf32>
    %493 = arith.mulf %442, %492 : vector<16x128xf32>
    %cst_122 = arith.constant dense<0.000000e+00> : vector<16xf32>
    %494 = vector.multi_reduction <add>, %493, %cst_122 [1] : vector<16x128xf32> to vector<16xf32>
    %495 = vector.shape_cast %494 : vector<16xf32> to vector<16x1xf32>
    %cst_123 = arith.constant 3.125000e-02 : f32
    %496 = vector.broadcast %cst_123 : f32 to vector<16x1xf32>
    %497 = arith.mulf %495, %496 : vector<16x1xf32>
    %498 = vector.broadcast %497 : vector<16x1xf32> to vector<16x128xf32>
    %499 = arith.subf %442, %498 : vector<16x128xf32>
    %500 = vector.broadcast %21 : vector<1x128xf32> to vector<16x128xf32>
    %501 = arith.mulf %499, %500 : vector<16x128xf32>
    %502 = arith.mulf %501, %501 : vector<16x128xf32>
    %cst_124 = arith.constant dense<0.000000e+00> : vector<16xf32>
    %503 = vector.multi_reduction <add>, %502, %cst_124 [1] : vector<16x128xf32> to vector<16xf32>
    %504 = vector.shape_cast %503 : vector<16xf32> to vector<16x1xf32>
    %cst_125 = arith.constant 3.125000e-02 : f32
    %505 = vector.broadcast %cst_125 : f32 to vector<16x1xf32>
    %506 = arith.mulf %504, %505 : vector<16x1xf32>
    %cst_126 = arith.constant 9.99999974E-6 : f32
    %507 = vector.broadcast %cst_126 : f32 to vector<16x1xf32>
    %508 = arith.addf %506, %507 : vector<16x1xf32>
    %509 = math.rsqrt %508 : vector<16x1xf32>
    %510 = vector.broadcast %509 : vector<16x1xf32> to vector<16x128xf32>
    %511 = arith.mulf %501, %510 : vector<16x128xf32>
    %512 = arith.addf %491, %511 : vector<16x128xf32>
    %513 = vector.broadcast %28 : vector<1x128xf32> to vector<16x128xf32>
    %514 = arith.mulf %442, %513 : vector<16x128xf32>
    %cst_127 = arith.constant dense<0.000000e+00> : vector<16xf32>
    %515 = vector.multi_reduction <add>, %514, %cst_127 [1] : vector<16x128xf32> to vector<16xf32>
    %516 = vector.shape_cast %515 : vector<16xf32> to vector<16x1xf32>
    %cst_128 = arith.constant 3.125000e-02 : f32
    %517 = vector.broadcast %cst_128 : f32 to vector<16x1xf32>
    %518 = arith.mulf %516, %517 : vector<16x1xf32>
    %519 = vector.broadcast %518 : vector<16x1xf32> to vector<16x128xf32>
    %520 = arith.subf %442, %519 : vector<16x128xf32>
    %521 = vector.broadcast %28 : vector<1x128xf32> to vector<16x128xf32>
    %522 = arith.mulf %520, %521 : vector<16x128xf32>
    %523 = arith.mulf %522, %522 : vector<16x128xf32>
    %cst_129 = arith.constant dense<0.000000e+00> : vector<16xf32>
    %524 = vector.multi_reduction <add>, %523, %cst_129 [1] : vector<16x128xf32> to vector<16xf32>
    %525 = vector.shape_cast %524 : vector<16xf32> to vector<16x1xf32>
    %cst_130 = arith.constant 3.125000e-02 : f32
    %526 = vector.broadcast %cst_130 : f32 to vector<16x1xf32>
    %527 = arith.mulf %525, %526 : vector<16x1xf32>
    %cst_131 = arith.constant 9.99999974E-6 : f32
    %528 = vector.broadcast %cst_131 : f32 to vector<16x1xf32>
    %529 = arith.addf %527, %528 : vector<16x1xf32>
    %530 = math.rsqrt %529 : vector<16x1xf32>
    %531 = vector.broadcast %530 : vector<16x1xf32> to vector<16x128xf32>
    %532 = arith.mulf %522, %531 : vector<16x128xf32>
    %533 = arith.addf %512, %532 : vector<16x128xf32>
    %534 = vector.broadcast %445 : vector<1x128xf32> to vector<16x128xf32>
    %535 = arith.mulf %533, %534 : vector<16x128xf32>
    %536 = vector.broadcast %448 : vector<1x128xf32> to vector<16x128xf32>
    %537 = arith.addf %535, %536 : vector<16x128xf32>
    %538 = vector.extract_strided_slice %86 {offsets = [1, 0], sizes = [1, 128], strides = [1, 1]} : vector<13x128xf32> to vector<1x128xf32>
    %539 = vector.shape_cast %538 : vector<1x128xf32> to vector<128xf32>
    %540 = vector.shape_cast %539 : vector<128xf32> to vector<1x128xf32>
    %541 = vector.extract_strided_slice %86 {offsets = [2, 0], sizes = [1, 128], strides = [1, 1]} : vector<13x128xf32> to vector<1x128xf32>
    %542 = vector.shape_cast %541 : vector<1x128xf32> to vector<128xf32>
    %543 = vector.shape_cast %542 : vector<128xf32> to vector<1x128xf32>
    %cst_132 = arith.constant 0.000000e+00 : f32
    %544 = vector.broadcast %cst_132 : f32 to vector<16x128xf32>
    %545 = vector.broadcast %7 : vector<1x128xf32> to vector<16x128xf32>
    %546 = arith.mulf %537, %545 : vector<16x128xf32>
    %cst_133 = arith.constant dense<0.000000e+00> : vector<16xf32>
    %547 = vector.multi_reduction <add>, %546, %cst_133 [1] : vector<16x128xf32> to vector<16xf32>
    %548 = vector.shape_cast %547 : vector<16xf32> to vector<16x1xf32>
    %cst_134 = arith.constant 3.125000e-02 : f32
    %549 = vector.broadcast %cst_134 : f32 to vector<16x1xf32>
    %550 = arith.mulf %548, %549 : vector<16x1xf32>
    %551 = vector.broadcast %550 : vector<16x1xf32> to vector<16x128xf32>
    %552 = arith.subf %537, %551 : vector<16x128xf32>
    %553 = vector.broadcast %7 : vector<1x128xf32> to vector<16x128xf32>
    %554 = arith.mulf %552, %553 : vector<16x128xf32>
    %555 = arith.mulf %554, %554 : vector<16x128xf32>
    %cst_135 = arith.constant dense<0.000000e+00> : vector<16xf32>
    %556 = vector.multi_reduction <add>, %555, %cst_135 [1] : vector<16x128xf32> to vector<16xf32>
    %557 = vector.shape_cast %556 : vector<16xf32> to vector<16x1xf32>
    %cst_136 = arith.constant 3.125000e-02 : f32
    %558 = vector.broadcast %cst_136 : f32 to vector<16x1xf32>
    %559 = arith.mulf %557, %558 : vector<16x1xf32>
    %cst_137 = arith.constant 9.99999974E-6 : f32
    %560 = vector.broadcast %cst_137 : f32 to vector<16x1xf32>
    %561 = arith.addf %559, %560 : vector<16x1xf32>
    %562 = math.rsqrt %561 : vector<16x1xf32>
    %563 = vector.broadcast %562 : vector<16x1xf32> to vector<16x128xf32>
    %564 = arith.mulf %554, %563 : vector<16x128xf32>
    %565 = arith.addf %544, %564 : vector<16x128xf32>
    %566 = vector.broadcast %14 : vector<1x128xf32> to vector<16x128xf32>
    %567 = arith.mulf %537, %566 : vector<16x128xf32>
    %cst_138 = arith.constant dense<0.000000e+00> : vector<16xf32>
    %568 = vector.multi_reduction <add>, %567, %cst_138 [1] : vector<16x128xf32> to vector<16xf32>
    %569 = vector.shape_cast %568 : vector<16xf32> to vector<16x1xf32>
    %cst_139 = arith.constant 3.125000e-02 : f32
    %570 = vector.broadcast %cst_139 : f32 to vector<16x1xf32>
    %571 = arith.mulf %569, %570 : vector<16x1xf32>
    %572 = vector.broadcast %571 : vector<16x1xf32> to vector<16x128xf32>
    %573 = arith.subf %537, %572 : vector<16x128xf32>
    %574 = vector.broadcast %14 : vector<1x128xf32> to vector<16x128xf32>
    %575 = arith.mulf %573, %574 : vector<16x128xf32>
    %576 = arith.mulf %575, %575 : vector<16x128xf32>
    %cst_140 = arith.constant dense<0.000000e+00> : vector<16xf32>
    %577 = vector.multi_reduction <add>, %576, %cst_140 [1] : vector<16x128xf32> to vector<16xf32>
    %578 = vector.shape_cast %577 : vector<16xf32> to vector<16x1xf32>
    %cst_141 = arith.constant 3.125000e-02 : f32
    %579 = vector.broadcast %cst_141 : f32 to vector<16x1xf32>
    %580 = arith.mulf %578, %579 : vector<16x1xf32>
    %cst_142 = arith.constant 9.99999974E-6 : f32
    %581 = vector.broadcast %cst_142 : f32 to vector<16x1xf32>
    %582 = arith.addf %580, %581 : vector<16x1xf32>
    %583 = math.rsqrt %582 : vector<16x1xf32>
    %584 = vector.broadcast %583 : vector<16x1xf32> to vector<16x128xf32>
    %585 = arith.mulf %575, %584 : vector<16x128xf32>
    %586 = arith.addf %565, %585 : vector<16x128xf32>
    %587 = vector.broadcast %21 : vector<1x128xf32> to vector<16x128xf32>
    %588 = arith.mulf %537, %587 : vector<16x128xf32>
    %cst_143 = arith.constant dense<0.000000e+00> : vector<16xf32>
    %589 = vector.multi_reduction <add>, %588, %cst_143 [1] : vector<16x128xf32> to vector<16xf32>
    %590 = vector.shape_cast %589 : vector<16xf32> to vector<16x1xf32>
    %cst_144 = arith.constant 3.125000e-02 : f32
    %591 = vector.broadcast %cst_144 : f32 to vector<16x1xf32>
    %592 = arith.mulf %590, %591 : vector<16x1xf32>
    %593 = vector.broadcast %592 : vector<16x1xf32> to vector<16x128xf32>
    %594 = arith.subf %537, %593 : vector<16x128xf32>
    %595 = vector.broadcast %21 : vector<1x128xf32> to vector<16x128xf32>
    %596 = arith.mulf %594, %595 : vector<16x128xf32>
    %597 = arith.mulf %596, %596 : vector<16x128xf32>
    %cst_145 = arith.constant dense<0.000000e+00> : vector<16xf32>
    %598 = vector.multi_reduction <add>, %597, %cst_145 [1] : vector<16x128xf32> to vector<16xf32>
    %599 = vector.shape_cast %598 : vector<16xf32> to vector<16x1xf32>
    %cst_146 = arith.constant 3.125000e-02 : f32
    %600 = vector.broadcast %cst_146 : f32 to vector<16x1xf32>
    %601 = arith.mulf %599, %600 : vector<16x1xf32>
    %cst_147 = arith.constant 9.99999974E-6 : f32
    %602 = vector.broadcast %cst_147 : f32 to vector<16x1xf32>
    %603 = arith.addf %601, %602 : vector<16x1xf32>
    %604 = math.rsqrt %603 : vector<16x1xf32>
    %605 = vector.broadcast %604 : vector<16x1xf32> to vector<16x128xf32>
    %606 = arith.mulf %596, %605 : vector<16x128xf32>
    %607 = arith.addf %586, %606 : vector<16x128xf32>
    %608 = vector.broadcast %28 : vector<1x128xf32> to vector<16x128xf32>
    %609 = arith.mulf %537, %608 : vector<16x128xf32>
    %cst_148 = arith.constant dense<0.000000e+00> : vector<16xf32>
    %610 = vector.multi_reduction <add>, %609, %cst_148 [1] : vector<16x128xf32> to vector<16xf32>
    %611 = vector.shape_cast %610 : vector<16xf32> to vector<16x1xf32>
    %cst_149 = arith.constant 3.125000e-02 : f32
    %612 = vector.broadcast %cst_149 : f32 to vector<16x1xf32>
    %613 = arith.mulf %611, %612 : vector<16x1xf32>
    %614 = vector.broadcast %613 : vector<16x1xf32> to vector<16x128xf32>
    %615 = arith.subf %537, %614 : vector<16x128xf32>
    %616 = vector.broadcast %28 : vector<1x128xf32> to vector<16x128xf32>
    %617 = arith.mulf %615, %616 : vector<16x128xf32>
    %618 = arith.mulf %617, %617 : vector<16x128xf32>
    %cst_150 = arith.constant dense<0.000000e+00> : vector<16xf32>
    %619 = vector.multi_reduction <add>, %618, %cst_150 [1] : vector<16x128xf32> to vector<16xf32>
    %620 = vector.shape_cast %619 : vector<16xf32> to vector<16x1xf32>
    %cst_151 = arith.constant 3.125000e-02 : f32
    %621 = vector.broadcast %cst_151 : f32 to vector<16x1xf32>
    %622 = arith.mulf %620, %621 : vector<16x1xf32>
    %cst_152 = arith.constant 9.99999974E-6 : f32
    %623 = vector.broadcast %cst_152 : f32 to vector<16x1xf32>
    %624 = arith.addf %622, %623 : vector<16x1xf32>
    %625 = math.rsqrt %624 : vector<16x1xf32>
    %626 = vector.broadcast %625 : vector<16x1xf32> to vector<16x128xf32>
    %627 = arith.mulf %617, %626 : vector<16x128xf32>
    %628 = arith.addf %607, %627 : vector<16x128xf32>
    %629 = vector.broadcast %540 : vector<1x128xf32> to vector<16x128xf32>
    %630 = arith.mulf %628, %629 : vector<16x128xf32>
    %631 = vector.broadcast %543 : vector<1x128xf32> to vector<16x128xf32>
    %632 = arith.addf %630, %631 : vector<16x128xf32>
    %633 = vector.shape_cast %632 : vector<16x128xf32> to vector<2x8x128xf32>
    %c0_153 = arith.constant 0 : index
    %c0_154 = arith.constant 0 : index
    %c0_155 = arith.constant 0 : index
    %c0_156 = arith.constant 0 : index
    %634 = vector.load %arg5[%c0_153, %c0_154, %c0_155, %c0_156] : memref<1x2x8x128xf32, #tpu.memory_space<vmem>>, vector<1x2x8x128xf32>
    %635 = vector.shape_cast %634 : vector<1x2x8x128xf32> to vector<2x8x128xf32>
    %636 = vector.shape_cast %633 : vector<2x8x128xf32> to vector<1x2x8x128xf32>
    tpu.vector_store %arg5[%c0_153, %c0_154, %c0_155, %c0_156], %636 {strides = array<i32>} : memref<1x2x8x128xf32, #tpu.memory_space<vmem>>, vector<1x2x8x128xf32>,
    return
  }
  func.func @transform_0(%arg0: i32) -> (i32, i32, i32, i32) {
    %c0_i32 = arith.constant 0 : i32
    %c0_i32_0 = arith.constant 0 : i32
    %c0_i32_1 = arith.constant 0 : i32
    %c0_i32_2 = arith.constant 0 : i32
    return %arg0, %c0_i32, %c0_i32_0, %c0_i32_1 : i32, i32, i32, i32
  }
  func.func @transform_1(%arg0: i32) -> (i32, i32, i32) {
    %c0_i32 = arith.constant 0 : i32
    %c0_i32_0 = arith.constant 0 : i32
    %c0_i32_1 = arith.constant 0 : i32
    return %arg0, %c0_i32, %c0_i32_0 : i32, i32, i32
  }
  func.func @transform_2(%arg0: i32) -> (i32, i32, i32, i32) {
    %c0_i32 = arith.constant 0 : i32
    %c0_i32_0 = arith.constant 0 : i32
    %c0_i32_1 = arith.constant 0 : i32
    %c0_i32_2 = arith.constant 0 : i32
    return %arg0, %c0_i32, %c0_i32_0, %c0_i32_1 : i32, i32, i32, i32
  }
  func.func @transform_3(%arg0: i32) -> (i32, i32, i32) {
    %c0_i32 = arith.constant 0 : i32
    %c0_i32_0 = arith.constant 0 : i32
    %c0_i32_1 = arith.constant 0 : i32
    return %arg0, %c0_i32, %c0_i32_0 : i32, i32, i32
  }
  func.func @transform_4(%arg0: i32) -> (i32, i32, i32, i32) {
    %c0_i32 = arith.constant 0 : i32
    %c0_i32_0 = arith.constant 0 : i32
    %c0_i32_1 = arith.constant 0 : i32
    %c0_i32_2 = arith.constant 0 : i32
    return %arg0, %c0_i32, %c0_i32_0, %c0_i32_1 : i32, i32, i32, i32
  }
}

</mosaic_0001>

<bundles_post_ra>
// kernel: att_new_3_forward.3
= control target key start
LH: loop header
LB: loop body
LE: loop exit
PB: predicated region body
PF: predicated region fallthrough
CT: control target
= control target key end

     0   :  { %s2651_s0 = inlined_call_operand.vmem [shape: f32[2,2,8,128], index: 0, kind: input, shape index: {}]   ;;  %s2652_s1 = inlined_call_operand.vmem [shape: f32[2,2,128,128], index: 1, kind: input, shape index: {}]   ;;  %s2653_s2 = inlined_call_operand.vmem [shape: f32[2,2,128], index: 2, kind: input, shape index: {}]   ;;  %s2654_s3 = inlined_call_operand.vmem [shape: f32[256,128], index: 3, kind: input, shape index: {}]   ;;  %s2655_s4 = inlined_call_operand.vmem [shape: f32[1,128], index: 4, kind: input, shape index: {}]   ;;  %s2656_s5 = inlined_call_operand.hbm [shape: f32[2,256], index: 5, kind: output, shape index: {0}]   ;;  %s2657_s6 = inlined_call_operand.vmem [shape: f32[2,128], index: 6, kind: output, shape index: {1}]  }
   0x1   :  { %v37_v0 = vld [vmem:[%s2652_s1] sm:$0xff]  ;;  %v38_v1 = vld [vmem:[%s2652_s1 + $0x8] sm:$0xff]  ;;  %v39_v5 = vld [vmem:[%s2652_s1 + $0x10] sm:$0xff] }
   0x2   :  { %v53_v2 = vld [vmem:[%s2652_s1 + $0x80] sm:$0xff]  ;;  %v1942_v3 = vpack.c.bf16 %v38_v1, %v37_v0  ;;  %v54_v4 = vld [vmem:[%s2652_s1 + $0x88] sm:$0xff]  ;;  %v40_v6 = vld [vmem:[%s2652_s1 + $0x18] sm:$0xff] }
   0x3   :  { %v1974_v7 = vpack.c.bf16 %v54_v4, %v53_v2  ;;  %v1946_v8 = vpack.c.bf16 %v40_v6, %v39_v5  ;;  %v55_v9 = vld [vmem:[%s2652_s1 + $0x90] sm:$0xff]  ;;  %v56_v10 = vld [vmem:[%s2652_s1 + $0x98] sm:$0xff]  ;;  %v41_v11 = vld [vmem:[%s2652_s1 + $0x20] sm:$0xff] }
   0x4   :  { %1943 = vmatprep.subr.bf16.mxu0 %v1942_v3  ;;  %v1978_v12 = vpack.c.bf16 %v56_v10, %v55_v9  ;;  %v42_v13 = vld [vmem:[%s2652_s1 + $0x28] sm:$0xff]  ;;  %v57_v14 = vld [vmem:[%s2652_s1 + $0xa0] sm:$0xff]  ;;  %v43_v18 = vld [vmem:[%s2652_s1 + $0x30] sm:$0xff] }
   0x5   :  { %v58_v15 = vld [vmem:[%s2652_s1 + $0xa8] sm:$0xff]  ;;  %1975 = vmatprep.subr.bf16.mxu1 %v1974_v7  ;;  %1945 = vmatpush3.bf16.msra.mxu0 %v1942_v3  ;;  %v1950_v16 = vpack.c.bf16 %v42_v13, %v41_v11  ;;  %v44_v19 = vld [vmem:[%s2652_s1 + $0x38] sm:$0xff]  ;;  %v59_v20 = vld [vmem:[%s2652_s1 + $0xb0] sm:$0xff] }
   0x6   :  { %1977 = vmatpush3.bf16.msra.mxu1 %v1974_v7  ;;  %1947 = vmatprep.subr.bf16.mxu0 %v1946_v8  ;;  %v1982_v17 = vpack.c.bf16 %v58_v15, %v57_v14  ;;  %v60_v21 = vld [vmem:[%s2652_s1 + $0xb8] sm:$0xff]  ;;  %v1954_v22 = vpack.c.bf16 %v44_v19, %v43_v18  ;;  %v45_v24 = vld [vmem:[%s2652_s1 + $0x40] sm:$0xff]  ;;  %v46_v25 = vld [vmem:[%s2652_s1 + $0x48] sm:$0xff] }
   0x7   :  { %1979 = vmatprep.subr.bf16.mxu1 %v1978_v12  ;;  %v1986_v23 = vpack.c.bf16 %v60_v21, %v59_v20  ;;  %v2260_v26 = vld [vmem:[%s2651_s0] sm:$0xff]  ;;  %v62_v28 = vld [vmem:[%s2652_s1 + $0xc8] sm:$0xff] }
   0x8   :  { %v61_v27 = vld [vmem:[%s2652_s1 + $0xc0] sm:$0xff]  ;;  %1774 = vmatprep.mubr.f32.mxu0 %v2260_v26  ;;  %1809 = vmatprep.mubr.f32.mxu1 %v2260_v26 }
   0x9   :  { %1949 = vmatpush3.bf16.msra.mxu0 %v1946_v8 }
   0xa   :  { %1981 = vmatpush3.bf16.msra.mxu1 %v1978_v12  ;;  %1951 = vmatprep.subr.bf16.mxu0 %v1950_v16 }
   0xb   :  { %1983 = vmatprep.subr.bf16.mxu1 %v1982_v17 }
   0xc   :  { %12 = vsyncpa [#allocation3], 0  ;;  %v1958_v29 = vpack.c.bf16 %v46_v25, %v45_v24  ;;  %v1990_v30 = vpack.c.bf16 %v62_v28, %v61_v27  ;;  %v47_v31 = vld [vmem:[%s2652_s1 + $0x50] sm:$0xff]  ;;  %v48_v32 = vld [vmem:[%s2652_s1 + $0x58] sm:$0xff]  ;;  %v2165_v50 = vmov 0.0   ;;  %vm2166_vm0 = vmmov 0  }
   0xd   :  { %1953 = vmatpush3.bf16.msra.mxu0 %v1950_v16  ;;  %v63_v33 = vld [vmem:[%s2652_s1 + $0xd0] sm:$0xff]  ;;  %v64_v34 = vld [vmem:[%s2652_s1 + $0xd8] sm:$0xff]  ;;  %v1962_v35 = vpack.c.bf16 %v48_v32, %v47_v31  ;;  %v49_v37 = vld [vmem:[%s2652_s1 + $0x60] sm:$0xff]  ;;  %v23_v51 = vlaneseq  ;;  %vm371_vm3 = vcmask 64512   ;;  %vm1417_vm4 = vcmask 1041409  }
   0xe   :  { %1985 = vmatpush3.bf16.msra.mxu1 %v1982_v17  ;;  %1955 = vmatprep.subr.bf16.mxu0 %v1954_v22  ;;  %v1994_v36 = vpack.c.bf16 %v64_v34, %v63_v33  ;;  %v50_v38 = vld [vmem:[%s2652_s1 + $0x68] sm:$0xff]  ;;  %v65_v39 = vld [vmem:[%s2652_s1 + $0xe0] sm:$0xff]  ;;  %v51_v43 = vld [vmem:[%s2652_s1 + $0x70] sm:$0xff] }
   0xf   :  { %1987 = vmatprep.subr.bf16.mxu1 %v1986_v23  ;;  %v66_v40 = vld [vmem:[%s2652_s1 + $0xe8] sm:$0xff]  ;;  %v1966_v41 = vpack.c.bf16 %v50_v38, %v49_v37  ;;  %v52_v44 = vld [vmem:[%s2652_s1 + $0x78] sm:$0xff]  ;;  %v67_v45 = vld [vmem:[%s2652_s1 + $0xf0] sm:$0xff]  ;;  %v24_v52 = vand.u32 127, %v23_v51  ;;  %v2316_v53 = vshrl.u32 %v23_v51, 7 }
  0x10   :  { %v1998_v42 = vpack.c.bf16 %v66_v40, %v65_v39  ;;  %v68_v46 = vld [vmem:[%s2652_s1 + $0xf8] sm:$0xff]  ;;  %v1970_v47 = vpack.c.bf16 %v52_v44, %v51_v43  ;;  %v2309_v49 = vld [vmem:[%s2651_s0 + $0x8] sm:$0xff]  ;;  %v69_v55 = vld [vmem:[%s2653_s2] sm:$0x3] }
  0x11   :  { %1957 = vmatpush3.bf16.msra.mxu0 %v1954_v22  ;;  %v2002_v48 = vpack.c.bf16 %v68_v46, %v67_v45  ;;  %vm26_vm1 = vcmp.lt.s32.totalorder %v24_v52, 64  ;;  %v72_v54 = vsub.s32 0, %v2316_v53  ;;  %v151_v56 = vsub.s32 1, %v2316_v53  ;;  %v1574_v43 = vld [vmem:[%s2652_s1 + $0x100] sm:$0xff]  ;;  %v1575_v44 = vld [vmem:[%s2652_s1 + $0x108] sm:$0xff]  ;;  %v1576_v46 = vld [vmem:[%s2652_s1 + $0x110] sm:$0xff] }
  0x12   :  { %1989 = vmatpush3.bf16.msra.mxu1 %v1986_v23  ;;  %1959 = vmatprep.subr.bf16.mxu0 %v1958_v29  ;;  %v1568_v57 = vsel %vm26_vm1, 1.0, %v2165_v50  ;;  %vm30_vm2 = vcmp.ge.s32.totalorder %v24_v52, 64  ;;  %v2006_v45 = vpack.c.bf16 %v1575_v44, %v1574_v43  ;;  %v1578_v51 = vld [vmem:[%s2652_s1 + $0x120] sm:$0xff]  ;;  %v1579_v52 = vld [vmem:[%s2652_s1 + $0x128] sm:$0xff]  ;;  %v1601_v43 = vld [vmem:[%s2652_s1 + $0x1d8] sm:$0xff] }
  0x13   :  { %1991 = vmatprep.subr.bf16.mxu1 %v1990_v30  ;;  %v73_v58 = vrot.slane %v69_v55, %v72_v54  ;;  %v152_v59 = vrot.slane %v69_v55, %v151_v56  ;;  %v2328_v61 = vmul.f32 0.125, %v1568_v57  ;;  %v1569_v5 = vsel %vm30_vm2, 1.0, %v2165_v50  ;;  %v1580_v57 = vld [vmem:[%s2652_s1 + $0x130] sm:$0xff] }
  0x14   :  { %v2336_v8 = vmul.f32 0.125, %v1569_v5  ;;  %v2014_v55 = vpack.c.bf16 %v1579_v52, %v1578_v51  ;;  %v1605_v51 = vld [vmem:[%s2652_s1 + $0x1f8] sm:$0xff] }
  0x15   :  { %1961 = vmatpush3.bf16.msra.mxu0 %v1958_v29 }
  0x16   :  { %1993 = vmatpush3.bf16.msra.mxu1 %v1990_v30  ;;  %1963 = vmatprep.subr.bf16.mxu0 %v1962_v35 }
  0x17   :  { %1995 = vmatprep.subr.bf16.mxu1 %v1994_v36 }
  0x19   :  { %1965 = vmatpush3.bf16.msra.mxu0 %v1962_v35 }
  0x1a   :  { %1997 = vmatpush3.bf16.msra.mxu1 %v1994_v36  ;;  %1967 = vmatprep.subr.bf16.mxu0 %v1966_v41 }
  0x1b   :  { %1999 = vmatprep.subr.bf16.mxu1 %v1998_v42 }
  0x1d   :  { %1969 = vmatpush3.bf16.msra.mxu0 %v1966_v41 }
  0x1e   :  { %2001 = vmatpush3.bf16.msra.mxu1 %v1998_v42  ;;  %1971 = vmatprep.subr.bf16.mxu0 %v1970_v47 }
  0x1f   :  { %2003 = vmatprep.subr.bf16.mxu1 %v2002_v48 }
  0x21   :  { %1973 = vmatpush3.bf16.msra.mxu0 %v1970_v47  ;;  %v1577_v47 = vld [vmem:[%s2652_s1 + $0x118] sm:$0xff] }
  0x22   :  { %2005 = vmatpush3.bf16.msra.mxu1 %v2002_v48  ;;  %2007 = vmatprep.subr.bf16.mxu0 %v2006_v45  ;;  %v2010_v48 = vpack.c.bf16 %v1577_v47, %v1576_v46  ;;  %v1603_v46 = vld [vmem:[%s2652_s1 + $0x1e8] sm:$0xff] }
  0x23   :  { %1812 = vmatprep.subr.mxu1 %v2165_v50 }
  0x24   :  { %1775 = vmatmul.mubr.f32.vlgmr.msra.gmra.mrb[0].mxu0 %v2309_v49 }
  0x25   :  { %1810 = vmatmul.mubr.f32.vlgmr.msra.gmra.mrb[0].mxu1 %v2309_v49  ;;  %2009 = vmatpush3.bf16.msra.mxu0 %v2006_v45  ;;  %v1602_v45 = vld [vmem:[%s2652_s1 + $0x1e0] sm:$0xff] }
  0x26   :  { %1814 = vmatprep.mubr.msk.f32.mxu1 %vm2166_vm0, %v2165_v50  ;;  %2011 = vmatprep.subr.bf16.mxu0 %v2010_v48  ;;  %v2062_v47 = vpack.c.bf16 %v1603_v46, %v1602_v45 }
  0x29   :  { %2013 = vmatpush3.bf16.msra.mxu0 %v2010_v48  ;;  %v1604_v48 = vld [vmem:[%s2652_s1 + $0x1f0] sm:$0xff] }
  0x2a   :  { %2015 = vmatprep.subr.bf16.mxu0 %v2014_v55  ;;  %v2066_v52 = vpack.c.bf16 %v1605_v51, %v1604_v48 }
  0x2d   :  { %2017 = vmatpush3.bf16.msra.mxu0 %v2014_v55 }
  0xf7   :  { %v1776_v60 = vpop.f32.mrb[0].mxu0 }
  0xf8   :  { %v1811_v62 = vpop.f32.mrb[0].mxu1  ;;  %v140_v63 = vpop.f32.mrb[1].mxu0  ;;  %v146_v4 = vadd.f32 %v1776_v60, %v73_v58  ;;  %v1582_v60 = vld [vmem:[%s2652_s1 + $0x140] sm:$0xff] }
  0xf9   :  { %v141_v0 = vadd.f32 %v140_v63, %v73_v58  ;;  %v219_v1 = vpop.f32.mrb[1].mxu1  ;;  %v225_v6 = vadd.f32 %v1811_v62, %v152_v59  ;;  %v1581_v58 = vld [vmem:[%s2652_s1 + $0x138] sm:$0xff]  ;;  %v1583_v62 = vld [vmem:[%s2652_s1 + $0x148] sm:$0xff] }
  0xfa   :  { %v220_v2 = vadd.f32 %v219_v1, %v152_v59  ;;  %v230_v7 = vmul.f32 %v2328_v61, %v146_v4  ;;  %v398_v10 = vmul.f32 %v2336_v8, %v146_v4  ;;  %v2018_v59 = vpack.c.bf16 %v1581_v58, %v1580_v57  ;;  %v1585_v1 = vld [vmem:[%s2652_s1 + $0x158] sm:$0xff]  ;;  %v1587_v4 = vld [vmem:[%s2652_s1 + $0x168] sm:$0xff] }
  0xfb   :  { %v229_v3 = vmul.f32 %v2328_v61, %v141_v0  ;;  %v397_v9 = vmul.f32 %v2336_v8, %v141_v0  ;;  %v2022_v63 = vpack.c.bf16 %v1583_v62, %v1582_v60  ;;  %v1584_v0 = vld [vmem:[%s2652_s1 + $0x150] sm:$0xff] }
  0xfc   :  { %1813 = vmatpush3.xpose.msra.mxu1 %v220_v2  ;;  %2019 = vmatprep.subr.bf16.mxu0 %v2018_v59 }
  0xfd   :  { %1817 = vmatprep.subr.mxu1 %v2165_v50  ;;  %2021 = vmatpush3.bf16.msra.mxu0 %v2018_v59 }
  0xfe   :  { %2023 = vmatprep.subr.bf16.mxu0 %v2022_v63 }
  0xff   :  { %1815 = vmatmul.mubr.f32.vlgmr.msra.gmra.mrb[2].mxu1 %v229_v3  ;;  %v1586_v3 = vld [vmem:[%s2652_s1 + $0x160] sm:$0xff] }
 0x100   :  { %1818 = vmatpush3.xpose.msra.mxu1 %v225_v6  ;;  %1819 = vmatprep.mubr.msk.f32.mxu1 %vm2166_vm0, %v2165_v50  ;;  %v2030_v5 = vpack.c.bf16 %v1587_v4, %v1586_v3 }
 0x101   :  { %1822 = vmatprep.subr.mxu1 %v2165_v50  ;;  %2025 = vmatpush3.bf16.msra.mxu0 %v2022_v63 }
 0x103   :  { %1820 = vmatmul.mubr.f32.vlgmr.msra.gmra.mrb[4].mxu1 %v230_v7  ;;  %v1589_v7 = vld [vmem:[%s2652_s1 + $0x178] sm:$0xff] }
 0x104   :  { %1823 = vmatpush3.xpose.msra.mxu1 %v220_v2  ;;  %1824 = vmatprep.mubr.msk.f32.mxu1 %vm2166_vm0, %v2165_v50  ;;  %v2026_v2 = vpack.c.bf16 %v1585_v1, %v1584_v0 }
 0x105   :  { %1827 = vmatprep.subr.mxu1 %v2165_v50 }
 0x106   :  { %2027 = vmatprep.subr.bf16.mxu0 %v2026_v2 }
 0x107   :  { %1825 = vmatmul.mubr.f32.vlgmr.msra.gmra.mrb[6].mxu1 %v397_v9  ;;  %2029 = vmatpush3.bf16.msra.mxu0 %v2026_v2 }
 0x108   :  { %1828 = vmatpush3.xpose.msra.mxu1 %v225_v6  ;;  %1829 = vmatprep.mubr.msk.f32.mxu1 %vm2166_vm0, %v2165_v50  ;;  %v1588_v6 = vld [vmem:[%s2652_s1 + $0x170] sm:$0xff] }
 0x109   :  { %1832 = vmatprep.subr.mxu1 %v2165_v50  ;;  %2031 = vmatprep.subr.bf16.mxu0 %v2030_v5  ;;  %v2034_v9 = vpack.c.bf16 %v1589_v7, %v1588_v6 }
 0x10b   :  { %1830 = vmatmul.mubr.f32.vlgmr.msra.gmra.mrb[8].mxu1 %v398_v10  ;;  %2033 = vmatpush3.bf16.msra.mxu0 %v2030_v5  ;;  %v2422_v10 = vld [vmem:[%s2651_s0 + $0x10] sm:$0xff] }
 0x10c   :  { %1833 = vmatpush3.msra.mxu1 %v2260_v26  ;;  %1834 = vmatprep.mubr.msk.f32.mxu1 %vm2166_vm0, %v2165_v50 }
 0x10d   :  { %1837 = vmatprep.subr.mxu1 %v2165_v50  ;;  %2035 = vmatprep.subr.bf16.mxu0 %v2034_v9 }
 0x10e   :  { %1874 = vmatprep.mubr.f32.mxu0 %v2422_v10 }
 0x10f   :  { %2037 = vmatpush3.bf16.msra.mxu0 %v2034_v9 }
 0x110   :  { %1922 = vmatprep.subr.mxu0 %v2165_v50 }
 0x1d2   :  { %v297_v11 = vpop.f32.mrb[2].mxu1 }
 0x1d3   :  { %v1816_v12 = vpop.f32.mrb[3].mxu1  ;;  %v372_v13 = vsel %vm371_vm3, %v297_v11, -inf }
 0x1d4   :  { %373 = vmax.xlane.f32.xlu0 %v372_v13 }
 0x1d6   :  { %v367_v14 = vpop.f32.mrb[4].mxu1 }
 0x1d7   :  { %v1821_v15 = vpop.f32.mrb[5].mxu1  ;;  %v375_v16 = vsel %vm371_vm3, %v367_v14, -inf }
 0x1d8   :  { %376 = vmax.xlane.f32.xlu1 %v375_v16 }
 0x1da   :  { %v465_v17 = vpop.f32.mrb[6].mxu1 }
 0x1db   :  { %v1826_v18 = vpop.f32.mrb[7].mxu1  ;;  %v539_v19 = vsel %vm371_vm3, %v465_v17, -inf }
 0x1dc   :  { %540 = vmax.xlane.f32.xlu0 %v539_v19 }
 0x1de   :  { %v535_v20 = vpop.f32.mrb[8].mxu1 }
 0x1df   :  { %v1831_v21 = vpop.f32.mrb[9].mxu1  ;;  %v542_v22 = vsel %vm371_vm3, %v535_v20, -inf }
 0x1e0   :  { %543 = vmax.xlane.f32.xlu1 %v542_v22  ;;  %v1590_v21 = vld [vmem:[%s2652_s1 + $0x180] sm:$0xff]  ;;  %v1591_v22 = vld [vmem:[%s2652_s1 + $0x188] sm:$0xff] }
 0x261   :  { %v374_v23 = vpop.xlane.xlu0 %373 }
 0x262   :  { %v378_v24 = vsub.f32 %v297_v11, %v374_v23  ;;  %v2428_v11 = vld [vmem:[%s2651_s0 + $0x18] sm:$0xff] }
 0x263   :  { %1875 = vmatmul.mubr.f32.vlgmr.msra.gmra.mrb[2].mxu0 %v2428_v11 }
 0x264   :  { %v380_v25 = vmul.f32 1.442695, %v378_v24  ;;  %1924 = vmatprep.mubr.msk.f32.mxu0 %vm2166_vm0, %v2165_v50 }
 0x265   :  { %v377_v26 = vpop.xlane.xlu1 %376 }
 0x266   :  { %2105 = vpow2.f32 %v380_v25  ;;  %v379_v27 = vsub.f32 %v367_v14, %v377_v26 }
 0x268   :  { %v382_v28 = vmul.f32 1.442695, %v379_v27 }
 0x269   :  { %v541_v29 = vpop.xlane.xlu0 %540 }
 0x26a   :  { %2107 = vpow2.f32 %v382_v28  ;;  %v545_v30 = vsub.f32 %v465_v17, %v541_v29  ;;  %v2038_v28 = vpack.c.bf16 %v1591_v22, %v1590_v21  ;;  %v1592_v29 = vld [vmem:[%s2652_s1 + $0x190] sm:$0xff] }
 0x26c   :  { %v547_v31 = vmul.f32 1.442695, %v545_v30  ;;  %v1593_v30 = vld [vmem:[%s2652_s1 + $0x198] sm:$0xff] }
 0x26d   :  { %v544_v32 = vpop.xlane.xlu1 %543 }
 0x26e   :  { %2109 = vpow2.f32 %v547_v31  ;;  %v546_v33 = vsub.f32 %v535_v20, %v544_v32 }
 0x270   :  { %v2355_v34 = vpop.eup %2105  ;;  %v549_v35 = vmul.f32 1.442695, %v546_v33  ;;  %v2042_v33 = vpack.c.bf16 %v1593_v30, %v1592_v29 }
 0x271   :  { %v384_v36 = vsel %vm371_vm3, %v2355_v34, 0.0 }
 0x272   :  { %2111 = vpow2.f32 %v549_v35  ;;  %385 = vadd.xlane.f32.xlu0 %v384_v36  ;;  %v1595_v35 = vld [vmem:[%s2652_s1 + $0x1a8] sm:$0xff]  ;;  %v1596_v36 = vld [vmem:[%s2652_s1 + $0x1b0] sm:$0xff] }
 0x274   :  { %v2359_v37 = vpop.eup %2107 }
 0x275   :  { %v387_v38 = vsel %vm371_vm3, %v2359_v37, 0.0 }
 0x276   :  { %388 = vadd.xlane.f32.xlu0 %v387_v38 }
 0x278   :  { %v2363_v39 = vpop.eup %2109 }
 0x279   :  { %v551_v40 = vsel %vm371_vm3, %v2363_v39, 0.0 }
 0x27a   :  { %552 = vadd.xlane.f32.xlu1 %v551_v40  ;;  %v1599_v40 = vld [vmem:[%s2652_s1 + $0x1c8] sm:$0xff] }
 0x27c   :  { %v2367_v41 = vpop.eup %2111 }
 0x27d   :  { %v554_v42 = vsel %vm371_vm3, %v2367_v41, 0.0 }
 0x27e   :  { %555 = vadd.xlane.f32.xlu1 %v554_v42  ;;  %v1600_v42 = vld [vmem:[%s2652_s1 + $0x1d0] sm:$0xff] }
 0x27f   :  { %v2058_v44 = vpack.c.bf16 %v1601_v43, %v1600_v42 }
 0x2ff   :  { %v386_v12 = vpop.xlane.xlu0 %385 }
 0x300   :  { %2113 = vrcp.f32 %v386_v12 }
 0x303   :  { %v389_v13 = vpop.xlane.xlu0 %388 }
 0x307   :  { %v553_v14 = vpop.xlane.xlu1 %552 }
 0x308   :  { %2115 = vrcp.f32 %v553_v14 }
 0x309   :  { %2117 = vrcp.f32 %v389_v13 }
 0x30a   :  { %v2114_v16 = vpop.eup %2113 }
 0x30b   :  { %v556_v15 = vpop.xlane.xlu1 %555  ;;  %v391_v18 = vmul.f32 %v2114_v16, %v2355_v34  ;;  %v1594_v34 = vld [vmem:[%s2652_s1 + $0x1a0] sm:$0xff] }
 0x30c   :  { %2119 = vrcp.f32 %v556_v15 }
 0x312   :  { %v2116_v17 = vpop.eup %2115 }
 0x313   :  { %v558_v19 = vmul.f32 %v2116_v17, %v2363_v39  ;;  %v2118_v20 = vpop.eup %2117  ;;  %v1598_v39 = vld [vmem:[%s2652_s1 + $0x1c0] sm:$0xff] }
 0x314   :  { %v393_v25 = vmul.f32 %v2118_v20, %v2359_v37  ;;  %v1597_v37 = vld [vmem:[%s2652_s1 + $0x1b8] sm:$0xff]  ;;  %v1606_v17 = vld [vmem:[%s2653_s2 + $0x2] sm:$0x3] }
 0x315   :  { %v561_v23 = vadd.f32 %v558_v19, %v391_v18  ;;  %v2050_v38 = vpack.c.bf16 %v1597_v37, %v1596_v36  ;;  %v766_v18 = vrot.slane %v1606_v17, %v72_v54  ;;  %v845_v19 = vrot.slane %v1606_v17, %v151_v56 }
 0x316   :  { %v2120_v24 = vpop.eup %2119 }
 0x317   :  { %v560_v26 = vmul.f32 %v2120_v24, %v2367_v41  ;;  %v563_v27 = vmul.f32 0.5, %v561_v23  ;;  %v2054_v41 = vpack.c.bf16 %v1599_v40, %v1598_v39 }
 0x319   :  { %1835 = vmatmul.mubr.msk.f32.vlgmr.msra.gmra.mrb[10].mxu1 %vm371_vm3, %v563_v27  ;;  %v562_v31 = vadd.f32 %v560_v26, %v393_v25 }
 0x31a   :  { %1838 = vmatpush3.msra.mxu1 %v2309_v49  ;;  %1839 = vmatprep.mubr.msk.f32.mxu1 %vm2166_vm0, %v2165_v50  ;;  %v2046_v49 = vpack.c.bf16 %v1595_v35, %v1594_v34 }
 0x31b   :  { %2039 = vmatprep.subr.bf16.mxu1 %v2038_v28  ;;  %v564_v32 = vmul.f32 0.5, %v562_v31 }
 0x31d   :  { %1840 = vmatmul.mubr.msk.f32.vlgmr.msra.gmra.mrb[12].mxu1 %vm371_vm3, %v564_v32 }
 0x31e   :  { %2041 = vmatpush3.bf16.msra.mxu1 %v2038_v28  ;;  %1909 = vmatprep.mubr.f32.mxu1 %v2422_v10 }
 0x31f   :  { %2043 = vmatprep.subr.bf16.mxu1 %v2042_v33 }
 0x322   :  { %2045 = vmatpush3.bf16.msra.mxu1 %v2042_v33 }
 0x323   :  { %2047 = vmatprep.subr.bf16.mxu1 %v2046_v49 }
 0x326   :  { %2049 = vmatpush3.bf16.msra.mxu1 %v2046_v49 }
 0x327   :  { %2051 = vmatprep.subr.bf16.mxu1 %v2050_v38 }
 0x32a   :  { %2053 = vmatpush3.bf16.msra.mxu1 %v2050_v38 }
 0x32b   :  { %2055 = vmatprep.subr.bf16.mxu1 %v2054_v41 }
 0x32e   :  { %2057 = vmatpush3.bf16.msra.mxu1 %v2054_v41 }
 0x32f   :  { %2059 = vmatprep.subr.bf16.mxu1 %v2058_v44 }
 0x332   :  { %2061 = vmatpush3.bf16.msra.mxu1 %v2058_v44 }
 0x333   :  { %2063 = vmatprep.subr.bf16.mxu1 %v2062_v47 }
 0x336   :  { %2065 = vmatpush3.bf16.msra.mxu1 %v2062_v47  ;;  %v1876_v55 = vpop.f32.mrb[2].mxu0 }
 0x337   :  { %2067 = vmatprep.subr.bf16.mxu1 %v2066_v52  ;;  %v833_v57 = vpop.f32.mrb[3].mxu0  ;;  %v839_v26 = vadd.f32 %v1876_v55, %v766_v18 }
 0x338   :  { %v834_v20 = vadd.f32 %v833_v57, %v766_v18 }
 0x339   :  { %v922_v53 = vmul.f32 %v839_v26, %v2328_v61  ;;  %v1088_v54 = vmul.f32 %v839_v26, %v2336_v8 }
 0x33a   :  { %2069 = vmatpush3.bf16.msra.mxu1 %v2066_v52  ;;  %v921_v24 = vmul.f32 %v834_v20, %v2328_v61  ;;  %v1087_v25 = vmul.f32 %v834_v20, %v2336_v8  ;;  %v1436_v20 = vld [vmem:[%s2654_s3 + $0x10] sm:$0xff] }
 0x33b   :  { %1912 = vmatprep.subr.mxu1 %v2165_v50 }
 0x33d   :  { %1910 = vmatmul.mubr.f32.vlgmr.msra.gmra.mrb[14].mxu1 %v2428_v11 }
 0x33e   :  { %1914 = vmatprep.mubr.msk.f32.mxu1 %vm2166_vm0, %v2165_v50 }
 0x3ec   :  { %v634_v58 = vpop.f32.mrb[10].mxu1 }
 0x3ed   :  { %v711_v59 = vrot.slane %v634_v58, 4  ;;  %v1836_v60 = vpop.f32.mrb[11].mxu1 }
 0x3ef   :  { %v712_v62 = vadd.f32 %v711_v59, %v634_v58  ;;  %v1450_v58 = vld [vmem:[%s2654_s3 + $0x80] sm:$0xff]  ;;  %v1451_v59 = vld [vmem:[%s2654_s3 + $0x88] sm:$0xff] }
 0x3f0   :  { %v707_v63 = vpop.f32.mrb[12].mxu1  ;;  %v2070_v60 = vpack.c.bf16 %v1451_v59, %v1450_v58 }
 0x3f1   :  { %v713_v0 = vrot.slane %v712_v62, 2  ;;  %v717_v1 = vrot.slane %v707_v63, 4  ;;  %v1841_v2 = vpop.f32.mrb[13].mxu1 }
 0x3f3   :  { %v714_v3 = vadd.f32 %v713_v0, %v712_v62  ;;  %v718_v4 = vadd.f32 %v717_v1, %v707_v63 }
 0x3f5   :  { %v715_v5 = vrot.slane %v714_v3, 1  ;;  %v719_v6 = vrot.slane %v718_v4, 2 }
 0x3f7   :  { %v720_v7 = vadd.f32 %v719_v6, %v718_v4  ;;  %v716_v9 = vadd.f32 %v715_v5, %v714_v3  ;;  %v1434_v6 = vld [vmem:[%s2654_s3] sm:$0xff] }
 0x3f9   :  { %v721_v12 = vrot.slane %v720_v7, 1  ;;  %v723_v14 = vmul.f32 0.125, %v716_v9  ;;  %v1452_v9 = vld [vmem:[%s2654_s3 + $0x90] sm:$0xff] }
 0x3fb   :  { %v722_v13 = vadd.f32 %v721_v12, %v720_v7  ;;  %v1435_v7 = vld [vmem:[%s2654_s3 + $0x8] sm:$0xff]  ;;  %v1453_v12 = vld [vmem:[%s2654_s3 + $0x98] sm:$0xff] }
 0x3fd   :  { %v724_v15 = vmul.f32 0.125, %v722_v13 }
 0x3ff   :  { %v2497_v16 = vsel %vm1417_vm4, %v724_v15, %v723_v14  ;;  %v2072_v15 = vpack.c.bf16 %v1435_v7, %v1434_v6 }
 0x410   :  { %v1911_v21 = vpop.f32.mrb[14].mxu1 }
 0x411   :  { %v912_v22 = vpop.f32.mrb[15].mxu1  ;;  %v918_v27 = vadd.f32 %v1911_v21, %v845_v19  ;;  %v1437_v21 = vld [vmem:[%s2654_s3 + $0x18] sm:$0xff] }
 0x412   :  { %v913_v23 = vadd.f32 %v912_v22, %v845_v19  ;;  %v2074_v19 = vpack.c.bf16 %v1453_v12, %v1452_v9 }
 0x414   :  { %1913 = vmatpush3.xpose.msra.mxu1 %v913_v23  ;;  %1923 = vmatpush3.xpose.msra.mxu0 %v913_v23 }
 0x415   :  { %1917 = vmatprep.subr.mxu1 %v2165_v50  ;;  %1932 = vmatprep.subr.mxu0 %v2165_v50 }
 0x417   :  { %1915 = vmatmul.mubr.f32.vlgmr.msra.gmra.mrb[16].mxu1 %v921_v24  ;;  %1925 = vmatmul.mubr.f32.vlgmr.msra.gmra.mrb[4].mxu0 %v1087_v25  ;;  %v1454_v24 = vld [vmem:[%s2654_s3 + $0xa0] sm:$0xff]  ;;  %v1455_v25 = vld [vmem:[%s2654_s3 + $0xa8] sm:$0xff] }
 0x418   :  { %1918 = vmatpush3.xpose.msra.mxu1 %v918_v27  ;;  %1919 = vmatprep.mubr.msk.f32.mxu1 %vm2166_vm0, %v2165_v50 }
 0x419   :  { %1927 = vmatprep.subr.mxu1 %v2165_v50  ;;  %1933 = vmatpush3.msra.mxu0 %v2422_v10 }
 0x41a   :  { %1934 = vmatprep.mubr.msk.f32.mxu0 %vm2166_vm0, %v2165_v50  ;;  %2071 = vmatprep.subr.bf16.mxu0 %v2070_v60 }
 0x41b   :  { %1920 = vmatmul.mubr.f32.vlgmr.msra.gmra.mrb[18].mxu1 %v922_v53  ;;  %v2078_v53 = vpack.c.bf16 %v1455_v25, %v1454_v24 }
 0x41c   :  { %1928 = vmatpush3.xpose.msra.mxu1 %v918_v27  ;;  %1929 = vmatprep.mubr.msk.f32.mxu1 %vm2166_vm0, %v2165_v50  ;;  %v2076_v27 = vpack.c.bf16 %v1437_v21, %v1436_v20 }
 0x41d   :  { %1937 = vmatprep.subr.mxu1 %v2165_v50 }
 0x41f   :  { %1930 = vmatmul.mubr.f32.vlgmr.msra.gmra.mrb[20].mxu1 %v1088_v54  ;;  %v1438_v54 = vld [vmem:[%s2654_s3 + $0x20] sm:$0xff] }
 0x420   :  { %1938 = vmatpush3.msra.mxu1 %v2428_v11  ;;  %1939 = vmatprep.mubr.msk.f32.mxu1 %vm2166_vm0, %v2165_v50 }
 0x4ea   :  { %v989_v56 = vpop.f32.mrb[16].mxu1  ;;  %v1155_v61 = vpop.f32.mrb[4].mxu0 }
 0x4eb   :  { %v1916_v10 = vpop.f32.mrb[17].mxu1  ;;  %v1926_v28 = vpop.f32.mrb[5].mxu0  ;;  %v1063_v29 = vsel %vm371_vm3, %v989_v56, -inf  ;;  %v1229_v32 = vsel %vm371_vm3, %v1155_v61, -inf }
 0x4ec   :  { %1064 = vmax.xlane.f32.xlu0 %v1063_v29  ;;  %v1456_v28 = vld [vmem:[%s2654_s3 + $0xb0] sm:$0xff]  ;;  %v1457_v29 = vld [vmem:[%s2654_s3 + $0xb8] sm:$0xff] }
 0x4ee   :  { %v1059_v30 = vpop.f32.mrb[18].mxu1 }
 0x4ef   :  { %v1921_v31 = vpop.f32.mrb[19].mxu1  ;;  %v1066_v8 = vsel %vm371_vm3, %v1059_v30, -inf }
 0x4f0   :  { %1230 = vmax.xlane.f32.xlu0 %v1229_v32  ;;  %1067 = vmax.xlane.f32.xlu1 %v1066_v8  ;;  %v1440_v31 = vld [vmem:[%s2654_s3 + $0x30] sm:$0xff]  ;;  %v1441_v32 = vld [vmem:[%s2654_s3 + $0x38] sm:$0xff] }
 0x4f1   :  { %v2084_v8 = vpack.c.bf16 %v1441_v32, %v1440_v31 }
 0x4f2   :  { %v1225_v33 = vpop.f32.mrb[20].mxu1 }
 0x4f3   :  { %v1931_v11 = vpop.f32.mrb[21].mxu1  ;;  %v1232_v34 = vsel %vm371_vm3, %v1225_v33, -inf }
 0x4f4   :  { %1233 = vmax.xlane.f32.xlu1 %v1232_v34  ;;  %v1459_v11 = vld [vmem:[%s2654_s3 + $0xc8] sm:$0xff] }
 0x579   :  { %v1065_v50 = vpop.xlane.xlu0 %1064 }
 0x57a   :  { %v1069_v35 = vsub.f32 %v989_v56, %v1065_v50  ;;  %v1439_v56 = vld [vmem:[%s2654_s3 + $0x28] sm:$0xff]  ;;  %v1442_v50 = vld [vmem:[%s2654_s3 + $0x40] sm:$0xff] }
 0x57b   :  { %v2080_v10 = vpack.c.bf16 %v1439_v56, %v1438_v54 }
 0x57c   :  { %v1071_v49 = vmul.f32 1.442695, %v1069_v35  ;;  %v1443_v35 = vld [vmem:[%s2654_s3 + $0x48] sm:$0xff] }
 0x57d   :  { %v1231_v36 = vpop.xlane.xlu0 %1230  ;;  %v1068_v37 = vpop.xlane.xlu1 %1067 }
 0x57e   :  { %2121 = vpow2.f32 %v1071_v49  ;;  %v1235_v38 = vsub.f32 %v1155_v61, %v1231_v36  ;;  %v1070_v39 = vsub.f32 %v1059_v30, %v1068_v37  ;;  %v2082_v30 = vpack.c.bf16 %v1457_v29, %v1456_v28  ;;  %v1460_v36 = vld [vmem:[%s2654_s3 + $0xd0] sm:$0xff]  ;;  %v1461_v37 = vld [vmem:[%s2654_s3 + $0xd8] sm:$0xff] }
 0x57f   :  { %v2088_v49 = vpack.c.bf16 %v1443_v35, %v1442_v50 }
 0x580   :  { %v1237_v40 = vmul.f32 1.442695, %v1235_v38  ;;  %v1073_v41 = vmul.f32 1.442695, %v1070_v39  ;;  %v2090_v38 = vpack.c.bf16 %v1461_v37, %v1460_v36  ;;  %v1444_v39 = vld [vmem:[%s2654_s3 + $0x50] sm:$0xff] }
 0x581   :  { %v1234_v42 = vpop.xlane.xlu1 %1233 }
 0x582   :  { %2123 = vpow2.f32 %v1237_v40  ;;  %v1236_v43 = vsub.f32 %v1225_v33, %v1234_v42  ;;  %v1458_v33 = vld [vmem:[%s2654_s3 + $0xc0] sm:$0xff]  ;;  %v1445_v40 = vld [vmem:[%s2654_s3 + $0x58] sm:$0xff] }
 0x583   :  { %2125 = vpow2.f32 %v1073_v41  ;;  %v2086_v34 = vpack.c.bf16 %v1459_v11, %v1458_v33  ;;  %v2092_v41 = vpack.c.bf16 %v1445_v40, %v1444_v39  ;;  %v1462_v42 = vld [vmem:[%s2654_s3 + $0xe0] sm:$0xff] }
 0x584   :  { %v1239_v44 = vmul.f32 1.442695, %v1236_v43  ;;  %v1463_v43 = vld [vmem:[%s2654_s3 + $0xe8] sm:$0xff] }
 0x586   :  { %2127 = vpow2.f32 %v1239_v44  ;;  %v2094_v44 = vpack.c.bf16 %v1463_v43, %v1462_v42 }
 0x588   :  { %v2122_v45 = vpop.eup %2121 }
 0x589   :  { %v1075_v46 = vsel %vm371_vm3, %v2122_v45, 0.0 }
 0x58a   :  { %1076 = vadd.xlane.f32.xlu0 %v1075_v46  ;;  %v1447_v46 = vld [vmem:[%s2654_s3 + $0x68] sm:$0xff] }
 0x58c   :  { %v2124_v47 = vpop.eup %2123 }
 0x58d   :  { %v2126_v48 = vpop.eup %2125  ;;  %v1241_v51 = vsel %vm371_vm3, %v2124_v47, 0.0 }
 0x58e   :  { %1242 = vadd.xlane.f32.xlu0 %v1241_v51  ;;  %v1078_v52 = vsel %vm371_vm3, %v2126_v48, 0.0  ;;  %v1465_v51 = vld [vmem:[%s2654_s3 + $0xf8] sm:$0xff] }
 0x58f   :  { %1079 = vadd.xlane.f32.xlu1 %v1078_v52 }
 0x590   :  { %v2128_v55 = vpop.eup %2127 }
 0x591   :  { %v1244_v57 = vsel %vm371_vm3, %v2128_v55, 0.0 }
 0x593   :  { %1245 = vadd.xlane.f32.xlu1 %v1244_v57  ;;  %v1449_v57 = vld [vmem:[%s2654_s3 + $0x78] sm:$0xff] }
 0x617   :  { %v1077_v62 = vpop.xlane.xlu0 %1076 }
 0x618   :  { %2129 = vrcp.f32 %v1077_v62 }
 0x61b   :  { %v1243_v63 = vpop.xlane.xlu0 %1242 }
 0x61c   :  { %2131 = vrcp.f32 %v1243_v63  ;;  %v1080_v0 = vpop.xlane.xlu1 %1079 }
 0x61d   :  { %2133 = vrcp.f32 %v1080_v0 }
 0x620   :  { %v1246_v1 = vpop.xlane.xlu1 %1245 }
 0x621   :  { %2135 = vrcp.f32 %v1246_v1 }
 0x622   :  { %v2130_v2 = vpop.eup %2129 }
 0x623   :  { %v1082_v4 = vmul.f32 %v2130_v2, %v2122_v45  ;;  %v1446_v45 = vld [vmem:[%s2654_s3 + $0x60] sm:$0xff] }
 0x626   :  { %v2132_v3 = vpop.eup %2131 }
 0x627   :  { %v1248_v5 = vmul.f32 %v2132_v3, %v2124_v47  ;;  %v2134_v13 = vpop.eup %2133  ;;  %v2096_v47 = vpack.c.bf16 %v1447_v46, %v1446_v45 }
 0x628   :  { %v1084_v22 = vmul.f32 %v2134_v13, %v2126_v48  ;;  %v1464_v48 = vld [vmem:[%s2654_s3 + $0xf0] sm:$0xff] }
 0x629   :  { %v1251_v14 = vadd.f32 %v1248_v5, %v1082_v4  ;;  %v2098_v52 = vpack.c.bf16 %v1465_v51, %v1464_v48 }
 0x62b   :  { %v2136_v17 = vpop.eup %2135  ;;  %v1253_v18 = vmul.f32 0.5, %v1251_v14 }
 0x62c   :  { %v1250_v23 = vmul.f32 %v2136_v17, %v2128_v55  ;;  %v1448_v55 = vld [vmem:[%s2654_s3 + $0x70] sm:$0xff]  ;;  %s2167_s3 = smov [#allocation2]  }
 0x62d   :  { %1935 = vmatmul.mubr.msk.f32.vlgmr.msra.gmra.mrb[6].mxu0 %vm371_vm3, %v1253_v18  ;;  %v2100_v58 = vpack.c.bf16 %v1449_v57, %v1448_v55  ;;  %s1556_s23 = sshll.u32 %s2167_s3, 4  ;;  %s1557_s23 = int_to_ptr.vmem [resolvable:$true] %s1556_s23 }
 0x62e   :  { %v1252_v26 = vadd.f32 %v1250_v23, %v1084_v22  ;;  %2073 = vmatpush3.bf16.msra.mxu0 %v2072_v15  ;;  %s2141_s24 = scalar_lea.vmem %s1557_s23, 64  ;;  %p2146_p1 = scmp.lt.s32.totalorder %s1557_s23, %s1557_s23 }
 0x62f   :  { %2075 = vmatprep.subr.bf16.mxu0 %v2074_v19  ;;  %p2142_p0 = scmp.ne.s32.totalorder %s1557_s23, %s2141_s24  ;;  %p2147_p2 = scmp.lt.s32.totalorder %s2141_s24, %s2141_s24 }
 0x630   :  { %v1254_v61 = vmul.f32 0.5, %v1252_v26 }
 0x631   :  { %p2148_p3 = por %p2147_p2, %p2146_p1 }
 0x632   :  { %1940 = vmatmul.mubr.msk.f32.vlgmr.msra.gmra.mrb[22].mxu1 %vm371_vm3, %v1254_v61  ;;  %2077 = vmatpush3.bf16.msra.mxu0 %v2076_v27 }
 0x633   :  { %2079 = vmatprep.subr.bf16.mxu0 %v2078_v53  ;;  %p2149_p4 = pnand %p2148_p3, %p2142_p0 }
 0x636   :  { %2081 = vmatpush3.bf16.msra.mxu0 %v2080_v10 }
 0x637   :  { %2083 = vmatprep.subr.bf16.mxu0 %v2082_v30 }
 0x63a   :  { %2085 = vmatpush3.bf16.msra.mxu0 %v2084_v8 }
 0x63b   :  { %2087 = vmatprep.subr.bf16.mxu0 %v2086_v34 }
 0x63e   :  { %2089 = vmatpush3.bf16.msra.mxu0 %v2088_v49 }
 0x63f   :  { %2091 = vmatprep.subr.bf16.mxu0 %v2090_v38 }
 0x642   :  { %2093 = vmatpush3.bf16.msra.mxu0 %v2092_v41 }
 0x643   :  { %2095 = vmatprep.subr.bf16.mxu0 %v2094_v44 }
 0x646   :  { %2097 = vmatpush3.bf16.msra.mxu0 %v2096_v47 }
 0x647   :  { %2099 = vmatprep.subr.bf16.mxu0 %v2098_v52 }
 0x64a   :  { %2101 = vmatpush3.bf16.msra.mxu0 %v2100_v58 }
 0x700   :  { %v1324_v59 = vpop.f32.mrb[6].mxu0 }
 0x701   :  { %v1401_v60 = vrot.slane %v1324_v59, 4  ;;  %v1936_v62 = vpop.f32.mrb[7].mxu0 }
 0x703   :  { %v1402_v63 = vadd.f32 %v1401_v60, %v1324_v59 }
 0x705   :  { %v1403_v0 = vrot.slane %v1402_v63, 2  ;;  %v1397_v1 = vpop.f32.mrb[22].mxu1 }
 0x706   :  { %v1407_v2 = vrot.slane %v1397_v1, 4  ;;  %v1941_v3 = vpop.f32.mrb[23].mxu1 }
 0x707   :  { %v1404_v4 = vadd.f32 %v1403_v0, %v1402_v63 }
 0x708   :  { %v1408_v5 = vadd.f32 %v1407_v2, %v1397_v1 }
 0x709   :  { %v1405_v6 = vrot.slane %v1404_v4, 1 }
 0x70a   :  { %v1409_v7 = vrot.slane %v1408_v5, 2 }
 0x70b   :  { %v1406_v12 = vadd.f32 %v1405_v6, %v1404_v4 }
 0x70c   :  { %v1410_v9 = vadd.f32 %v1409_v7, %v1408_v5 }
 0x70d   :  { %v1413_v15 = vmul.f32 0.125, %v1406_v12 }
 0x70e   :  { %v1411_v13 = vrot.slane %v1410_v9, 1 }
 0x710   :  { %v1412_v14 = vadd.f32 %v1411_v13, %v1410_v9 }
 0x712   :  { %v1414_v17 = vmul.f32 0.125, %v1412_v14 }
 0x714   :  { %v1422_v18 = vsel %vm1417_vm4, %v1414_v17, %v1413_v15 }
 0x715   :  { %1537 = vmatprep.mubr.f32.mxu0 %v1422_v18  ;;  %v1424_v19 = vcombine.low %v2497_v16, %v1422_v18 }
 0x716   :  { %1538 = vmatmul.mubr.f32.vlgmr.msra.gmra.mrb[8].mxu0 %v2497_v16 }
 0x717   :  { %1609 = vst.sshfl [vmem:[#allocation2] sm:$0x33 pattern:$0x76325410] %v1424_v19 }
 0x718   :  { %2152 = shalt.err (!%p2149_p4)
}
 0x719   :  { %s2153_s27 = scalar_lea.hbm %s2656_s5, 64 }
 0x71a   :  { %p2154_p5 = scmp.ne.s32.totalorder %s2656_s5, %s2153_s27  ;;  %p2157_p6 = scmp.lt.u32.totalorder %s2153_s27, %s2656_s5 }
 0x71c   :  { %p2159_p7 = pnand %p2157_p6, %p2154_p5 }
 0x71e   :  { %2162 = shalt.err (!%p2159_p7)
}
 0x71f   :  { %1559 = dma.vmem_to_hbm [thread:$0]  %s1557_s23, 64, %s2656_s5, [#allocation3]   ;;  %v1610_v20 = vld [vmem:[%s2655_s4] ss:$0 sm:$0xff] }
 0x7e9   :  { %v1739_v16 = vpop.f32.mrb[8].mxu0 }
 0x7ea   :  { %v1740_v21 = vpop.f32.mrb[9].mxu0 }
 0x7eb   :  { %v1741_v22 = vadd.f32 %v1740_v21, %v1739_v16 }
 0x7ed   :  { %v1540_v23 = vadd.f32 %v1741_v22, %v1610_v20 }
 0x7ef   :  { %v1543_v24 = vsub.f32 0.0, %v1540_v23 }
 0x7f1   :  { %v1544_v25 = vmul.f32 1.442695, %v1543_v24 }
 0x7f3   :  { %2137 = vpow2.f32 %v1544_v25 }
 0x7fd   :  { %v2138_v26 = vpop.eup %2137 }
 0x7fe   :  { %v1546_v27 = vadd.f32 1.0, %v2138_v26 }
 0x800   :  { %2139 = vrcp.f32 %v1546_v27 }
 0x80a   :  { %v2140_v53 = vpop.eup %2139 }
 0x80b   :  { %1549 = vst [vmem:[%s2657_s6] sm:$0x3] %v2140_v53 }
 0x80c   :  { %2163 = dma.done.wait [#allocation3], 64  }
 0x80d   :  { %2164 = vsyncadd [#allocation3], 4294967232 }
 0x80e   :  { %1567 = vsyncpa [#allocation3], 1 }

// kernel: att_new_3_forward.2
= control target key start
LH: loop header
LB: loop body
LE: loop exit
PB: predicated region body
PF: predicated region fallthrough
CT: control target
= control target key end

     0   :  { %9 = vsyncpa [#allocation3], 0  ;;  %s5847_s0 = inlined_call_operand.vmem [shape: f32[2,2,8,128], index: 0, kind: input, shape index: {}]   ;;  %s5848_s1 = inlined_call_operand.vmem [shape: f32[2,128,128], index: 1, kind: input, shape index: {}]   ;;  %s5849_s2 = inlined_call_operand.hbm [shape: f32[2,1,128,768], index: 2, kind: input, shape index: {}]   ;;  %s5850_s3 = inlined_call_operand.vmem [shape: f32[2,13,128], index: 3, kind: input, shape index: {}]   ;;  %s5851_s4 = inlined_call_operand.vmem [shape: f32[2,2,8,128], index: 4, kind: output, shape index: {}]  }
   0x1   :  { %11 = vsyncpa [#allocation3 + $0x1], 0  ;;  %s5009_s15 = smov 0   ;;  %s5011_s16 = smov 0  }
   0x2   :  { %s5013_s17 = smov 0   ;;  %s5015_s18 = smov 0  }
   0x3 LB: > { %s5028_s19 = sadd.s32 4294967295, %s4976_s18   ;;  %s5031_s20 = sadd.s32 1, %s4976_s18   ;;  %s4976_s18 = sphi %s5015_s18, %s5860_s18   ;;  %s4972_s17 = sphi %s5013_s17, %s5859_s17   ;;  %s4968_s16 = sphi %s5011_s16, %s5858_s16   ;;  %s4964_s15 = sphi %s5009_s15, %s5857_s15  }
   0x4   : > { %s73_s21 = ssub.s32 %s4976_s18, %s5031_s20  ;;  %s76_s22 = sadd.s32 1, %s4972_s17 }
   0x5   : > { %p74_p0 = scmp.eq.s32.totalorder %s73_s21, 0  ;;  %p83_p1 = scmp.ne.s32.totalorder %s4972_s17, %s4968_s16 }
   0x6   : > { %p84_p2 = scmp.eq.s32.totalorder %s4976_s18, 0  ;;  %p89_p3 = scmp.ne.s32.totalorder %s4968_s16, %s4964_s15 }
   0x7   : > { %s5041_s23 = scalar_select %p74_p0, %s4972_s17, %s76_s22  }
   0x8   : > { %p85_p4 = por %p84_p2, %p83_p1  ;;  %p90_p5 = scmp.eq.s32.totalorder %s5028_s19, 0 }
   0x9   : > { %p4752_p6 = scmp.lt.s32.totalorder %s4976_s18, 2  ;;  %s181_s25 = sand.u32 1, %s4972_s17  }
   0xa   : > { %p5045_p7 = por %p90_p5, %p89_p3  ;;  %s4743_s26 = smul.u32 768, %s181_s25 }
   0xb   : > { %s4744_s27 = smul.u32 12288, %s4976_s18  ;;  %p5051_p8 = pnand %p4752_p6, %p85_p4 }
   0xc   : > { %s185_s6 = scalar_lea.vmem [#allocation2], %s4743_s26  ;;  %s5063_s8 = scalar_lea.sflag [#allocation3], %s181_s25 }
   0xd   : > { %s5058_s5 = scalar_lea.hbm %s5849_s2, %s4744_s27  ;;  %s192_s7 = sshll.u32 %s185_s6, 4  ;;  %s5060_s7 = int_to_ptr.vmem [resolvable:$true] %s192_s7 }
   0xe   : > { %s4912_s9 = scalar_lea.hbm %s5058_s5, 12288  ;;  %p4914_p11 = pneg %p5051_p8 }
   0xf   : > { %p4913_p10 = scmp.ne.s32.totalorder %s5058_s5, %s4912_s9  ;;  %s4917_s12 = scalar_lea.hbm %s5849_s2, 24576 }
  0x10   : > { %p4918_p0 = scmp.lt.u32.totalorder %s5058_s5, %s5849_s2  ;;  %p4919_p1 = scmp.lt.u32.totalorder %s4917_s12, %s4912_s9 }
  0x11   : > { %p4915_p12 = pnand %p4914_p11, %p4913_p10  ;;  %p4921_p3 = scmp.lt.u32.totalorder %s4912_s9, %s5058_s5 }
  0x12   : > { %p4920_p2 = por %p4919_p1, %p4918_p0 }
  0x13   : > { %p4916_p13 = pneg %p4915_p12 }
  0x14   : > { %p4922_p4 = por %p4921_p3, %p4920_p2 }
  0x16   : > { %p4923_p5 = pnand %p4922_p4, %p4916_p13 }
  0x18   : > { %4926 = shalt.err (!%p4923_p5)
}
  0x19   : > { %s4927_s15 = scalar_lea.vmem %s5060_s7, 12288  ;;  %s4978_s21 = smov [#allocation2]  }
  0x1a   : > { %p4928_p6 = scmp.ne.s32.totalorder %s5060_s7, %s4927_s15  ;;  %s4932_s22 = sshll.u32 %s4978_s21, 4  ;;  %s4933_s22 = int_to_ptr.vmem [resolvable:$false] %s4932_s22 }
  0x1b   : > { %s4934_s25 = scalar_lea.vmem %s4933_s22, 24576  ;;  %p4935_p9 = scmp.lt.s32.totalorder %s5060_s7, %s4933_s22 }
  0x1c   : > { %p4930_p10 = pnand %p4928_p6, %p4914_p11  ;;  %p4936_p0 = scmp.lt.s32.totalorder %s4934_s25, %s4927_s15 }
  0x1e   : > { %p4931_p12 = pneg %p4930_p10  ;;  %p4937_p1 = por %p4936_p0, %p4935_p9 }
  0x20   : > { %p4938_p2 = pnand %p4937_p1, %p4931_p12 }
  0x22   : > { %4941 = shalt.err (!%p4938_p2)
}
  0x23   : > { %s4979_s26 = smov 768   ;;  %s4980_s27 = smov 48  }
  0x24   : > { %4751 = dma.hbm_to_vmem [thread:$0]  (!%p5051_p8), %s5058_s5, 12288, %s5060_s7, %s5063_s8, %s4979_s26, %s4979_s26, %s4980_s27  }
  0x25   : > { %p208_p11 = scmp.lt.s32.totalorder %s4976_s18, 3  ;;  %p5854_p13 = scmp.ge.s32.totalorder %s4976_s18, 1 }
  0x27   : > { %p209_p3 = pnand %p5854_p13, %p208_p11 }
  0x28   : > { %s214_s29 = sand.u32 (!%p209_p3), 1, %s4968_s16  }
  0x29   : > { %212 = sbr.rel (%p209_p3) target bundleno = 4074 (0xfea), region = 36  ;;  %s215_s6 = scalar_lea.sflag (!%p209_p3), [#allocation3], %s214_s29 }
  0x2a   : > { %s4745_s30 = smul.u32 (!%p209_p3), 768, %s214_s29 }
  0x2c   : > { %s5095_s9 = scalar_lea.vmem (!%p209_p3), [#allocation2], %s4745_s30 }
  0x30   : > { %4959 = dma.done.wait (%p5045_p7), %s215_s6, 12288  }
  0x31   : > { %4961 = vsyncadd (%p5045_p7), %s215_s6, 4294955008  ;;  %p258_p9 = scmp.lt.s32.totalorder %s5028_s19, 1  ;;  %v434_v12 = vld [vmem:[%s5095_s9 + $0x8] sm:$0xff]  ;;  %v440_v13 = vld [vmem:[%s5095_s9 + $0x38] sm:$0xff]  ;;  %vm4982_vm0 = vmmov 0  }
  0x32   : > { %v433_v14 = vld [vmem:[%s5095_s9] sm:$0xff]  ;;  %v439_v15 = vld [vmem:[%s5095_s9 + $0x30] sm:$0xff]  ;;  %v4555_v16 = vpack.c.bf16 %v440_v13, %v434_v12  ;;  %v446_v18 = vld [vmem:[%s5095_s9 + $0x68] sm:$0xff] }
  0x33   : > { %s5862_s19 = smov (!%p258_p9, %s5028_s19), 1  ;;  %v4557_v17 = vpack.c.bf16 %v439_v15, %v433_v14  ;;  %v452_v20 = vld [vmem:[%s5095_s9 + $0x98] sm:$0xff]  ;;  %v445_v21 = vld [vmem:[%s5095_s9 + $0x60] sm:$0xff]  ;;  %v451_v22 = vld [vmem:[%s5095_s9 + $0x90] sm:$0xff] }
  0x34   : > { %s4031_s28 = sshll.u32 %s5862_s19, 7  ;;  %s5111_s24 = sshll.u32 %s5862_s19, 4  ;;  %4556 = vmatprep.subr.bf16.mxu1 %v4555_v16  ;;  %v4559_v25 = vpack.c.bf16 %v452_v20, %v446_v18  ;;  %v458_v26 = vld [vmem:[%s5095_s9 + $0xc8] sm:$0xff]  ;;  %v4561_v27 = vpack.c.bf16 %v451_v22, %v445_v21  ;;  %v464_v28 = vld [vmem:[%s5095_s9 + $0xf8] sm:$0xff]  ;;  %v457_v30 = vld [vmem:[%s5095_s9 + $0xc0] sm:$0xff] }
  0x35   : > { %s5106_s7 = scalar_lea.vmem %s5848_s1, %s4031_s28  ;;  %s5120_s11 = scalar_lea.vmem %s5847_s0, %s5111_s24  ;;  %4558 = vmatpush1.bf16.msra.mxu1 %v4557_v17  ;;  %v4563_v29 = vpack.c.bf16 %v464_v28, %v458_v26  ;;  %v463_v31 = vld [vmem:[%s5095_s9 + $0xf0] sm:$0xff]  ;;  %v470_v33 = vld [vmem:[%s5095_s9 + $0x128] sm:$0xff]  ;;  %v476_v34 = vld [vmem:[%s5095_s9 + $0x158] sm:$0xff] }
  0x36   : > { %v336_v0 = vld [vmem:[%s5106_s7] sm:$0xff]  ;;  %v337_v1 = vld [vmem:[%s5106_s7 + $0x8] sm:$0xff]  ;;  %v338_v2 = vld [vmem:[%s5106_s7 + $0x10] sm:$0xff]  ;;  %4560 = vmatprep.subr.bf16.mxu1 %v4559_v25  ;;  %v4565_v37 = vpack.c.bf16 %v463_v31, %v457_v30  ;;  %v4567_v38 = vpack.c.bf16 %v476_v34, %v470_v33  ;;  %v4981_v34 = vmov 0.0   ;;  %s5191_s13 = scalar_lea.vmem %s5850_s3, %s5111_s24  ;;  %s277_s21 = scalar_lea.vmem %s5851_s4, %s5111_s24 }
  0x37   : > { %v4523_v3 = vpack.c.bf16 %v337_v1, %v336_v0  ;;  %v339_v4 = vld [vmem:[%s5106_s7 + $0x18] sm:$0xff]  ;;  %v340_v6 = vld [vmem:[%s5106_s7 + $0x20] sm:$0xff]  ;;  %v341_v7 = vld [vmem:[%s5106_s7 + $0x28] sm:$0xff]  ;;  %610 = vmatprep.mubr.f32.mxu1 %v4981_v34 }
  0x38   : > { %v4527_v5 = vpack.c.bf16 %v339_v4, %v338_v2  ;;  %v4531_v8 = vpack.c.bf16 %v341_v7, %v340_v6  ;;  %v342_v9 = vld [vmem:[%s5106_s7 + $0x30] sm:$0xff]  ;;  %v343_v10 = vld [vmem:[%s5106_s7 + $0x38] sm:$0xff]  ;;  %v334_v11 = vld [vmem:[%s5120_s11] sm:$0xff] }
  0x39   : > { %4524 = vmatprep.subr.bf16.mxu0 %v4523_v3  ;;  %4220 = vmatprep.mubr.f32.mxu0 %v334_v11  ;;  %v4535_v19 = vpack.c.bf16 %v343_v10, %v342_v9  ;;  %v344_v23 = vld [vmem:[%s5106_s7 + $0x40] sm:$0xff]  ;;  %v345_v24 = vld [vmem:[%s5106_s7 + $0x48] sm:$0xff]  ;;  %v346_v35 = vld [vmem:[%s5106_s7 + $0x50] sm:$0xff] }
  0x3a   : > { %4526 = vmatpush3.bf16.msra.mxu0 %v4523_v3  ;;  %v4539_v32 = vpack.c.bf16 %v345_v24, %v344_v23  ;;  %v347_v36 = vld [vmem:[%s5106_s7 + $0x58] sm:$0xff]  ;;  %4562 = vmatpush1.bf16.msra.mxu1 %v4561_v27  ;;  %v469_v39 = vld [vmem:[%s5095_s9 + $0x120] sm:$0xff]  ;;  %v475_v40 = vld [vmem:[%s5095_s9 + $0x150] sm:$0xff] }
  0x3b   : > { %4528 = vmatprep.subr.bf16.mxu0 %v4527_v5  ;;  %4564 = vmatprep.subr.bf16.mxu1 %v4563_v29  ;;  %v4543_v41 = vpack.c.bf16 %v347_v36, %v346_v35  ;;  %v482_v42 = vld [vmem:[%s5095_s9 + $0x188] sm:$0xff]  ;;  %v488_v43 = vld [vmem:[%s5095_s9 + $0x1b8] sm:$0xff]  ;;  %v348_v44 = vld [vmem:[%s5106_s7 + $0x60] sm:$0xff]  ;;  %v4569_v46 = vpack.c.bf16 %v475_v40, %v469_v39  ;;  %v278_v35 = vlaneseq }
  0x3c   : > { %v349_v45 = vld [vmem:[%s5106_s7 + $0x68] sm:$0xff]  ;;  %v4571_v47 = vpack.c.bf16 %v488_v43, %v482_v42  ;;  %v481_v48 = vld [vmem:[%s5095_s9 + $0x180] sm:$0xff]  ;;  %v487_v49 = vld [vmem:[%s5095_s9 + $0x1b0] sm:$0xff] }
  0x3d   : > { %v4547_v50 = vpack.c.bf16 %v349_v45, %v348_v44  ;;  %v494_v51 = vld [vmem:[%s5095_s9 + $0x1e8] sm:$0xff]  ;;  %v500_v52 = vld [vmem:[%s5095_s9 + $0x218] sm:$0xff]  ;;  %v350_v53 = vld [vmem:[%s5106_s7 + $0x70] sm:$0xff]  ;;  %v4573_v55 = vpack.c.bf16 %v487_v49, %v481_v48  ;;  %v5185_v36 = vshrl.u32 %v278_v35, 7 }
  0x3e   : > { %4530 = vmatpush3.bf16.msra.mxu0 %v4527_v5  ;;  %4566 = vmatpush1.bf16.msra.mxu1 %v4565_v37  ;;  %v351_v54 = vld [vmem:[%s5106_s7 + $0x78] sm:$0xff]  ;;  %v4575_v56 = vpack.c.bf16 %v500_v52, %v494_v51  ;;  %v493_v57 = vld [vmem:[%s5095_s9 + $0x1e0] sm:$0xff]  ;;  %v499_v58 = vld [vmem:[%s5095_s9 + $0x210] sm:$0xff] }
  0x3f   : > { %4532 = vmatprep.subr.bf16.mxu0 %v4531_v8  ;;  %4568 = vmatprep.subr.bf16.mxu1 %v4567_v38  ;;  %v4551_v59 = vpack.c.bf16 %v351_v54, %v350_v53  ;;  %v506_v60 = vld [vmem:[%s5095_s9 + $0x248] sm:$0xff]  ;;  %v512_v61 = vld [vmem:[%s5095_s9 + $0x278] sm:$0xff]  ;;  %v435_v62 = vld [vmem:[%s5095_s9 + $0x10] sm:$0xff]  ;;  %v4577_v0 = vpack.c.bf16 %v499_v58, %v493_v57  ;;  %v354_v37 = vsub.s32 0, %v5185_v36  ;;  %v5223_v48 = vsub.s32 3, %v5185_v36 }
  0x40   : > { %v441_v63 = vld [vmem:[%s5095_s9 + $0x40] sm:$0xff]  ;;  %v4579_v1 = vpack.c.bf16 %v512_v61, %v506_v60  ;;  %v511_v3 = vld [vmem:[%s5095_s9 + $0x270] sm:$0xff]  ;;  %v518_v25 = vld [vmem:[%s5095_s9 + $0x2a8] sm:$0xff] }
  0x41   : > { %v505_v2 = vld [vmem:[%s5095_s9 + $0x240] sm:$0xff]  ;;  %v4587_v4 = vpack.c.bf16 %v441_v63, %v435_v62  ;;  %v447_v5 = vld [vmem:[%s5095_s9 + $0x70] sm:$0xff]  ;;  %v524_v26 = vld [vmem:[%s5095_s9 + $0x2d8] sm:$0xff] }
  0x42   : > { %4534 = vmatpush3.bf16.msra.mxu0 %v4531_v8  ;;  %4570 = vmatpush1.bf16.msra.mxu1 %v4569_v46  ;;  %v453_v6 = vld [vmem:[%s5095_s9 + $0xa0] sm:$0xff]  ;;  %v4581_v7 = vpack.c.bf16 %v511_v3, %v505_v2  ;;  %v335_v8 = vld [vmem:[%s5120_s11 + $0x8] sm:$0xff]  ;;  %v459_v10 = vld [vmem:[%s5095_s9 + $0xd0] sm:$0xff]  ;;  %v4583_v27 = vpack.c.bf16 %v524_v26, %v518_v25  ;;  %v5210_v46 = vand.u32 127, %v278_v35 }
  0x43   : > { %4536 = vmatprep.subr.bf16.mxu0 %v4535_v19  ;;  %4572 = vmatprep.subr.bf16.mxu1 %v4571_v47  ;;  %v4591_v9 = vpack.c.bf16 %v453_v6, %v447_v5  ;;  %v465_v11 = vld [vmem:[%s5095_s9 + $0x100] sm:$0xff]  ;;  %v471_v13 = vld [vmem:[%s5095_s9 + $0x130] sm:$0xff] }
  0x44   : > { %v4595_v12 = vpack.c.bf16 %v465_v11, %v459_v10  ;;  %v477_v14 = vld [vmem:[%s5095_s9 + $0x160] sm:$0xff]  ;;  %v483_v16 = vld [vmem:[%s5095_s9 + $0x190] sm:$0xff]  ;;  %vm290_vm1 = vcmp.ge.s32.totalorder %v5210_v46, 64  ;;  %vm291_vm2 = vcmp.lt.s32.totalorder %v5210_v46, 96  ;;  %vm300_vm4 = vcmp.lt.s32.totalorder %v5210_v46, 16 }
  0x45   : > { %v4599_v15 = vpack.c.bf16 %v477_v14, %v471_v13  ;;  %v489_v17 = vld [vmem:[%s5095_s9 + $0x1c0] sm:$0xff]  ;;  %v507_v22 = vld [vmem:[%s5095_s9 + $0x250] sm:$0xff]  ;;  %vm5218_vm3 = vmand %vm290_vm1, %vm291_vm2  ;;  %vm286_vm5 = vcmp.lt.s32.totalorder %v5210_v46, 64  ;;  %vm312_vm6 = vcmp.ge.s32.totalorder %v5210_v46, 48  ;;  %v5232_v54 = vsel %vm300_vm4, 1.0, %v4981_v34 }
  0x46   : > { %4538 = vmatpush3.bf16.msra.mxu0 %v4535_v19  ;;  %4574 = vmatpush1.bf16.msra.mxu1 %v4573_v55  ;;  %v4603_v18 = vpack.c.bf16 %v489_v17, %v483_v16  ;;  %v495_v19 = vld [vmem:[%s5095_s9 + $0x1f0] sm:$0xff]  ;;  %v501_v20 = vld [vmem:[%s5095_s9 + $0x220] sm:$0xff]  ;;  %vm313_vm7 = vmand %vm312_vm6, %vm286_vm5  ;;  %vm281_vm8 = vcmp.lt.s32.totalorder %v5210_v46, 32  ;;  %vm304_vm9 = vcmp.ge.s32.totalorder %v5210_v46, 16  ;;  %vm316_vm10 = vcmp.lt.s32.totalorder %v5210_v46, 80 }
  0x47   : > { %4540 = vmatprep.subr.bf16.mxu0 %v4539_v32  ;;  %4576 = vmatprep.subr.bf16.mxu1 %v4575_v56  ;;  %v4607_v21 = vpack.c.bf16 %v501_v20, %v495_v19  ;;  %v513_v23 = vld [vmem:[%s5095_s9 + $0x280] sm:$0xff]  ;;  %v523_v29 = vld [vmem:[%s5095_s9 + $0x2d0] sm:$0xff]  ;;  %v5247_v63 = vsel %vm313_vm7, 1.0, %v4981_v34  ;;  %vm305_vm11 = vmand %vm304_vm9, %vm281_vm8  ;;  %vm320_vm13 = vcmp.ge.s32.totalorder %v5210_v46, 80  ;;  %vm295_vm15 = vcmp.ge.s32.totalorder %v5210_v46, 96 }
  0x48   : > { %v4611_v24 = vpack.c.bf16 %v513_v23, %v507_v22  ;;  %v517_v28 = vld [vmem:[%s5095_s9 + $0x2a0] sm:$0xff]  ;;  %v519_v30 = vld [vmem:[%s5095_s9 + $0x2b0] sm:$0xff]  ;;  %vm317_vm12 = vmand %vm290_vm1, %vm316_vm10  ;;  %v5260_v5 = vsel %vm305_vm11, 1.0, %v4981_v34  ;;  %vm324_vm1 = vcmp.lt.s32.totalorder %v5210_v46, 112  ;;  %vm328_vm4 = vcmp.ge.s32.totalorder %v5210_v46, 112 }
  0x49   : > { %v4585_v31 = vpack.c.bf16 %v523_v29, %v517_v28  ;;  %v332_v38 = vld [vmem:[%s5191_s13] sm:$0xff]  ;;  %vm321_vm14 = vmand %vm320_vm13, %vm291_vm2  ;;  %v5339_v26 = vsel %vm328_vm4, 1.0, %v4981_v34  ;;  %vm841_vm6 = vcmask 64512   ;;  %vm285_vm7 = vcmp.ge.s32.totalorder %v5210_v46, 32 }
  0x4a   : > { %4542 = vmatpush3.bf16.msra.mxu0 %v4539_v32  ;;  %4578 = vmatpush1.bf16.msra.mxu1 %v4577_v0  ;;  %v525_v32 = vld [vmem:[%s5095_s9 + $0x2e0] sm:$0xff]  ;;  %v355_v39 = vrot.slane %v332_v38, %v354_v37  ;;  %v530_v49 = vrot.slane %v332_v38, 1  ;;  %v537_v51 = vrot.slane %v332_v38, %v5223_v48  ;;  %v5296_v16 = vsel %vm321_vm14, 1.0, %v4981_v34  ;;  %vm325_vm2 = vmand %vm295_vm15, %vm324_vm1 }
  0x4b   : > { %4544 = vmatprep.subr.bf16.mxu0 %v4543_v41  ;;  %4580 = vmatprep.subr.bf16.mxu1 %v4579_v1  ;;  %v4615_v33 = vpack.c.bf16 %v525_v32, %v519_v30  ;;  %v2270_v19 = vmul.f32 0.25, %v5296_v16  ;;  %v5321_v22 = vsel %vm325_vm2, 1.0, %v4981_v34  ;;  %v2900_v28 = vmul.f32 0.25, %v5339_v26 }
  0x4c   : > { %v541_v52 = vrot.slane %v530_v49, %v5223_v48  ;;  %vm308_vm9 = vcmp.lt.s32.totalorder %v5210_v46, 48 }
  0x4d   : > { %vm309_vm10 = vmand %vm285_vm7, %vm308_vm9 }
  0x4e   : > { %4546 = vmatpush3.bf16.msra.mxu0 %v4543_v41  ;;  %4582 = vmatpush1.bf16.msra.mxu1 %v4581_v7  ;;  %v5265_v7 = vsel %vm317_vm12, 1.0, %v4981_v34 }
  0x4f   : > { %4548 = vmatprep.subr.bf16.mxu0 %v4547_v50  ;;  %4584 = vmatprep.subr.bf16.mxu1 %v4583_v27  ;;  %v1955_v11 = vmul.f32 0.25, %v5265_v7 }
  0x52   : > { %4550 = vmatpush3.bf16.msra.mxu0 %v4547_v50  ;;  %4586 = vmatpush1.bf16.msra.mxu1 %v4585_v31  ;;  %v532_v50 = vrot.slane %v332_v38, 2 }
  0x53   : > { %4552 = vmatprep.subr.bf16.mxu0 %v4551_v59  ;;  %4258 = vmatprep.subr.mxu1 %v4981_v34 }
  0x54   : > { %v545_v53 = vrot.slane %v532_v50, %v5223_v48 }
  0x56   : > { %4554 = vmatpush3.bf16.msra.mxu0 %v4551_v59  ;;  %v698_v59 = vmul.f32 0.25, %v5232_v54 }
  0x57   : > { %4588 = vmatprep.subr.bf16.mxu0 %v4587_v4 }
  0x59   : > { %4221 = vmatmul.mubr.f32.vlgmr.msra.gmra.mrb[0].mxu0 %v335_v8  ;;  %v866_v8 = vmul.f32 0.25, %v5260_v5 }
  0x5a   : > { %4590 = vmatpush3.bf16.msra.mxu0 %v4587_v4  ;;  %v1640_v4 = vmul.f32 0.25, %v5247_v63 }
  0x5b   : > { %4592 = vmatprep.subr.bf16.mxu0 %v4591_v9 }
  0x5e   : > { %4594 = vmatpush3.bf16.msra.mxu0 %v4591_v9 }
  0x5f   : > { %4596 = vmatprep.subr.bf16.mxu0 %v4595_v12 }
  0x62   : > { %4598 = vmatpush3.bf16.msra.mxu0 %v4595_v12 }
  0x63   : > { %4600 = vmatprep.subr.bf16.mxu0 %v4599_v15 }
  0x66   : > { %4602 = vmatpush3.bf16.msra.mxu0 %v4599_v15 }
  0x67   : > { %4604 = vmatprep.subr.bf16.mxu0 %v4603_v18 }
  0x6a   : > { %4606 = vmatpush3.bf16.msra.mxu0 %v4603_v18 }
  0x6b   : > { %4608 = vmatprep.subr.bf16.mxu0 %v4607_v21 }
  0x6e   : > { %4610 = vmatpush3.bf16.msra.mxu0 %v4607_v21 }
  0x6f   : > { %4612 = vmatprep.subr.bf16.mxu0 %v4611_v24 }
  0x72   : > { %4614 = vmatpush3.bf16.msra.mxu0 %v4611_v24  ;;  %v2585_v24 = vmul.f32 0.25, %v5321_v22 }
  0x73   : > { %4616 = vmatprep.subr.bf16.mxu0 %v4615_v33 }
  0x76   : > { %4618 = vmatpush3.bf16.msra.mxu0 %v4615_v33 }
  0x77   : > { %4323 = vmatprep.subr.mxu0 %v4981_v34 }
 0x12c   : > { %v4222_v40 = vpop.f32.mrb[0].mxu0 }
 0x12d   : > { %v428_v41 = vadd.f32 %v4222_v40, %v355_v39  ;;  %v422_v42 = vpop.f32.mrb[1].mxu0 }
 0x12e   : > { %v423_v43 = vadd.f32 %v422_v42, %v355_v39 }
 0x12f   : > { %v5199_v45 = vmax.f32 %v428_v41, 0.0 }
 0x130   : > { %v5197_v44 = vmax.f32 %v423_v43, 0.0 }
 0x132   : > { %611 = vmatmul.mubr.f32.vlgmr.msra.gmra.mrb[0].mxu1 %v5197_v44  ;;  %4255 = vmatprep.mubr.f32.mxu0 %v5197_v44 }
 0x133   : > { %4256 = vmatmul.mubr.f32.vlgmr.msra.gmra.mrb[2].mxu0 %v5199_v45  ;;  %616 = vmatprep.mubr.f32.mxu1 %v4981_v34 }
 0x134   : > { %4325 = vmatprep.mubr.msk.f32.mxu0 %vm4982_vm0, %v4981_v34 }
 0x136   : > { %617 = vmatmul.mubr.f32.gmra.mrb[2].mxu1 %v5199_v45 }
 0x137   : > { %4260 = vmatprep.mubr.msk.f32.mxu1 %vm4982_vm0, %v4981_v34 }
 0x205   : > { %v612_v55 = vpop.f32.mrb[0].mxu1 }
 0x206   : > { %v5239_v56 = vadd.f32 %v612_v55, %v537_v51  ;;  %v614_v57 = vpop.f32.mrb[1].mxu1  ;;  %v4257_v58 = vpop.f32.mrb[2].mxu0 }
 0x207   : > { %v5242_v60 = vadd.f32 %v614_v57, %v541_v52  ;;  %v5244_v61 = vadd.f32 %v4257_v58, %v545_v53  ;;  %v689_v62 = vpop.f32.mrb[3].mxu0 }
 0x208   : > { %v699_v3 = vmul.f32 %v698_v59, %v5239_v56  ;;  %v5278_v12 = vmul.f32 %v1640_v4, %v5239_v56  ;;  %v867_v13 = vmul.f32 %v866_v8, %v5239_v56  ;;  %v1956_v14 = vmul.f32 %v1955_v11, %v5239_v56 }
 0x209   : > { %v618_v0 = vpop.f32.mrb[2].mxu1  ;;  %4259 = vmatpush3.xpose.msra.mxu1 %v5242_v60  ;;  %v5291_v15 = vadd.f32 %v689_v62, %v545_v53  ;;  %v2271_v21 = vmul.f32 %v2270_v19, %v5239_v56  ;;  %v2586_v25 = vmul.f32 %v2585_v24, %v5239_v56  ;;  %v2901_v29 = vmul.f32 %v2900_v28, %v5239_v56 }
 0x20a   : > { %v5254_v1 = vadd.f32 %v618_v0, %v537_v51  ;;  %v620_v2 = vpop.f32.mrb[3].mxu1  ;;  %4263 = vmatprep.subr.mxu1 %v4981_v34 }
 0x20b   : > { %v5262_v6 = vadd.f32 %v620_v2, %v541_v52  ;;  %v1031_v20 = vmul.f32 %v5260_v5, %v5291_v15 }
 0x20c   : > { %4261 = vmatmul.mubr.f32.vlgmr.msra.gmra.mrb[4].mxu1 %v699_v3  ;;  %v700_v9 = vmul.f32 %v698_v59, %v5254_v1  ;;  %v1642_v10 = vmul.f32 %v1640_v4, %v5254_v1  ;;  %v868_v17 = vmul.f32 %v866_v8, %v5254_v1  ;;  %v1957_v18 = vmul.f32 %v1955_v11, %v5254_v1 }
 0x20d   : > { %4264 = vmatpush3.xpose.msra.mxu1 %v5262_v6  ;;  %4324 = vmatpush3.xpose.msra.mxu0 %v5262_v6  ;;  %v2272_v23 = vmul.f32 %v2270_v19, %v5254_v1  ;;  %v2587_v27 = vmul.f32 %v2585_v24, %v5254_v1  ;;  %v2902_v30 = vmul.f32 %v2900_v28, %v5254_v1 }
 0x20e   : > { %4265 = vmatprep.mubr.msk.f32.mxu1 %vm4982_vm0, %v4981_v34  ;;  %4268 = vmatprep.subr.mxu1 %v4981_v34 }
 0x20f   : > { %4338 = vmatprep.subr.mxu0 %v4981_v34 }
 0x210   : > { %4266 = vmatmul.mubr.f32.vlgmr.msra.gmra.mrb[6].mxu1 %v700_v9  ;;  %4326 = vmatmul.mubr.f32.vlgmr.msra.gmra.mrb[4].mxu0 %v1642_v10 }
 0x211   : > { %4269 = vmatpush3.xpose.msra.mxu1 %v5242_v60  ;;  %4339 = vmatpush3.xpose.msra.mxu0 %v5242_v60 }
 0x212   : > { %4270 = vmatprep.mubr.msk.f32.mxu1 %vm4982_vm0, %v4981_v34  ;;  %4340 = vmatprep.mubr.msk.f32.mxu0 %vm4982_vm0, %v4981_v34 }
 0x213   : > { %4273 = vmatprep.subr.mxu1 %v4981_v34  ;;  %4343 = vmatprep.subr.mxu0 %v4981_v34 }
 0x214   : > { %4271 = vmatmul.mubr.f32.vlgmr.msra.gmra.mrb[8].mxu1 %v867_v13  ;;  %4341 = vmatmul.mubr.f32.vlgmr.msra.gmra.mrb[6].mxu0 %v1956_v14 }
 0x215   : > { %4274 = vmatpush3.xpose.msra.mxu1 %v5262_v6  ;;  %4344 = vmatpush3.xpose.msra.mxu0 %v5262_v6 }
 0x216   : > { %4275 = vmatprep.mubr.msk.f32.mxu1 %vm4982_vm0, %v4981_v34  ;;  %4345 = vmatprep.mubr.msk.f32.mxu0 %vm4982_vm0, %v4981_v34 }
 0x217   : > { %4278 = vmatprep.subr.mxu1 %v4981_v34  ;;  %4358 = vmatprep.subr.mxu0 %v4981_v34 }
 0x218   : > { %4276 = vmatmul.mubr.f32.vlgmr.msra.gmra.mrb[10].mxu1 %v868_v17  ;;  %4346 = vmatmul.mubr.f32.vlgmr.msra.gmra.mrb[8].mxu0 %v1957_v18 }
 0x219   : > { %4279 = vmatpush3.msra.mxu1 %v1031_v20  ;;  %4359 = vmatpush3.xpose.msra.mxu0 %v5242_v60 }
 0x21a   : > { %4360 = vmatprep.mubr.msk.f32.mxu0 %vm4982_vm0, %v4981_v34  ;;  %4363 = vmatprep.subr.mxu0 %v4981_v34 }
 0x21b   : > { %4280 = vmatprep.mubr.msk.f32.mxu1 %vm4982_vm0, %v4981_v34  ;;  %4283 = vmatprep.subr.mxu1 %v4981_v34 }
 0x21c   : > { %4361 = vmatmul.mubr.f32.vlgmr.msra.gmra.mrb[10].mxu0 %v2271_v21 }
 0x21d   : > { %4364 = vmatpush3.xpose.msra.mxu0 %v5262_v6  ;;  %4365 = vmatprep.mubr.msk.f32.mxu0 %vm4982_vm0, %v4981_v34 }
 0x21e   : > { %4378 = vmatprep.subr.mxu0 %v4981_v34 }
 0x220   : > { %4366 = vmatmul.mubr.f32.vlgmr.msra.gmra.mrb[12].mxu0 %v2272_v23 }
 0x221   : > { %4379 = vmatpush3.xpose.msra.mxu0 %v5242_v60  ;;  %4380 = vmatprep.mubr.msk.f32.mxu0 %vm4982_vm0, %v4981_v34 }
 0x222   : > { %4383 = vmatprep.subr.mxu0 %v4981_v34 }
 0x224   : > { %4381 = vmatmul.mubr.f32.vlgmr.msra.gmra.mrb[14].mxu0 %v2586_v25 }
 0x225   : > { %4384 = vmatpush3.xpose.msra.mxu0 %v5262_v6  ;;  %4385 = vmatprep.mubr.msk.f32.mxu0 %vm4982_vm0, %v4981_v34 }
 0x226   : > { %4398 = vmatprep.subr.mxu0 %v4981_v34 }
 0x228   : > { %4386 = vmatmul.mubr.f32.vlgmr.msra.gmra.mrb[16].mxu0 %v2587_v27 }
 0x229   : > { %4399 = vmatpush3.xpose.msra.mxu0 %v5242_v60  ;;  %4400 = vmatprep.mubr.msk.f32.mxu0 %vm4982_vm0, %v4981_v34 }
 0x22a   : > { %4403 = vmatprep.subr.mxu0 %v4981_v34 }
 0x22c   : > { %4401 = vmatmul.mubr.f32.vlgmr.msra.gmra.mrb[18].mxu0 %v2901_v29 }
 0x22d   : > { %4404 = vmatpush3.xpose.msra.mxu0 %v5262_v6  ;;  %4405 = vmatprep.mubr.msk.f32.mxu0 %vm4982_vm0, %v4981_v34 }
 0x230   : > { %4406 = vmatmul.mubr.f32.vlgmr.msra.gmra.mrb[20].mxu0 %v2902_v30 }
 0x2df   : > { %v767_v31 = vpop.f32.mrb[4].mxu1 }
 0x2e0   : > { %v4262_v32 = vpop.f32.mrb[5].mxu1  ;;  %v842_v33 = vsel %vm841_vm6, %v767_v31, -inf }
 0x2e1   : > { %843 = vmax.xlane.f32.xlu1 %v842_v33 }
 0x2e3   : > { %v837_v35 = vpop.f32.mrb[6].mxu1  ;;  %v5357_v38 = vpop.f32.mrb[4].mxu0 }
 0x2e4   : > { %v4267_v39 = vpop.f32.mrb[7].mxu1  ;;  %v4327_v40 = vpop.f32.mrb[5].mxu0  ;;  %v845_v41 = vsel %vm841_vm6, %v837_v35, -inf }
 0x2e5   : > { %846 = vmax.xlane.f32.xlu1 %v845_v41 }
 0x2e7   : > { %v935_v42 = vpop.f32.mrb[8].mxu1  ;;  %v5360_v43 = vpop.f32.mrb[6].mxu0 }
 0x2e8   : > { %v4272_v49 = vpop.f32.mrb[9].mxu1  ;;  %v4342_v50 = vpop.f32.mrb[7].mxu0  ;;  %v1009_v51 = vsel %vm841_vm6, %v935_v42, -inf }
 0x2e9   : > { %1010 = vmax.xlane.f32.xlu0 %v1009_v51 }
 0x2eb   : > { %v1005_v52 = vpop.f32.mrb[10].mxu1  ;;  %v5363_v53 = vpop.f32.mrb[8].mxu0 }
 0x2ec   : > { %v4277_v55 = vpop.f32.mrb[11].mxu1  ;;  %v4347_v57 = vpop.f32.mrb[9].mxu0  ;;  %v1012_v58 = vsel %vm841_vm6, %v1005_v52, -inf }
 0x2ed   : > { %1013 = vmax.xlane.f32.xlu0 %v1012_v58  ;;  %v1032_v58 = vmul.f32 %v5260_v5, %v5244_v61 }
 0x2ef   : > { %v5366_v59 = vpop.f32.mrb[10].mxu0 }
 0x2f0   : > { %v4362_v62 = vpop.f32.mrb[11].mxu0 }
 0x2f3   : > { %v5368_v0 = vpop.f32.mrb[12].mxu0 }
 0x2f4   : > { %v4367_v2 = vpop.f32.mrb[13].mxu0 }
 0x2f7   : > { %v5370_v3 = vpop.f32.mrb[14].mxu0 }
 0x2f8   : > { %v4382_v4 = vpop.f32.mrb[15].mxu0 }
 0x2fb   : > { %v5372_v8 = vpop.f32.mrb[16].mxu0 }
 0x2fc   : > { %v4387_v9 = vpop.f32.mrb[17].mxu0 }
 0x2fd   : > { %v864_v9 = vmul.f32 %v5232_v54, %v5291_v15 }
 0x2ff   : > { %v5374_v10 = vpop.f32.mrb[18].mxu0 }
 0x300   : > { %v4402_v11 = vpop.f32.mrb[19].mxu0 }
 0x303   : > { %v5376_v13 = vpop.f32.mrb[20].mxu0 }
 0x304   : > { %v4407_v14 = vpop.f32.mrb[21].mxu0 }
 0x305   : > { %v865_v14 = vmul.f32 %v5232_v54, %v5244_v61 }
 0x36e   : > { %v844_v17 = vpop.xlane.xlu1 %843 }
 0x36f   : > { %v848_v18 = vsub.f32 %v767_v31, %v844_v17 }
 0x371   : > { %v850_v23 = vmul.f32 1.442695, %v848_v18  ;;  %v4006_v18 = vsel %vm309_vm10, 1.0, %v4981_v34 }
 0x372   : > { %v847_v19 = vpop.xlane.xlu1 %846  ;;  %v1325_v54 = vmul.f32 0.25, %v4006_v18 }
 0x373   : > { %v849_v24 = vsub.f32 %v837_v35, %v847_v19 }
 0x374   : > { %v1326_v19 = vmul.f32 %v1325_v54, %v5239_v56 }
 0x375   : > { %v852_v29 = vmul.f32 1.442695, %v849_v24 }
 0x376   : > { %v1011_v20 = vpop.xlane.xlu0 %1010 }
 0x377   : > { %v1015_v21 = vsub.f32 %v935_v42, %v1011_v20  ;;  %v1327_v20 = vmul.f32 %v1325_v54, %v5254_v1 }
 0x379   : > { %v1017_v25 = vmul.f32 1.442695, %v1015_v21  ;;  %v1490_v21 = vmul.f32 %v4006_v18, %v5291_v15 }
 0x37a   : > { %v1014_v27 = vpop.xlane.xlu0 %1013 }
 0x37b   : > { %4790 = vpow2.f32 %v1017_v25  ;;  %v1016_v28 = vsub.f32 %v1005_v52, %v1014_v27 }
 0x37c   : > { %4792 = vpow2.f32 %v850_v23 }
 0x37d   : > { %v1019_v30 = vmul.f32 1.442695, %v1016_v28 }
 0x37f   : > { %4794 = vpow2.f32 %v1019_v30 }
 0x380   : > { %4796 = vpow2.f32 %v852_v29 }
 0x385   : > { %v4791_v32 = vpop.eup %4790 }
 0x386   : > { %v1021_v33 = vsel %vm841_vm6, %v4791_v32, 0.0  ;;  %v4793_v39 = vpop.eup %4792 }
 0x387   : > { %1022 = vadd.xlane.f32.xlu0 %v1021_v33  ;;  %v854_v40 = vsel %vm841_vm6, %v4793_v39, 0.0 }
 0x389   : > { %v4795_v31 = vpop.eup %4794 }
 0x38a   : > { %v1024_v41 = vsel %vm841_vm6, %v4795_v31, 0.0  ;;  %v4797_v35 = vpop.eup %4796 }
 0x38b   : > { %855 = vadd.xlane.f32.xlu0 %v854_v40  ;;  %1025 = vadd.xlane.f32.xlu1 %v1024_v41  ;;  %v857_v42 = vsel %vm841_vm6, %v4797_v35, 0.0 }
 0x38f   : > { %858 = vadd.xlane.f32.xlu1 %v857_v42  ;;  %v2101_v42 = vsel %vm841_vm6, %v5363_v53, -inf }
 0x414   : > { %v1023_v49 = vpop.xlane.xlu0 %1022 }
 0x415   : > { %4798 = vrcp.f32 %v1023_v49  ;;  %v2416_v49 = vsel %vm841_vm6, %v5368_v0, -inf }
 0x418   : > { %v1026_v50 = vpop.xlane.xlu1 %1025  ;;  %v856_v51 = vpop.xlane.xlu0 %855 }
 0x419   : > { %4800 = vrcp.f32 %v1026_v50  ;;  %v2731_v50 = vsel %vm841_vm6, %v5372_v8, -inf }
 0x41a   : > { %4802 = vrcp.f32 %v856_v51  ;;  %v3046_v51 = vsel %vm841_vm6, %v5376_v13, -inf }
 0x41c   : > { %v859_v52 = vpop.xlane.xlu1 %858 }
 0x41d   : > { %4804 = vrcp.f32 %v859_v52 }
 0x41f   : > { %v4799_v55 = vpop.eup %4798 }
 0x420   : > { %v1028_v57 = vmul.f32 %v4799_v55, %v4791_v32 }
 0x422   : > { %4281 = vmatmul.mubr.msk.f32.vlgmr.msra.gmra.mrb[12].mxu1 %vm841_vm6, %v1028_v57 }
 0x423   : > { %v4801_v62 = vpop.eup %4800  ;;  %4284 = vmatpush3.msra.mxu1 %v1032_v58  ;;  %4285 = vmatprep.mubr.msk.f32.mxu1 %vm4982_vm0, %v4981_v34 }
 0x424   : > { %v1030_v2 = vmul.f32 %v4801_v62, %v4795_v31  ;;  %4288 = vmatprep.subr.mxu1 %v4981_v34  ;;  %v4803_v4 = vpop.eup %4802 }
 0x425   : > { %v861_v5 = vmul.f32 %v4803_v4, %v4793_v39 }
 0x426   : > { %4286 = vmatmul.mubr.msk.f32.vlgmr.msra.gmra.mrb[14].mxu1 %vm841_vm6, %v1030_v2 }
 0x427   : > { %4289 = vmatpush3.msra.mxu1 %v864_v9  ;;  %4290 = vmatprep.mubr.msk.f32.mxu1 %vm4982_vm0, %v4981_v34  ;;  %v4805_v11 = vpop.eup %4804 }
 0x428   : > { %4293 = vmatprep.subr.mxu1 %v4981_v34  ;;  %v863_v17 = vmul.f32 %v4805_v11, %v4797_v35  ;;  %v1786_v35 = vsel %vm841_vm6, %v5357_v38, -inf  ;;  %v1491_v11 = vmul.f32 %v4006_v18, %v5244_v61 }
 0x42a   : > { %4291 = vmatmul.mubr.msk.f32.vlgmr.msra.gmra.mrb[12].mxu1 %vm841_vm6, %v861_v5 }
 0x42b   : > { %4294 = vmatpush3.msra.mxu1 %v865_v14  ;;  %4295 = vmatprep.mubr.msk.f32.mxu1 %vm4982_vm0, %v4981_v34 }
 0x42c   : > { %4298 = vmatprep.subr.mxu1 %v4981_v34 }
 0x42e   : > { %4296 = vmatmul.mubr.msk.f32.vlgmr.msra.gmra.mrb[14].mxu1 %vm841_vm6, %v863_v17 }
 0x42f   : > { %4300 = vmatprep.mubr.msk.f32.mxu1 %vm4982_vm0, %v4981_v34 }
 0x432   : > { %4299 = vmatpush3.xpose.msra.mxu1 %v5242_v60 }
 0x433   : > { %4303 = vmatprep.subr.mxu1 %v4981_v34 }
 0x435   : > { %4301 = vmatmul.mubr.f32.vlgmr.msra.gmra.mrb[16].mxu1 %v1326_v19 }
 0x436   : > { %4304 = vmatpush3.xpose.msra.mxu1 %v5262_v6  ;;  %4305 = vmatprep.mubr.msk.f32.mxu1 %vm4982_vm0, %v4981_v34 }
 0x437   : > { %4308 = vmatprep.subr.mxu1 %v4981_v34 }
 0x439   : > { %4306 = vmatmul.mubr.f32.vlgmr.msra.gmra.mrb[18].mxu1 %v1327_v20 }
 0x43a   : > { %4309 = vmatpush3.msra.mxu1 %v1490_v21  ;;  %4310 = vmatprep.mubr.msk.f32.mxu1 %vm4982_vm0, %v4981_v34 }
 0x43b   : > { %4313 = vmatprep.subr.mxu1 %v4981_v34 }
 0x508   : > { %v1394_v56 = vpop.f32.mrb[16].mxu1 }
 0x509   : > { %v4302_v23 = vpop.f32.mrb[17].mxu1  ;;  %v1468_v6 = vsel %vm841_vm6, %v1394_v56, -inf }
 0x50a   : > { %1469 = vmax.xlane.f32.xlu0 %v1468_v6 }
 0x50c   : > { %v1464_v24 = vpop.f32.mrb[18].mxu1 }
 0x50d   : > { %v4307_v25 = vpop.f32.mrb[19].mxu1  ;;  %v1471_v1 = vsel %vm841_vm6, %v1464_v24, -inf }
 0x50e   : > { %1472 = vmax.xlane.f32.xlu1 %v1471_v1 }
 0x597   : > { %v1470_v27 = vpop.xlane.xlu0 %1469 }
 0x598   : > { %v1474_v28 = vsub.f32 %v1394_v56, %v1470_v27 }
 0x59a   : > { %v1476_v29 = vmul.f32 1.442695, %v1474_v28 }
 0x59b   : > { %v1473_v30 = vpop.xlane.xlu1 %1472 }
 0x59c   : > { %4806 = vpow2.f32 %v1476_v29  ;;  %v1475_v32 = vsub.f32 %v1464_v24, %v1473_v30 }
 0x59e   : > { %v1478_v33 = vmul.f32 1.442695, %v1475_v32 }
 0x5a0   : > { %4808 = vpow2.f32 %v1478_v33 }
 0x5a6   : > { %v4807_v39 = vpop.eup %4806 }
 0x5a7   : > { %v1480_v31 = vsel %vm841_vm6, %v4807_v39, 0.0 }
 0x5a8   : > { %1481 = vadd.xlane.f32.xlu0 %v1480_v31  ;;  %v2413_v31 = vsel %vm841_vm6, %v5366_v59, -inf }
 0x5aa   : > { %v4809_v40 = vpop.eup %4808 }
 0x5ab   : > { %v1483_v41 = vsel %vm841_vm6, %v4809_v40, 0.0 }
 0x5ac   : > { %1484 = vadd.xlane.f32.xlu1 %v1483_v41  ;;  %v3043_v41 = vsel %vm841_vm6, %v5374_v10, -inf }
 0x5b0   : > { %1787 = vmax.xlane.f32.xlu1 %v1786_v35 }
 0x5b4   : > { %2102 = vmax.xlane.f32.xlu1 %v2101_v42 }
 0x5b8   : > { %2417 = vmax.xlane.f32.xlu1 %v2416_v49 }
 0x5bc   : > { %2732 = vmax.xlane.f32.xlu1 %v2731_v50 }
 0x5c0   : > { %3047 = vmax.xlane.f32.xlu1 %v3046_v51 }
 0x635   : > { %v1482_v52 = vpop.xlane.xlu0 %1481 }
 0x636   : > { %4810 = vrcp.f32 %v1482_v52 }
 0x639   : > { %v1485_v55 = vpop.xlane.xlu1 %1484 }
 0x63a   : > { %4812 = vrcp.f32 %v1485_v55 }
 0x63d   : > { %v1788_v57 = vpop.xlane.xlu1 %1787 }
 0x63e   : > { %v1790_v58 = vsub.f32 %v5357_v38, %v1788_v57 }
 0x640   : > { %v4811_v62 = vpop.eup %4810  ;;  %v1793_v2 = vmul.f32 1.442695, %v1790_v58 }
 0x641   : > { %v1487_v4 = vmul.f32 %v4811_v62, %v4807_v39  ;;  %v2103_v9 = vpop.xlane.xlu1 %2102  ;;  %v2098_v39 = vsel %vm841_vm6, %v5360_v43, -inf }
 0x642   : > { %4814 = vpow2.f32 %v1793_v2  ;;  %v2105_v5 = vsub.f32 %v5363_v53, %v2103_v9 }
 0x643   : > { %4311 = vmatmul.mubr.msk.f32.vlgmr.msra.gmra.mrb[12].mxu1 %vm841_vm6, %v1487_v4 }
 0x644   : > { %v4813_v14 = vpop.eup %4812  ;;  %v2108_v17 = vmul.f32 1.442695, %v2105_v5  ;;  %4314 = vmatpush3.msra.mxu1 %v1491_v11  ;;  %4315 = vmatprep.mubr.msk.f32.mxu1 %vm4982_vm0, %v4981_v34 }
 0x645   : > { %v1489_v54 = vmul.f32 %v4813_v14, %v4809_v40  ;;  %v2418_v19 = vpop.xlane.xlu1 %2417  ;;  %4318 = vmatprep.subr.mxu1 %v4981_v34  ;;  %v2728_v40 = vsel %vm841_vm6, %v5370_v3, -inf }
 0x646   : > { %4816 = vpow2.f32 %v2108_v17  ;;  %v2420_v38 = vsub.f32 %v5368_v0, %v2418_v19  ;;  %v1805_v0 = vmul.f32 %v5247_v63, %v5291_v15 }
 0x647   : > { %4316 = vmatmul.mubr.msk.f32.vlgmr.msra.gmra.mrb[14].mxu1 %vm841_vm6, %v1489_v54 }
 0x648   : > { %v2423_v53 = vmul.f32 1.442695, %v2420_v38  ;;  %4320 = vmatprep.mubr.msk.f32.mxu1 %vm4982_vm0, %v4981_v34 }
 0x649   : > { %v2733_v18 = vpop.xlane.xlu1 %2732 }
 0x64a   : > { %4818 = vpow2.f32 %v2423_v53  ;;  %v2735_v20 = vsub.f32 %v5372_v8, %v2733_v18  ;;  %v436_v18 = vld [vmem:[%s5095_s9 + $0x18] sm:$0xff] }
 0x64b   : > { %4319 = vmatpush3.xpose.msra.mxu1 %v5242_v60 }
 0x64c   : > { %v5447_v21 = vpop.eup %4814  ;;  %v2738_v56 = vmul.f32 1.442695, %v2735_v20  ;;  %4328 = vmatprep.subr.mxu1 %v4981_v34  ;;  %v442_v20 = vld [vmem:[%s5095_s9 + $0x48] sm:$0xff] }
 0x64d   : > { %v3048_v23 = vpop.xlane.xlu1 %3047  ;;  %v1798_v6 = vsel %vm841_vm6, %v5447_v21, 0.0 }
 0x64e   : > { %4820 = vpow2.f32 %v2738_v56  ;;  %4321 = vmatmul.mubr.f32.vlgmr.msra.gmra.mrb[20].mxu1 %v5278_v12  ;;  %v3050_v24 = vsub.f32 %v5376_v13, %v3048_v23  ;;  %1799 = vadd.xlane.f32.xlu1 %v1798_v6  ;;  %v448_v56 = vld [vmem:[%s5095_s9 + $0x78] sm:$0xff]  ;;  %v4619_v23 = vpack.c.bf16 %v442_v20, %v436_v18  ;;  %v2436_v18 = vmul.f32 %v5296_v16, %v5244_v61 }
 0x64f   : > { %4329 = vmatpush3.msra.mxu1 %v1805_v0  ;;  %4330 = vmatprep.mubr.msk.f32.mxu1 %vm4982_vm0, %v4981_v34  ;;  %v454_v0 = vld [vmem:[%s5095_s9 + $0xa8] sm:$0xff] }
 0x650   : > { %v5458_v60 = vpop.eup %4816  ;;  %v3053_v8 = vmul.f32 1.442695, %v3050_v24  ;;  %4333 = vmatprep.subr.mxu1 %v4981_v34  ;;  %v4623_v6 = vpack.c.bf16 %v454_v0, %v448_v56  ;;  %v460_v24 = vld [vmem:[%s5095_s9 + $0xd8] sm:$0xff]  ;;  %4620 = vmatprep.subr.bf16.mxu0 %v4619_v23 }
 0x651   : > { %v2113_v25 = vsel %vm841_vm6, %v5458_v60, 0.0  ;;  %4622 = vmatpush3.bf16.msra.mxu0 %v4619_v23  ;;  %v2750_v23 = vmul.f32 %v5321_v22, %v5291_v15 }
 0x652   : > { %4822 = vpow2.f32 %v3053_v8  ;;  %2114 = vadd.xlane.f32.xlu1 %v2113_v25  ;;  %v466_v8 = vld [vmem:[%s5095_s9 + $0x108] sm:$0xff]  ;;  %4624 = vmatprep.subr.bf16.mxu0 %v4623_v6 }
 0x653   : > { %v4627_v25 = vpack.c.bf16 %v466_v8, %v460_v24 }
 0x654   : > { %v5463_v1 = vpop.eup %4818 }
 0x655   : > { %v2428_v12 = vsel %vm841_vm6, %v5463_v1, 0.0  ;;  %4626 = vmatpush3.bf16.msra.mxu0 %v4623_v6 }
 0x656   : > { %2429 = vadd.xlane.f32.xlu1 %v2428_v12  ;;  %v472_v12 = vld [vmem:[%s5095_s9 + $0x138] sm:$0xff]  ;;  %4628 = vmatprep.subr.bf16.mxu0 %v4627_v25 }
 0x658   : > { %v5467_v13 = vpop.eup %4820 }
 0x659   : > { %v2743_v27 = vsel %vm841_vm6, %v5467_v13, 0.0  ;;  %4630 = vmatpush3.bf16.msra.mxu0 %v4627_v25  ;;  %v520_v25 = vld [vmem:[%s5095_s9 + $0x2b8] sm:$0xff] }
 0x65a   : > { %2744 = vadd.xlane.f32.xlu1 %v2743_v27  ;;  %v478_v27 = vld [vmem:[%s5095_s9 + $0x168] sm:$0xff] }
 0x65c   : > { %v5471_v28 = vpop.eup %4822 }
 0x65d   : > { %v3058_v29 = vsel %vm841_vm6, %v5471_v28, 0.0 }
 0x65e   : > { %3059 = vadd.xlane.f32.xlu1 %v3058_v29  ;;  %v4631_v29 = vpack.c.bf16 %v478_v27, %v472_v12  ;;  %v526_v12 = vld [vmem:[%s5095_s9 + $0x2e8] sm:$0xff] }
 0x660   : > { %4632 = vmatprep.subr.bf16.mxu0 %v4631_v29 }
 0x661   : > { %4634 = vmatpush3.bf16.msra.mxu0 %v4631_v29 }
 0x721   : > { %v1709_v30 = vpop.f32.mrb[20].mxu1 }
 0x722   : > { %v4322_v32 = vpop.f32.mrb[21].mxu1  ;;  %v1783_v33 = vsel %vm841_vm6, %v1709_v30, -inf }
 0x723   : > { %1784 = vmax.xlane.f32.xlu0 %v1783_v33  ;;  %v490_v32 = vld [vmem:[%s5095_s9 + $0x1c8] sm:$0xff] }
 0x727   : > { %2099 = vmax.xlane.f32.xlu0 %v2098_v39  ;;  %v496_v39 = vld [vmem:[%s5095_s9 + $0x1f8] sm:$0xff] }
 0x72b   : > { %2414 = vmax.xlane.f32.xlu0 %v2413_v31  ;;  %v502_v31 = vld [vmem:[%s5095_s9 + $0x228] sm:$0xff] }
 0x72f   : > { %2729 = vmax.xlane.f32.xlu0 %v2728_v40  ;;  %v4639_v40 = vpack.c.bf16 %v502_v31, %v496_v39 }
 0x733   : > { %3044 = vmax.xlane.f32.xlu0 %v3043_v41  ;;  %v508_v41 = vld [vmem:[%s5095_s9 + $0x258] sm:$0xff] }
 0x7b0   : > { %v1785_v35 = vpop.xlane.xlu0 %1784 }
 0x7b1   : > { %v1789_v42 = vsub.f32 %v1709_v30, %v1785_v35  ;;  %v484_v30 = vld [vmem:[%s5095_s9 + $0x198] sm:$0xff]  ;;  %v514_v35 = vld [vmem:[%s5095_s9 + $0x288] sm:$0xff] }
 0x7b2   : > { %v4635_v33 = vpack.c.bf16 %v490_v32, %v484_v30  ;;  %v3217_v30 = vsub.s32 6, %v5185_v36  ;;  %v5590_v32 = vld [vmem:[%s5191_s13] sm:$0xff] }
 0x7b3   : > { %v1791_v49 = vmul.f32 1.442695, %v1789_v42  ;;  %v4643_v42 = vpack.c.bf16 %v514_v35, %v508_v41 }
 0x7b4   : > { %v2100_v50 = vpop.xlane.xlu0 %2099  ;;  %4636 = vmatprep.subr.bf16.mxu0 %v4635_v33 }
 0x7b5   : > { %4824 = vpow2.f32 %v1791_v49  ;;  %v2104_v51 = vsub.f32 %v5360_v43, %v2100_v50  ;;  %4638 = vmatpush3.bf16.msra.mxu0 %v4635_v33  ;;  %v1800_v49 = vpop.xlane.xlu1 %1799  ;;  %v3218_v33 = vrot.slane %v5590_v32, %v3217_v30  ;;  %v437_v30 = vld [vmem:[%s5095_s9 + $0x20] sm:$0xff] }
 0x7b6   : > { %4640 = vmatprep.subr.bf16.mxu0 %v4639_v40 }
 0x7b7   : > { %v2106_v52 = vmul.f32 1.442695, %v2104_v51 }
 0x7b8   : > { %v2415_v55 = vpop.xlane.xlu0 %2414 }
 0x7b9   : > { %4826 = vpow2.f32 %v2106_v52  ;;  %v2419_v57 = vsub.f32 %v5366_v59, %v2415_v55  ;;  %4642 = vmatpush3.bf16.msra.mxu0 %v4639_v40  ;;  %v2115_v52 = vpop.xlane.xlu1 %2114  ;;  %v5600_v40 = vsel %vm281_vm8, 1.0, %v4981_v34 }
 0x7ba   : > { %4644 = vmatprep.subr.bf16.mxu0 %v4643_v42 }
 0x7bb   : > { %v2421_v58 = vmul.f32 1.442695, %v2419_v57 }
 0x7bc   : > { %v2730_v62 = vpop.xlane.xlu0 %2729 }
 0x7bd   : > { %4828 = vpow2.f32 %v2421_v58  ;;  %v2734_v2 = vsub.f32 %v5370_v3, %v2730_v62  ;;  %4646 = vmatpush3.bf16.msra.mxu0 %v4643_v42 }
 0x7bf   : > { %v5487_v4 = vpop.eup %4824  ;;  %v2736_v9 = vmul.f32 1.442695, %v2734_v2  ;;  %v1806_v2 = vmul.f32 %v5247_v63, %v5244_v61 }
 0x7c0   : > { %v3045_v5 = vpop.xlane.xlu0 %3044  ;;  %v1795_v11 = vsel %vm841_vm6, %v5487_v4, 0.0 }
 0x7c1   : > { %4830 = vpow2.f32 %v2736_v9  ;;  %v3049_v43 = vsub.f32 %v5374_v10, %v3045_v5  ;;  %1796 = vadd.xlane.f32.xlu0 %v1795_v11  ;;  %v2430_v5 = vpop.xlane.xlu1 %2429 }
 0x7c3   : > { %v5492_v14 = vpop.eup %4826  ;;  %v3051_v59 = vmul.f32 1.442695, %v3049_v43 }
 0x7c4   : > { %v2110_v3 = vsel %vm841_vm6, %v5492_v14, 0.0 }
 0x7c5   : > { %4832 = vpow2.f32 %v3051_v59  ;;  %2111 = vadd.xlane.f32.xlu0 %v2110_v3  ;;  %v2121_v59 = vmul.f32 %v5265_v7, %v5244_v61 }
 0x7c7   : > { %v5496_v17 = vpop.eup %4828 }
 0x7c8   : > { %v2425_v10 = vsel %vm841_vm6, %v5496_v17, 0.0 }
 0x7c9   : > { %2426 = vadd.xlane.f32.xlu0 %v2425_v10  ;;  %v2745_v10 = vpop.xlane.xlu1 %2744 }
 0x7cb   : > { %v5500_v54 = vpop.eup %4830 }
 0x7cc   : > { %v2740_v19 = vsel %vm841_vm6, %v5500_v54, 0.0 }
 0x7cd   : > { %2741 = vadd.xlane.f32.xlu0 %v2740_v19  ;;  %v2435_v19 = vmul.f32 %v5296_v16, %v5291_v15  ;;  %v3060_v56 = vpop.xlane.xlu1 %3059 }
 0x7cf   : > { %v5504_v38 = vpop.eup %4832 }
 0x7d0   : > { %v3055_v53 = vsel %vm841_vm6, %v5504_v38, 0.0 }
 0x7d1   : > { %3056 = vadd.xlane.f32.xlu0 %v3055_v53 }
 0x84e   : > { %v1797_v50 = vpop.xlane.xlu0 %1796 }
 0x84f   : > { %4834 = vrcp.f32 %v1797_v50 }
 0x850   : > { %4836 = vrcp.f32 %v1800_v49 }
 0x852   : > { %v2112_v51 = vpop.xlane.xlu0 %2111 }
 0x853   : > { %4838 = vrcp.f32 %v2112_v51 }
 0x854   : > { %4840 = vrcp.f32 %v2115_v52 }
 0x856   : > { %v2427_v58 = vpop.xlane.xlu0 %2426 }
 0x857   : > { %4842 = vrcp.f32 %v2427_v58  ;;  %v5631_v58 = vsel %vm295_vm15, 1.0, %v4981_v34 }
 0x858   : > { %4844 = vrcp.f32 %v2430_v5 }
 0x859   : > { %v4835_v55 = vpop.eup %4834 }
 0x85a   : > { %v1802_v57 = vmul.f32 %v4835_v55, %v5487_v4  ;;  %v4837_v62 = vpop.eup %4836  ;;  %v2120_v4 = vmul.f32 %v5265_v7, %v5291_v15  ;;  %v2742_v43 = vpop.xlane.xlu0 %2741 }
 0x85b   : > { %v1804_v9 = vmul.f32 %v4837_v62, %v5447_v21  ;;  %4846 = vrcp.f32 %v2742_v43 }
 0x85c   : > { %4331 = vmatmul.mubr.msk.f32.vlgmr.msra.gmra.mrb[12].mxu1 %vm841_vm6, %v1802_v57  ;;  %4848 = vrcp.f32 %v2745_v10 }
 0x85d   : > { %4334 = vmatpush3.msra.mxu1 %v1806_v2  ;;  %4335 = vmatprep.mubr.msk.f32.mxu1 %vm4982_vm0, %v4981_v34  ;;  %v4839_v11 = vpop.eup %4838 }
 0x85e   : > { %4348 = vmatprep.subr.mxu1 %v4981_v34  ;;  %v2117_v63 = vmul.f32 %v4839_v11, %v5492_v14  ;;  %v4841_v21 = vpop.eup %4840  ;;  %v3057_v53 = vpop.xlane.xlu0 %3056 }
 0x85f   : > { %v2119_v3 = vmul.f32 %v4841_v21, %v5458_v60  ;;  %4850 = vrcp.f32 %v3057_v53 }
 0x860   : > { %4336 = vmatmul.mubr.msk.f32.vlgmr.msra.gmra.mrb[14].mxu1 %vm841_vm6, %v1804_v9  ;;  %4852 = vrcp.f32 %v3060_v56 }
 0x861   : > { %4349 = vmatpush3.msra.mxu1 %v2120_v4  ;;  %4350 = vmatprep.mubr.msk.f32.mxu1 %vm4982_vm0, %v4981_v34  ;;  %v4843_v14 = vpop.eup %4842 }
 0x862   : > { %4353 = vmatprep.subr.mxu1 %v4981_v34  ;;  %v2432_v7 = vmul.f32 %v4843_v14, %v5496_v17  ;;  %v4845_v60 = vpop.eup %4844 }
 0x863   : > { %v2434_v20 = vmul.f32 %v4845_v60, %v5463_v1  ;;  %v2751_v1 = vmul.f32 %v5321_v22, %v5244_v61 }
 0x864   : > { %4351 = vmatmul.mubr.msk.f32.vlgmr.msra.gmra.mrb[12].mxu1 %vm841_vm6, %v2117_v63 }
 0x865   : > { %4354 = vmatpush3.msra.mxu1 %v2121_v59  ;;  %4355 = vmatprep.mubr.msk.f32.mxu1 %vm4982_vm0, %v4981_v34  ;;  %v4847_v17 = vpop.eup %4846 }
 0x866   : > { %4368 = vmatprep.subr.mxu1 %v4981_v34  ;;  %v2747_v16 = vmul.f32 %v4847_v17, %v5500_v54  ;;  %v4849_v0 = vpop.eup %4848  ;;  %v3065_v54 = vmul.f32 %v5339_v26, %v5291_v15 }
 0x867   : > { %v2749_v6 = vmul.f32 %v4849_v0, %v5467_v13  ;;  %v3066_v13 = vmul.f32 %v5339_v26, %v5244_v61 }
 0x868   : > { %4356 = vmatmul.mubr.msk.f32.vlgmr.msra.gmra.mrb[14].mxu1 %vm841_vm6, %v2119_v3 }
 0x869   : > { %4369 = vmatpush3.msra.mxu1 %v2435_v19  ;;  %4370 = vmatprep.mubr.msk.f32.mxu1 %vm4982_vm0, %v4981_v34  ;;  %v4851_v24 = vpop.eup %4850 }
 0x86a   : > { %4373 = vmatprep.subr.mxu1 %v4981_v34  ;;  %v3062_v22 = vmul.f32 %v4851_v24, %v5504_v38  ;;  %v4853_v8 = vpop.eup %4852  ;;  %v4647_v38 = vpack.c.bf16 %v526_v12, %v520_v25 }
 0x86b   : > { %v3064_v15 = vmul.f32 %v4853_v8, %v5471_v28 }
 0x86c   : > { %4371 = vmatmul.mubr.msk.f32.vlgmr.msra.gmra.mrb[12].mxu1 %vm841_vm6, %v2432_v7  ;;  %4648 = vmatprep.subr.bf16.mxu0 %v4647_v38 }
 0x86d   : > { %4374 = vmatpush3.msra.mxu1 %v2436_v18  ;;  %4375 = vmatprep.mubr.msk.f32.mxu1 %vm4982_vm0, %v4981_v34 }
 0x86e   : > { %4388 = vmatprep.subr.mxu1 %v4981_v34  ;;  %4650 = vmatpush3.bf16.msra.mxu0 %v4647_v38 }
 0x870   : > { %4376 = vmatmul.mubr.msk.f32.vlgmr.msra.gmra.mrb[14].mxu1 %vm841_vm6, %v2434_v20 }
 0x871   : > { %4389 = vmatpush3.msra.mxu1 %v2750_v23  ;;  %4390 = vmatprep.mubr.msk.f32.mxu1 %vm4982_vm0, %v4981_v34 }
 0x872   : > { %4393 = vmatprep.subr.mxu1 %v4981_v34 }
 0x874   : > { %4391 = vmatmul.mubr.msk.f32.vlgmr.msra.gmra.mrb[12].mxu1 %vm841_vm6, %v2747_v16 }
 0x875   : > { %4394 = vmatpush3.msra.mxu1 %v2751_v1  ;;  %4395 = vmatprep.mubr.msk.f32.mxu1 %vm4982_vm0, %v4981_v34 }
 0x876   : > { %4408 = vmatprep.subr.mxu1 %v4981_v34 }
 0x878   : > { %4396 = vmatmul.mubr.msk.f32.vlgmr.msra.gmra.mrb[14].mxu1 %vm841_vm6, %v2749_v6 }
 0x879   : > { %4409 = vmatpush3.msra.mxu1 %v3065_v54  ;;  %4410 = vmatprep.mubr.msk.f32.mxu1 %vm4982_vm0, %v4981_v34 }
 0x87a   : > { %4413 = vmatprep.subr.mxu1 %v4981_v34 }
 0x87c   : > { %4411 = vmatmul.mubr.msk.f32.vlgmr.msra.gmra.mrb[12].mxu1 %vm841_vm6, %v3062_v22 }
 0x87d   : > { %4414 = vmatpush3.msra.mxu1 %v3066_v13  ;;  %4415 = vmatprep.mubr.msk.f32.mxu1 %vm4982_vm0, %v4981_v34  ;;  %vm287_vm0 = vmand %vm285_vm7, %vm286_vm5 }
 0x87e   : > { %v5603_v41 = vsel %vm287_vm0, 1.0, %v4981_v34 }
 0x880   : > { %4416 = vmatmul.mubr.msk.f32.vlgmr.msra.gmra.mrb[14].mxu1 %vm841_vm6, %v3064_v15 }
 0x94f   : > { %v3136_v27 = vpop.f32.mrb[12].mxu1 }
 0x950   : > { %v4412_v29 = vpop.f32.mrb[13].mxu1  ;;  %4450 = vmatprep.mubr.f32.mxu0 %v3136_v27 }
 0x953   : > { %v3209_v61 = vpop.f32.mrb[14].mxu1 }
 0x954   : > { %v4417_v26 = vpop.f32.mrb[15].mxu1  ;;  %4451 = vmatmul.mubr.f32.vlgmr.msra.gmra.mrb[22].mxu0 %v3209_v61 }
 0xa27   : > { %v4452_v28 = vpop.f32.mrb[22].mxu0 }
 0xa28   : > { %v3291_v39 = vadd.f32 %v4452_v28, %v3218_v33  ;;  %v3285_v31 = vpop.f32.mrb[23].mxu0 }
 0xa29   : > { %v3286_v35 = vadd.f32 %v3285_v31, %v3218_v33  ;;  %v443_v33 = vld [vmem:[%s5095_s9 + $0x50] sm:$0xff] }
 0xa2a   : > { %v5606_v42 = vadd.f32 %v3291_v39, %v5199_v45  ;;  %v5622_v45 = vsel %vm5218_vm3, 1.0, %v4981_v34  ;;  %v4651_v28 = vpack.c.bf16 %v443_v33, %v437_v30  ;;  %v449_v39 = vld [vmem:[%s5095_s9 + $0x80] sm:$0xff]  ;;  %v455_v31 = vld [vmem:[%s5095_s9 + $0xb0] sm:$0xff] }
 0xa2b   : > { %v5609_v49 = vadd.f32 %v3286_v35, %v5197_v44  ;;  %v4655_v35 = vpack.c.bf16 %v455_v31, %v449_v39 }
 0xa2c   : > { %v3325_v50 = vmul.f32 %v5603_v41, %v5606_v42  ;;  %v3297_v51 = vmul.f32 %v5600_v40, %v5606_v42  ;;  %v3353_v44 = vmul.f32 %v5622_v45, %v5606_v42  ;;  %v3381_v47 = vmul.f32 %v5631_v58, %v5606_v42  ;;  %4652 = vmatprep.subr.bf16.mxu1 %v4651_v28 }
 0xa2d   : > { %v3324_v52 = vmul.f32 %v5603_v41, %v5609_v49  ;;  %v3296_v55 = vmul.f32 %v5600_v40, %v5609_v49  ;;  %v3352_v57 = vmul.f32 %v5622_v45, %v5609_v49  ;;  %v3380_v62 = vmul.f32 %v5631_v58, %v5609_v49  ;;  %4654 = vmatpush3.bf16.msra.mxu1 %v4651_v28 }
 0xa2e   : > { %3328 = vadd.xlane.f32.xlu1 %v3325_v50  ;;  %3300 = vadd.xlane.f32.xlu0 %v3297_v51  ;;  %v473_v51 = vld [vmem:[%s5095_s9 + $0x140] sm:$0xff] }
 0xa2f   : > { %4656 = vmatprep.subr.bf16.mxu1 %v4655_v35 }
 0xa31   : > { %4658 = vmatpush3.bf16.msra.mxu1 %v4655_v35 }
 0xa32   : > { %3326 = vadd.xlane.f32.xlu1 %v3324_v52  ;;  %3298 = vadd.xlane.f32.xlu0 %v3296_v55  ;;  %v479_v52 = vld [vmem:[%s5095_s9 + $0x170] sm:$0xff] }
 0xa33   : > { %v4663_v55 = vpack.c.bf16 %v479_v52, %v473_v51 }
 0xa36   : > { %3356 = vadd.xlane.f32.xlu1 %v3353_v44  ;;  %3354 = vadd.xlane.f32.xlu0 %v3352_v57  ;;  %v485_v44 = vld [vmem:[%s5095_s9 + $0x1a0] sm:$0xff]  ;;  %v491_v57 = vld [vmem:[%s5095_s9 + $0x1d0] sm:$0xff] }
 0xa3a   : > { %3384 = vadd.xlane.f32.xlu1 %v3381_v47  ;;  %3382 = vadd.xlane.f32.xlu0 %v3380_v62  ;;  %v4667_v47 = vpack.c.bf16 %v491_v57, %v485_v44  ;;  %v497_v62 = vld [vmem:[%s5095_s9 + $0x200] sm:$0xff] }
 0xabb   : > { %v3329_v2 = vpop.xlane.xlu1 %3328  ;;  %v3301_v9 = vpop.xlane.xlu0 %3300 }
 0xabc   : > { %v3331_v5 = vmul.f32 0.03125, %v3329_v2  ;;  %v3303_v11 = vmul.f32 0.03125, %v3301_v9  ;;  %v503_v2 = vld [vmem:[%s5095_s9 + $0x230] sm:$0xff]  ;;  %v509_v9 = vld [vmem:[%s5095_s9 + $0x260] sm:$0xff] }
 0xabe   : > { %v3333_v4 = vsub.f32 %v5606_v42, %v3331_v5  ;;  %v3305_v46 = vsub.f32 %v5606_v42, %v3303_v11  ;;  %v4671_v5 = vpack.c.bf16 %v503_v2, %v497_v62  ;;  %v515_v11 = vld [vmem:[%s5095_s9 + $0x290] sm:$0xff]  ;;  %v5709_v62 = vld [vmem:[%s5191_s13 + $0x8] sm:$0x1f] }
 0xabf   : > { %v3327_v34 = vpop.xlane.xlu1 %3326  ;;  %v3299_v63 = vpop.xlane.xlu0 %3298 }
 0xac0   : > { %v3330_v43 = vmul.f32 0.03125, %v3327_v34  ;;  %v3302_v21 = vmul.f32 0.03125, %v3299_v63  ;;  %v5640_v59 = vmul.f32 %v5603_v41, %v3333_v4  ;;  %v5643_v3 = vmul.f32 %v5600_v40, %v3305_v46  ;;  %v521_v46 = vld [vmem:[%s5095_s9 + $0x2c0] sm:$0xff]  ;;  %v527_v34 = vld [vmem:[%s5095_s9 + $0x2f0] sm:$0xff] }
 0xac1   : > { %v4675_v4 = vpack.c.bf16 %v515_v11, %v509_v9  ;;  %v4679_v63 = vpack.c.bf16 %v527_v34, %v521_v46 }
 0xac2   : > { %v3332_v10 = vsub.f32 %v5609_v49, %v3330_v43  ;;  %v3304_v14 = vsub.f32 %v5609_v49, %v3302_v21  ;;  %v3337_v19 = vmul.f32 %v5640_v59, %v5640_v59  ;;  %v3309_v7 = vmul.f32 %v5643_v3, %v5643_v3 }
 0xac3   : > { %v3357_v53 = vpop.xlane.xlu1 %3356  ;;  %v3355_v60 = vpop.xlane.xlu0 %3354 }
 0xac4   : > { %v3359_v18 = vmul.f32 0.03125, %v3357_v53  ;;  %v3358_v20 = vmul.f32 0.03125, %v3355_v60  ;;  %3340 = vadd.xlane.f32.xlu1 %v3337_v19  ;;  %3312 = vadd.xlane.f32.xlu0 %v3309_v7  ;;  %v5652_v56 = vmul.f32 %v5603_v41, %v3332_v10  ;;  %v5655_v17 = vmul.f32 %v5600_v40, %v3304_v14 }
 0xac6   : > { %v3361_v23 = vsub.f32 %v5606_v42, %v3359_v18  ;;  %v3360_v16 = vsub.f32 %v5609_v49, %v3358_v20  ;;  %v3336_v0 = vmul.f32 %v5652_v56, %v5652_v56  ;;  %v3308_v1 = vmul.f32 %v5655_v17, %v5655_v17 }
 0xac7   : > { %v3385_v6 = vpop.xlane.xlu1 %3384  ;;  %v3383_v24 = vpop.xlane.xlu0 %3382 }
 0xac8   : > { %v3387_v54 = vmul.f32 0.03125, %v3385_v6  ;;  %v3386_v22 = vmul.f32 0.03125, %v3383_v24  ;;  %3338 = vadd.xlane.f32.xlu1 %v3336_v0  ;;  %3310 = vadd.xlane.f32.xlu0 %v3308_v1  ;;  %v5664_v8 = vmul.f32 %v5622_v45, %v3361_v23  ;;  %v5667_v13 = vmul.f32 %v5622_v45, %v3360_v16 }
 0xaca   : > { %v3389_v15 = vsub.f32 %v5606_v42, %v3387_v54  ;;  %v3388_v25 = vsub.f32 %v5609_v49, %v3386_v22  ;;  %v3365_v12 = vmul.f32 %v5664_v8, %v5664_v8  ;;  %v3364_v38 = vmul.f32 %v5667_v13, %v5667_v13  ;;  %v461_v42 = vld [vmem:[%s5095_s9 + $0xe0] sm:$0xff]  ;;  %v467_v49 = vld [vmem:[%s5095_s9 + $0x110] sm:$0xff] }
 0xacb   : > { %v4659_v50 = vpack.c.bf16 %v467_v49, %v461_v42 }
 0xacc   : > { %3368 = vadd.xlane.f32.xlu1 %v3365_v12  ;;  %3366 = vadd.xlane.f32.xlu0 %v3364_v38  ;;  %v5676_v27 = vmul.f32 %v5631_v58, %v3389_v15  ;;  %v5679_v29 = vmul.f32 %v5631_v58, %v3388_v25 }
 0xacd   : > { %4660 = vmatprep.subr.bf16.mxu1 %v4659_v50 }
 0xace   : > { %v3393_v61 = vmul.f32 %v5676_v27, %v5676_v27  ;;  %v3392_v26 = vmul.f32 %v5679_v29, %v5679_v29  ;;  %4662 = vmatpush3.bf16.msra.mxu1 %v4659_v50 }
 0xacf   : > { %4664 = vmatprep.subr.bf16.mxu1 %v4663_v55 }
 0xad0   : > { %3396 = vadd.xlane.f32.xlu1 %v3393_v61  ;;  %3394 = vadd.xlane.f32.xlu0 %v3392_v26 }
 0xad2   : > { %4666 = vmatpush3.bf16.msra.mxu1 %v4663_v55  ;;  %v3410_v55 = vsub.s32 7, %v5185_v36 }
 0xad3   : > { %4668 = vmatprep.subr.bf16.mxu1 %v4667_v47 }
 0xad6   : > { %4670 = vmatpush3.bf16.msra.mxu1 %v4667_v47 }
 0xad7   : > { %4672 = vmatprep.subr.bf16.mxu1 %v4671_v5 }
 0xada   : > { %4674 = vmatpush3.bf16.msra.mxu1 %v4671_v5 }
 0xadb   : > { %4676 = vmatprep.subr.bf16.mxu1 %v4675_v4 }
 0xade   : > { %4678 = vmatpush3.bf16.msra.mxu1 %v4675_v4 }
 0xadf   : > { %4680 = vmatprep.subr.bf16.mxu1 %v4679_v63 }
 0xae2   : > { %4682 = vmatpush3.bf16.msra.mxu1 %v4679_v63 }
 0xb51   : > { %v3341_v43 = vpop.xlane.xlu1 %3340  ;;  %v3313_v21 = vpop.xlane.xlu0 %3312 }
 0xb52   : > { %v3343_v10 = vmul.f32 0.03125, %v3341_v43  ;;  %v3315_v14 = vmul.f32 0.03125, %v3313_v21  ;;  %v456_v43 = vld [vmem:[%s5095_s9 + $0xb8] sm:$0xff] }
 0xb54   : > { %v3345_v19 = vadd.f32 1e-05, %v3343_v10  ;;  %v3317_v7 = vadd.f32 1e-05, %v3315_v14  ;;  %v462_v10 = vld [vmem:[%s5095_s9 + $0xe8] sm:$0xff]  ;;  %v468_v14 = vld [vmem:[%s5095_s9 + $0x118] sm:$0xff] }
 0xb55   : > { %v3339_v53 = vpop.xlane.xlu1 %3338  ;;  %v3311_v60 = vpop.xlane.xlu0 %3310 }
 0xb56   : > { %v3342_v18 = vmul.f32 0.03125, %v3339_v53  ;;  %v3314_v20 = vmul.f32 0.03125, %v3311_v60  ;;  %4854 = vrsqrt.f32 %v3345_v19  ;;  %v4691_v19 = vpack.c.bf16 %v468_v14, %v462_v10  ;;  %v480_v53 = vld [vmem:[%s5095_s9 + $0x178] sm:$0xff] }
 0xb57   : > { %4856 = vrsqrt.f32 %v3317_v7  ;;  %v474_v7 = vld [vmem:[%s5095_s9 + $0x148] sm:$0xff] }
 0xb58   : > { %v3344_v23 = vadd.f32 1e-05, %v3342_v18  ;;  %v3316_v16 = vadd.f32 1e-05, %v3314_v20  ;;  %v4695_v60 = vpack.c.bf16 %v480_v53, %v474_v7  ;;  %v486_v18 = vld [vmem:[%s5095_s9 + $0x1a8] sm:$0xff]  ;;  %v492_v20 = vld [vmem:[%s5095_s9 + $0x1d8] sm:$0xff] }
 0xb59   : > { %v3369_v0 = vpop.xlane.xlu1 %3368  ;;  %v3367_v1 = vpop.xlane.xlu0 %3366 }
 0xb5a   : > { %4858 = vrsqrt.f32 %v3344_v23  ;;  %v3371_v6 = vmul.f32 0.03125, %v3369_v0  ;;  %v3370_v24 = vmul.f32 0.03125, %v3367_v1  ;;  %v4699_v23 = vpack.c.bf16 %v492_v20, %v486_v18  ;;  %v504_v0 = vld [vmem:[%s5095_s9 + $0x238] sm:$0xff] }
 0xb5b   : > { %4860 = vrsqrt.f32 %v3316_v16  ;;  %v498_v16 = vld [vmem:[%s5095_s9 + $0x208] sm:$0xff] }
 0xb5c   : > { %v3373_v54 = vadd.f32 1e-05, %v3371_v6  ;;  %v3372_v22 = vadd.f32 1e-05, %v3370_v24  ;;  %v4703_v1 = vpack.c.bf16 %v504_v0, %v498_v16  ;;  %v510_v6 = vld [vmem:[%s5095_s9 + $0x268] sm:$0xff]  ;;  %v516_v24 = vld [vmem:[%s5095_s9 + $0x298] sm:$0xff] }
 0xb5d   : > { %v3397_v15 = vpop.xlane.xlu1 %3396  ;;  %v3395_v25 = vpop.xlane.xlu0 %3394 }
 0xb5e   : > { %4862 = vrsqrt.f32 %v3373_v54  ;;  %v3399_v12 = vmul.f32 0.03125, %v3397_v15  ;;  %v3398_v38 = vmul.f32 0.03125, %v3395_v25  ;;  %v4707_v54 = vpack.c.bf16 %v516_v24, %v510_v6  ;;  %v528_v15 = vld [vmem:[%s5095_s9 + $0x2f8] sm:$0xff] }
 0xb5f   : > { %4864 = vrsqrt.f32 %v3372_v22  ;;  %v522_v22 = vld [vmem:[%s5095_s9 + $0x2c8] sm:$0xff] }
 0xb60   : > { %v3401_v61 = vadd.f32 1e-05, %v3399_v12  ;;  %v3400_v26 = vadd.f32 1e-05, %v3398_v38  ;;  %v4855_v30 = vpop.eup %4854  ;;  %v4711_v25 = vpack.c.bf16 %v528_v15, %v522_v22  ;;  %v3422_v12 = vsub.s32 1, %v5185_v36 }
 0xb61   : > { %v4857_v33 = vpop.eup %4856  ;;  %v3349_v31 = vmul.f32 %v4855_v30, %v5640_v59 }
 0xb62   : > { %4866 = vrsqrt.f32 %v3401_v61  ;;  %v3321_v35 = vmul.f32 %v4857_v33, %v5643_v3  ;;  %v3423_v38 = vrot.slane %v5709_v62, %v3422_v12 }
 0xb63   : > { %4868 = vrsqrt.f32 %v3400_v26 }
 0xb64   : > { %v4859_v28 = vpop.eup %4858  ;;  %v3351_v57 = vadd.f32 %v3349_v31, %v3321_v35 }
 0xb65   : > { %v4861_v39 = vpop.eup %4860  ;;  %v3348_v49 = vmul.f32 %v4859_v28, %v5652_v56  ;;  %v3411_v56 = vrot.slane %v5590_v32, %v3410_v55  ;;  %v438_v32 = vld [vmem:[%s5095_s9 + $0x28] sm:$0xff] }
 0xb66   : > { %v3320_v50 = vmul.f32 %v4861_v39, %v5655_v17 }
 0xb68   : > { %v4863_v42 = vpop.eup %4862  ;;  %v3350_v2 = vadd.f32 %v3348_v49, %v3320_v50 }
 0xb69   : > { %v4865_v51 = vpop.eup %4864  ;;  %v3377_v52 = vmul.f32 %v4863_v42, %v5664_v8 }
 0xb6a   : > { %v3376_v44 = vmul.f32 %v4865_v51, %v5667_v13  ;;  %v3417_v13 = vrot.slane %v5709_v62, %v354_v37  ;;  %v450_v37 = vld [vmem:[%s5095_s9 + $0x88] sm:$0xff] }
 0xb6b   : > { %v3379_v17 = vadd.f32 %v3377_v52, %v3351_v57  ;;  %v4687_v21 = vpack.c.bf16 %v456_v43, %v450_v37 }
 0xb6c   : > { %v4867_v47 = vpop.eup %4866  ;;  %v3378_v9 = vadd.f32 %v3376_v44, %v3350_v2 }
 0xb6d   : > { %v4869_v59 = vpop.eup %4868  ;;  %v3405_v3 = vmul.f32 %v4867_v47, %v5676_v27 }
 0xb6e   : > { %v3404_v8 = vmul.f32 %v4869_v59, %v5679_v29  ;;  %v444_v29 = vld [vmem:[%s5095_s9 + $0x58] sm:$0xff] }
 0xb6f   : > { %v3407_v5 = vadd.f32 %v3405_v3, %v3379_v17  ;;  %v4683_v63 = vpack.c.bf16 %v444_v29, %v438_v32 }
 0xb70   : > { %v3406_v11 = vadd.f32 %v3404_v8, %v3378_v9 }
 0xb71   : > { %v3413_v4 = vmul.f32 %v3411_v56, %v3407_v5  ;;  %4684 = vmatprep.subr.bf16.mxu0 %v4683_v63 }
 0xb72   : > { %v3412_v46 = vmul.f32 %v3411_v56, %v3406_v11  ;;  %4686 = vmatpush3.bf16.msra.mxu0 %v4683_v63 }
 0xb73   : > { %v5717_v34 = vadd.f32 %v3417_v13, %v3413_v4  ;;  %4688 = vmatprep.subr.bf16.mxu0 %v4687_v21 }
 0xb74   : > { %v5719_v27 = vadd.f32 %v3417_v13, %v3412_v46 }
 0xb76   : > { %4485 = vmatprep.mubr.f32.mxu1 %v5719_v27  ;;  %4690 = vmatpush3.bf16.msra.mxu0 %v4687_v21 }
 0xb77   : > { %4486 = vmatmul.mubr.f32.vlgmr.msra.gmra.mrb[22].mxu1 %v5717_v34  ;;  %4692 = vmatprep.subr.bf16.mxu0 %v4691_v19 }
 0xb7a   : > { %4694 = vmatpush3.bf16.msra.mxu0 %v4691_v19 }
 0xb7b   : > { %4696 = vmatprep.subr.bf16.mxu0 %v4695_v60 }
 0xb7e   : > { %4698 = vmatpush3.bf16.msra.mxu0 %v4695_v60 }
 0xb7f   : > { %4700 = vmatprep.subr.bf16.mxu0 %v4699_v23 }
 0xb82   : > { %4702 = vmatpush3.bf16.msra.mxu0 %v4699_v23  ;;  %v4983_v23 = vmov -1.0  }
 0xb83   : > { %4704 = vmatprep.subr.bf16.mxu0 %v4703_v1 }
 0xb86   : > { %4706 = vmatpush3.bf16.msra.mxu0 %v4703_v1 }
 0xb87   : > { %4708 = vmatprep.subr.bf16.mxu0 %v4707_v54 }
 0xb8a   : > { %4710 = vmatpush3.bf16.msra.mxu0 %v4707_v54 }
 0xb8b   : > { %4712 = vmatprep.subr.bf16.mxu0 %v4711_v25 }
 0xb8e   : > { %4714 = vmatpush3.bf16.msra.mxu0 %v4711_v25 }
 0xc4a   : > { %v4487_v61 = vpop.f32.mrb[22].mxu1 }
 0xc4b   : > { %v3496_v26 = vadd.f32 %v4487_v61, %v3423_v38  ;;  %v3490_v30 = vpop.f32.mrb[23].mxu1 }
 0xc4c   : > { %v3491_v33 = vadd.f32 %v3490_v30, %v3423_v38  ;;  %v3555_v30 = vsub.s32 2, %v5185_v36 }
 0xc4d   : > { %v3502_v28 = vmul.f32 0.70710677, %v3496_v26  ;;  %v3500_v25 = vmul.f32 0.5, %v3496_v26 }
 0xc4e   : > { %v3501_v39 = vmul.f32 0.70710677, %v3491_v33  ;;  %v3499_v22 = vmul.f32 0.5, %v3491_v33 }
 0xc4f   : > { %v3508_v31 = vand.u32 2147483647, %v3502_v28  ;;  %vm3504_vm3 = vcmp.ge.f32.partialorder %v3502_v28, 0.0  ;;  %v3556_v28 = vrot.slane %v5709_v62, %v3555_v30 }
 0xc50   : > { %v3507_v35 = vand.u32 2147483647, %v3501_v39  ;;  %vm3503_vm5 = vcmp.ge.f32.partialorder %v3501_v39, 0.0  ;;  %v3506_v16 = vsel %vm3504_vm3, 1.0, %v4983_v23 }
 0xc51   : > { %v3510_v42 = vmul.f32 0.3275911, %v3508_v31  ;;  %v3536_v52 = vmul.f32 %v3508_v31, %v3508_v31  ;;  %v3505_v6 = vsel %vm3503_vm5, 1.0, %v4983_v23 }
 0xc52   : > { %v3509_v49 = vmul.f32 0.3275911, %v3507_v35  ;;  %v3535_v55 = vmul.f32 %v3507_v35, %v3507_v35 }
 0xc53   : > { %v3512_v50 = vadd.f32 1.0, %v3510_v42  ;;  %v3538_v57 = vsub.f32 0.0, %v3536_v52 }
 0xc54   : > { %v3511_v51 = vadd.f32 1.0, %v3509_v49  ;;  %v3537_v59 = vsub.f32 0.0, %v3535_v55 }
 0xc55   : > { %4870 = vrcp.f32 %v3512_v50  ;;  %v3541_v17 = vmul.f32 1.442695, %v3538_v57 }
 0xc56   : > { %4872 = vrcp.f32 %v3511_v51  ;;  %v3539_v13 = vmul.f32 1.442695, %v3537_v59 }
 0xc57   : > { %4874 = vpow2.f32 %v3541_v17 }
 0xc58   : > { %4876 = vpow2.f32 %v3539_v13 }
 0xc5f   : > { %v4871_v44 = vpop.eup %4870 }
 0xc60   : > { %v4873_v47 = vpop.eup %4872  ;;  %v3518_v2 = vmul.f32 1.0614054, %v4871_v44 }
 0xc61   : > { %v3517_v3 = vmul.f32 1.0614054, %v4873_v47  ;;  %v4875_v19 = vpop.eup %4874 }
 0xc62   : > { %v3520_v56 = vadd.f32 -1.4531521, %v3518_v2  ;;  %v4877_v53 = vpop.eup %4876 }
 0xc63   : > { %v3519_v9 = vadd.f32 -1.4531521, %v3517_v3 }
 0xc64   : > { %v3522_v8 = vmul.f32 %v4871_v44, %v3520_v56 }
 0xc65   : > { %v3521_v5 = vmul.f32 %v4873_v47, %v3519_v9 }
 0xc66   : > { %v3524_v11 = vadd.f32 1.4214138, %v3522_v8 }
 0xc67   : > { %v3523_v4 = vadd.f32 1.4214138, %v3521_v5 }
 0xc68   : > { %v3526_v46 = vmul.f32 %v4871_v44, %v3524_v11 }
 0xc69   : > { %v3525_v32 = vmul.f32 %v4873_v47, %v3523_v4 }
 0xc6a   : > { %v3528_v29 = vadd.f32 -0.28449672, %v3526_v46 }
 0xc6b   : > { %v3527_v63 = vadd.f32 -0.28449672, %v3525_v32 }
 0xc6c   : > { %v3530_v37 = vmul.f32 %v4871_v44, %v3528_v29 }
 0xc6d   : > { %v3529_v43 = vmul.f32 %v4873_v47, %v3527_v63 }
 0xc6e   : > { %v3532_v21 = vadd.f32 0.2548296, %v3530_v37 }
 0xc6f   : > { %v3531_v10 = vadd.f32 0.2548296, %v3529_v43 }
 0xc70   : > { %v3534_v14 = vmul.f32 %v4871_v44, %v3532_v21 }
 0xc71   : > { %v3533_v7 = vmul.f32 %v4873_v47, %v3531_v10 }
 0xc72   : > { %v3544_v60 = vmul.f32 %v4875_v19, %v3534_v14 }
 0xc73   : > { %v3543_v18 = vmul.f32 %v4877_v53, %v3533_v7 }
 0xc74   : > { %v3546_v20 = vsub.f32 1.0, %v3544_v60 }
 0xc75   : > { %v3545_v0 = vsub.f32 1.0, %v3543_v18 }
 0xc76   : > { %v3548_v1 = vmul.f32 %v3546_v20, %v3506_v16 }
 0xc77   : > { %v3547_v24 = vmul.f32 %v3545_v0, %v3505_v6 }
 0xc78   : > { %v3550_v54 = vadd.f32 1.0, %v3548_v1 }
 0xc79   : > { %v3549_v15 = vadd.f32 1.0, %v3547_v24 }
 0xc7a   : > { %v3552_v61 = vmul.f32 %v3550_v54, %v3500_v25 }
 0xc7b   : > { %v3551_v38 = vmul.f32 %v3549_v15, %v3499_v22 }
 0xc7d   : > { %4520 = vmatprep.mubr.f32.mxu0 %v3551_v38 }
 0xc7e   : > { %4521 = vmatmul.mubr.f32.vlgmr.msra.gmra.mrb[24].mxu0 %v3552_v61 }
 0xd51   : > { %v4522_v39 = vpop.f32.mrb[24].mxu0 }
 0xd52   : > { %v3629_v31 = vadd.f32 %v4522_v39, %v3556_v28  ;;  %v3623_v35 = vpop.f32.mrb[25].mxu0 }
 0xd53   : > { %v3624_v42 = vadd.f32 %v3623_v35, %v3556_v28 }
 0xd54   : > { %v3633_v49 = vadd.f32 %v3629_v31, %v5717_v34 }
 0xd55   : > { %v3632_v33 = vadd.f32 %v3624_v42, %v5719_v27 }
 0xd56   : > { %v3635_v26 = vmul.f32 %v5600_v40, %v3633_v49  ;;  %v3663_v51 = vmul.f32 %v5603_v41, %v3633_v49  ;;  %v3691_v55 = vmul.f32 %v5622_v45, %v3633_v49  ;;  %v3719_v34 = vmul.f32 %v5631_v58, %v3633_v49 }
 0xd57   : > { %v3634_v50 = vmul.f32 %v5600_v40, %v3632_v33  ;;  %v3662_v52 = vmul.f32 %v5603_v41, %v3632_v33  ;;  %v3690_v44 = vmul.f32 %v5622_v45, %v3632_v33  ;;  %v3718_v27 = vmul.f32 %v5631_v58, %v3632_v33 }
 0xd58   : > { %3638 = vadd.xlane.f32.xlu1 %v3635_v26 }
 0xd59   : > { %3636 = vadd.xlane.f32.xlu0 %v3634_v50 }
 0xd5c   : > { %3666 = vadd.xlane.f32.xlu1 %v3663_v51 }
 0xd5d   : > { %3664 = vadd.xlane.f32.xlu0 %v3662_v52 }
 0xd60   : > { %3694 = vadd.xlane.f32.xlu1 %v3691_v55 }
 0xd61   : > { %3692 = vadd.xlane.f32.xlu0 %v3690_v44 }
 0xd64   : > { %3722 = vadd.xlane.f32.xlu1 %v3719_v34 }
 0xd65   : > { %3720 = vadd.xlane.f32.xlu0 %v3718_v27 }
 0xde5   : > { %v3639_v57 = vpop.xlane.xlu1 %3638 }
 0xde6   : > { %v3641_v47 = vmul.f32 0.03125, %v3639_v57  ;;  %v3637_v2 = vpop.xlane.xlu0 %3636 }
 0xde7   : > { %v3640_v59 = vmul.f32 0.03125, %v3637_v2 }
 0xde8   : > { %v3643_v3 = vsub.f32 %v3633_v49, %v3641_v47 }
 0xde9   : > { %v3642_v56 = vsub.f32 %v3632_v33, %v3640_v59  ;;  %v3667_v17 = vpop.xlane.xlu1 %3666 }
 0xdea   : > { %v3669_v9 = vmul.f32 0.03125, %v3667_v17  ;;  %v3665_v8 = vpop.xlane.xlu0 %3664  ;;  %v5758_v13 = vmul.f32 %v5600_v40, %v3643_v3 }
 0xdeb   : > { %v3668_v5 = vmul.f32 0.03125, %v3665_v8  ;;  %v5761_v11 = vmul.f32 %v5600_v40, %v3642_v56 }
 0xdec   : > { %v3671_v4 = vsub.f32 %v3633_v49, %v3669_v9  ;;  %v3647_v46 = vmul.f32 %v5758_v13, %v5758_v13 }
 0xded   : > { %v3670_v32 = vsub.f32 %v3632_v33, %v3668_v5  ;;  %v3695_v29 = vpop.xlane.xlu1 %3694  ;;  %v3646_v63 = vmul.f32 %v5761_v11, %v5761_v11 }
 0xdee   : > { %v3697_v37 = vmul.f32 0.03125, %v3695_v29  ;;  %3650 = vadd.xlane.f32.xlu1 %v3647_v46  ;;  %v3693_v43 = vpop.xlane.xlu0 %3692  ;;  %v5768_v21 = vmul.f32 %v5603_v41, %v3671_v4 }
 0xdef   : > { %v3696_v10 = vmul.f32 0.03125, %v3693_v43  ;;  %3648 = vadd.xlane.f32.xlu0 %v3646_v63  ;;  %v5771_v14 = vmul.f32 %v5603_v41, %v3670_v32 }
 0xdf0   : > { %v3699_v19 = vsub.f32 %v3633_v49, %v3697_v37  ;;  %v3675_v7 = vmul.f32 %v5768_v21, %v5768_v21 }
 0xdf1   : > { %v3698_v53 = vsub.f32 %v3632_v33, %v3696_v10  ;;  %v3723_v60 = vpop.xlane.xlu1 %3722  ;;  %v3674_v18 = vmul.f32 %v5771_v14, %v5771_v14 }
 0xdf2   : > { %v3725_v20 = vmul.f32 0.03125, %v3723_v60  ;;  %3678 = vadd.xlane.f32.xlu1 %v3675_v7  ;;  %v3721_v23 = vpop.xlane.xlu0 %3720  ;;  %v3701_v16 = vmul.f32 %v5622_v45, %v3699_v19  ;;  %v3754_v60 = vsub.s32 4, %v5185_v36 }
 0xdf3   : > { %v3724_v0 = vmul.f32 0.03125, %v3721_v23  ;;  %3676 = vadd.xlane.f32.xlu0 %v3674_v18  ;;  %v3700_v1 = vmul.f32 %v5622_v45, %v3698_v53 }
 0xdf4   : > { %v3727_v6 = vsub.f32 %v3633_v49, %v3725_v20  ;;  %v3703_v24 = vmul.f32 %v3701_v16, %v3701_v16 }
 0xdf5   : > { %v3726_v54 = vsub.f32 %v3632_v33, %v3724_v0  ;;  %v3702_v22 = vmul.f32 %v3700_v1, %v3700_v1 }
 0xdf6   : > { %3706 = vadd.xlane.f32.xlu1 %v3703_v24  ;;  %v3729_v15 = vmul.f32 %v5631_v58, %v3727_v6  ;;  %v3749_v6 = vrot.slane %v5709_v62, %v5223_v48 }
 0xdf7   : > { %3704 = vadd.xlane.f32.xlu0 %v3702_v22  ;;  %v3728_v25 = vmul.f32 %v5631_v58, %v3726_v54  ;;  %v3755_v22 = vrot.slane %v5709_v62, %v3754_v60 }
 0xdf8   : > { %v3731_v38 = vmul.f32 %v3729_v15, %v3729_v15 }
 0xdf9   : > { %v3730_v61 = vmul.f32 %v3728_v25, %v3728_v25 }
 0xdfa   : > { %3734 = vadd.xlane.f32.xlu1 %v3731_v38 }
 0xdfb   : > { %3732 = vadd.xlane.f32.xlu0 %v3730_v61 }
 0xe7b   : > { %v3651_v28 = vpop.xlane.xlu1 %3650 }
 0xe7c   : > { %v3649_v39 = vpop.xlane.xlu0 %3648  ;;  %v3653_v31 = vmul.f32 0.03125, %v3651_v28 }
 0xe7d   : > { %v3652_v35 = vmul.f32 0.03125, %v3649_v39 }
 0xe7e   : > { %v3655_v33 = vadd.f32 1e-05, %v3653_v31 }
 0xe7f   : > { %v3679_v42 = vpop.xlane.xlu1 %3678  ;;  %v3654_v52 = vadd.f32 1e-05, %v3652_v35 }
 0xe80   : > { %v3681_v26 = vmul.f32 0.03125, %v3679_v42  ;;  %v3677_v49 = vpop.xlane.xlu0 %3676 }
 0xe81   : > { %v3680_v50 = vmul.f32 0.03125, %v3677_v49 }
 0xe82   : > { %v3683_v51 = vadd.f32 1e-05, %v3681_v26 }
 0xe83   : > { %v3682_v55 = vadd.f32 1e-05, %v3680_v50  ;;  %v3707_v44 = vpop.xlane.xlu1 %3706 }
 0xe84   : > { %4878 = vrsqrt.f32 %v3683_v51  ;;  %v3709_v34 = vmul.f32 0.03125, %v3707_v44  ;;  %v3705_v27 = vpop.xlane.xlu0 %3704 }
 0xe85   : > { %4880 = vrsqrt.f32 %v3682_v55  ;;  %v3708_v57 = vmul.f32 0.03125, %v3705_v27 }
 0xe86   : > { %4882 = vrsqrt.f32 %v3655_v33  ;;  %v3711_v47 = vadd.f32 1e-05, %v3709_v34 }
 0xe87   : > { %4884 = vrsqrt.f32 %v3654_v52  ;;  %v3710_v2 = vadd.f32 1e-05, %v3708_v57  ;;  %v3735_v59 = vpop.xlane.xlu1 %3734 }
 0xe88   : > { %4886 = vrsqrt.f32 %v3711_v47  ;;  %v3737_v3 = vmul.f32 0.03125, %v3735_v59  ;;  %v3733_v56 = vpop.xlane.xlu0 %3732 }
 0xe89   : > { %4888 = vrsqrt.f32 %v3710_v2  ;;  %v3736_v17 = vmul.f32 0.03125, %v3733_v56 }
 0xe8a   : > { %v3739_v9 = vadd.f32 1e-05, %v3737_v3 }
 0xe8b   : > { %v3738_v8 = vadd.f32 1e-05, %v3736_v17 }
 0xe8c   : > { %4890 = vrsqrt.f32 %v3739_v9 }
 0xe8d   : > { %4892 = vrsqrt.f32 %v3738_v8 }
 0xe8e   : > { %v4879_v5 = vpop.eup %4878 }
 0xe8f   : > { %v4881_v4 = vpop.eup %4880  ;;  %v3687_v29 = vmul.f32 %v4879_v5, %v5768_v21 }
 0xe90   : > { %v4883_v46 = vpop.eup %4882  ;;  %v3686_v37 = vmul.f32 %v4881_v4, %v5771_v14 }
 0xe91   : > { %v4885_v32 = vpop.eup %4884  ;;  %v3659_v10 = vmul.f32 %v4883_v46, %v5758_v13 }
 0xe92   : > { %v4887_v63 = vpop.eup %4886  ;;  %v3658_v7 = vmul.f32 %v4885_v32, %v5761_v11 }
 0xe93   : > { %v4889_v43 = vpop.eup %4888  ;;  %v3715_v19 = vmul.f32 %v4887_v63, %v3701_v16  ;;  %v3689_v18 = vadd.f32 %v3687_v29, %v3659_v10 }
 0xe94   : > { %v3714_v53 = vmul.f32 %v4889_v43, %v3700_v1  ;;  %v3688_v23 = vadd.f32 %v3686_v37, %v3658_v7 }
 0xe95   : > { %v3717_v21 = vadd.f32 %v3715_v19, %v3689_v18 }
 0xe96   : > { %v4891_v20 = vpop.eup %4890  ;;  %v3716_v54 = vadd.f32 %v3714_v53, %v3688_v23 }
 0xe97   : > { %v4893_v0 = vpop.eup %4892  ;;  %v3743_v24 = vmul.f32 %v4891_v20, %v3729_v15 }
 0xe98   : > { %v3742_v14 = vmul.f32 %v4893_v0, %v3728_v25 }
 0xe99   : > { %v3745_v13 = vadd.f32 %v3743_v24, %v3717_v21 }
 0xe9a   : > { %v3744_v16 = vadd.f32 %v3742_v14, %v3716_v54 }
 0xe9b   : > { %v3751_v38 = vmul.f32 %v3749_v6, %v3745_v13 }
 0xe9c   : > { %v3750_v11 = vmul.f32 %v3749_v6, %v3744_v16 }
 0xe9d   : > { %v3757_v1 = vadd.f32 %v3755_v22, %v3751_v38 }
 0xe9e   : > { %v3756_v61 = vadd.f32 %v3755_v22, %v3750_v11 }
 0xe9f   : > { %v3759_v28 = vmul.f32 %v5600_v40, %v3757_v1  ;;  %v3787_v48 = vmul.f32 %v5603_v41, %v3757_v1  ;;  %v3815_v62 = vmul.f32 %v5622_v45, %v3757_v1  ;;  %v3843_v31 = vmul.f32 %v5631_v58, %v3757_v1 }
 0xea0   : > { %v3758_v39 = vmul.f32 %v5600_v40, %v3756_v61  ;;  %v3786_v15 = vmul.f32 %v5603_v41, %v3756_v61  ;;  %v3814_v25 = vmul.f32 %v5622_v45, %v3756_v61  ;;  %v3842_v35 = vmul.f32 %v5631_v58, %v3756_v61 }
 0xea1   : > { %3762 = vadd.xlane.f32.xlu1 %v3759_v28 }
 0xea2   : > { %3760 = vadd.xlane.f32.xlu0 %v3758_v39 }
 0xea5   : > { %3790 = vadd.xlane.f32.xlu1 %v3787_v48 }
 0xea6   : > { %3788 = vadd.xlane.f32.xlu0 %v3786_v15 }
 0xea9   : > { %3818 = vadd.xlane.f32.xlu1 %v3815_v62 }
 0xeaa   : > { %3816 = vadd.xlane.f32.xlu0 %v3814_v25 }
 0xead   : > { %3846 = vadd.xlane.f32.xlu1 %v3843_v31 }
 0xeae   : > { %3844 = vadd.xlane.f32.xlu0 %v3842_v35 }
 0xf2e   : > { %v3763_v42 = vpop.xlane.xlu1 %3762 }
 0xf2f   : > { %v3765_v26 = vmul.f32 0.03125, %v3763_v42  ;;  %v3761_v49 = vpop.xlane.xlu0 %3760 }
 0xf30   : > { %v3764_v50 = vmul.f32 0.03125, %v3761_v49 }
 0xf31   : > { %v3767_v33 = vsub.f32 %v3757_v1, %v3765_v26 }
 0xf32   : > { %v3766_v51 = vsub.f32 %v3756_v61, %v3764_v50  ;;  %v3791_v52 = vpop.xlane.xlu1 %3790 }
 0xf33   : > { %v3793_v55 = vmul.f32 0.03125, %v3791_v52  ;;  %v3789_v44 = vpop.xlane.xlu0 %3788  ;;  %v5798_v34 = vmul.f32 %v5600_v40, %v3767_v33 }
 0xf34   : > { %v3792_v27 = vmul.f32 0.03125, %v3789_v44  ;;  %v5801_v57 = vmul.f32 %v5600_v40, %v3766_v51 }
 0xf35   : > { %v3795_v47 = vsub.f32 %v3757_v1, %v3793_v55  ;;  %v3771_v2 = vmul.f32 %v5798_v34, %v5798_v34 }
 0xf36   : > { %v3794_v59 = vsub.f32 %v3756_v61, %v3792_v27  ;;  %v3819_v3 = vpop.xlane.xlu1 %3818  ;;  %v3770_v56 = vmul.f32 %v5801_v57, %v5801_v57 }
 0xf37   : > { %v3821_v17 = vmul.f32 0.03125, %v3819_v3  ;;  %3774 = vadd.xlane.f32.xlu1 %v3771_v2  ;;  %v3817_v9 = vpop.xlane.xlu0 %3816  ;;  %v5808_v8 = vmul.f32 %v5603_v41, %v3795_v47 }
 0xf38   : > { %v3820_v5 = vmul.f32 0.03125, %v3817_v9  ;;  %3772 = vadd.xlane.f32.xlu0 %v3770_v56  ;;  %v5811_v40 = vmul.f32 %v5603_v41, %v3794_v59 }
 0xf39   : > { %v3823_v4 = vsub.f32 %v3757_v1, %v3821_v17  ;;  %v3799_v46 = vmul.f32 %v5808_v8, %v5808_v8 }
 0xf3a   : > { %v3822_v32 = vsub.f32 %v3756_v61, %v3820_v5  ;;  %v3847_v29 = vpop.xlane.xlu1 %3846  ;;  %v3798_v63 = vmul.f32 %v5811_v40, %v5811_v40 }
 0xf3b   : > { %v3849_v37 = vmul.f32 0.03125, %v3847_v29  ;;  %3802 = vadd.xlane.f32.xlu1 %v3799_v46  ;;  %v3845_v43 = vpop.xlane.xlu0 %3844  ;;  %v3825_v10 = vmul.f32 %v5622_v45, %v3823_v4  ;;  %v4911_v46 = vld [vmem:[%s5191_s13] sm:$0xff] }
 0xf3c   : > { %v3848_v19 = vmul.f32 0.03125, %v3845_v43  ;;  %3800 = vadd.xlane.f32.xlu0 %v3798_v63  ;;  %v3824_v7 = vmul.f32 %v5622_v45, %v3822_v32  ;;  %v3873_v32 = vrot.slane %v4911_v46, %v3422_v12 }
 0xf3d   : > { %v3851_v41 = vsub.f32 %v3757_v1, %v3849_v37  ;;  %v3827_v53 = vmul.f32 %v3825_v10, %v3825_v10 }
 0xf3e   : > { %v3850_v60 = vsub.f32 %v3756_v61, %v3848_v19  ;;  %v3826_v18 = vmul.f32 %v3824_v7, %v3824_v7 }
 0xf3f   : > { %3830 = vadd.xlane.f32.xlu1 %v3827_v53  ;;  %v3853_v20 = vmul.f32 %v5631_v58, %v3851_v41 }
 0xf40   : > { %3828 = vadd.xlane.f32.xlu0 %v3826_v18  ;;  %v3852_v23 = vmul.f32 %v5631_v58, %v3850_v60 }
 0xf41   : > { %v3855_v0 = vmul.f32 %v3853_v20, %v3853_v20 }
 0xf42   : > { %v3854_v6 = vmul.f32 %v3852_v23, %v3852_v23 }
 0xf43   : > { %3858 = vadd.xlane.f32.xlu1 %v3855_v0 }
 0xf44   : > { %3856 = vadd.xlane.f32.xlu0 %v3854_v6 }
 0xfc4   : > { %v3775_v21 = vpop.xlane.xlu1 %3774 }
 0xfc5   : > { %v3773_v24 = vpop.xlane.xlu0 %3772  ;;  %v3777_v54 = vmul.f32 0.03125, %v3775_v21 }
 0xfc6   : > { %v3776_v14 = vmul.f32 0.03125, %v3773_v24 }
 0xfc7   : > { %v3779_v38 = vadd.f32 1e-05, %v3777_v54 }
 0xfc8   : > { %v3803_v22 = vpop.xlane.xlu1 %3802  ;;  %v3778_v1 = vadd.f32 1e-05, %v3776_v14 }
 0xfc9   : > { %v3805_v45 = vmul.f32 0.03125, %v3803_v22  ;;  %v3801_v13 = vpop.xlane.xlu0 %3800 }
 0xfca   : > { %v3804_v16 = vmul.f32 0.03125, %v3801_v13 }
 0xfcb   : > { %v3807_v11 = vadd.f32 1e-05, %v3805_v45 }
 0xfcc   : > { %v3806_v61 = vadd.f32 1e-05, %v3804_v16  ;;  %v3831_v28 = vpop.xlane.xlu1 %3830 }
 0xfcd   : > { %4894 = vrsqrt.f32 %v3807_v11  ;;  %v3833_v39 = vmul.f32 0.03125, %v3831_v28  ;;  %v3829_v58 = vpop.xlane.xlu0 %3828 }
 0xfce   : > { %4896 = vrsqrt.f32 %v3806_v61  ;;  %v3832_v48 = vmul.f32 0.03125, %v3829_v58 }
 0xfcf   : > { %4898 = vrsqrt.f32 %v3779_v38  ;;  %v3835_v15 = vadd.f32 1e-05, %v3833_v39 }
 0xfd0   : > { %4900 = vrsqrt.f32 %v3778_v1  ;;  %v3834_v62 = vadd.f32 1e-05, %v3832_v48  ;;  %v3859_v25 = vpop.xlane.xlu1 %3858 }
 0xfd1   : > { %4902 = vrsqrt.f32 %v3835_v15  ;;  %v3861_v31 = vmul.f32 0.03125, %v3859_v25  ;;  %v3857_v35 = vpop.xlane.xlu0 %3856 }
 0xfd2   : > { %4904 = vrsqrt.f32 %v3834_v62  ;;  %v3860_v42 = vmul.f32 0.03125, %v3857_v35 }
 0xfd3   : > { %v3863_v26 = vadd.f32 1e-05, %v3861_v31 }
 0xfd4   : > { %v3862_v49 = vadd.f32 1e-05, %v3860_v42 }
 0xfd5   : > { %4906 = vrsqrt.f32 %v3863_v26 }
 0xfd6   : > { %4908 = vrsqrt.f32 %v3862_v49 }
 0xfd7   : > { %v4895_v50 = vpop.eup %4894 }
 0xfd8   : > { %v4897_v33 = vpop.eup %4896  ;;  %v3811_v55 = vmul.f32 %v4895_v50, %v5808_v8 }
 0xfd9   : > { %v4899_v51 = vpop.eup %4898  ;;  %v3810_v27 = vmul.f32 %v4897_v33, %v5811_v40 }
 0xfda   : > { %v4901_v52 = vpop.eup %4900  ;;  %v3783_v2 = vmul.f32 %v4899_v51, %v5798_v34  ;;  %v3879_v34 = vrot.slane %v4911_v46, %v3555_v30 }
 0xfdb   : > { %v4903_v44 = vpop.eup %4902  ;;  %v3782_v3 = vmul.f32 %v4901_v52, %v5801_v57 }
 0xfdc   : > { %v4905_v47 = vpop.eup %4904  ;;  %v3839_v59 = vmul.f32 %v4903_v44, %v3825_v10  ;;  %v3813_v17 = vadd.f32 %v3811_v55, %v3783_v2 }
 0xfdd   : > { %v3838_v56 = vmul.f32 %v4905_v47, %v3824_v7  ;;  %v3812_v5 = vadd.f32 %v3810_v27, %v3782_v3 }
 0xfde   : > { %v3841_v8 = vadd.f32 %v3839_v59, %v3813_v17 }
 0xfdf   : > { %v4907_v9 = vpop.eup %4906  ;;  %v3840_v63 = vadd.f32 %v3838_v56, %v3812_v5 }
 0xfe0   : > { %v4909_v4 = vpop.eup %4908  ;;  %v3867_v29 = vmul.f32 %v4907_v9, %v3853_v20 }
 0xfe1   : > { %v3866_v40 = vmul.f32 %v4909_v4, %v3852_v23 }
 0xfe2   : > { %v3869_v37 = vadd.f32 %v3867_v29, %v3841_v8 }
 0xfe3   : > { %v3868_v43 = vadd.f32 %v3866_v40, %v3840_v63 }
 0xfe4   : > { %v3875_v57 = vmul.f32 %v3873_v32, %v3869_v37 }
 0xfe5   : > { %v3874_v10 = vmul.f32 %v3873_v32, %v3868_v43 }
 0xfe6   : > { %v3881_v19 = vadd.f32 %v3879_v34, %v3875_v57 }
 0xfe7   : > { %v3880_v7 = vadd.f32 %v3879_v34, %v3874_v10 }
 0xfe8   : > { %3883 = vst [vmem:[%s277_s21 + $0x8] sm:$0xff] %v3881_v19 }
 0xfe9   : > { %3882 = vst [vmem:[%s277_s21] sm:$0xff] %v3880_v7 }
 0xfea PF: > { %p14_p7 = scmp.ge.s32.totalorder %s5031_s20, 4   ;;  %s5857_s15 = smov %s4968_s16 }
 0xfeb   : > { %s5858_s16 = smov %s4972_s17  ;;  %s5859_s17 = smov %s5041_s23 }
 0xfec   : > { %s5860_s18 = smov %s5031_s20  ;;  %16 = sbr.rel (!%p14_p7) target bundleno = 3 (0x3), region = 85 }
 0xff3   :  { %3905 = vsyncpa [#allocation3], 1 }
 0xff4   :  { %3907 = vsyncpa [#allocation3 + $0x1], 1 }

</bundles_post_ra>
